<compile_context>
chip_gen: v7x
topology: tpu7x:2x2x1
jax: 0.10.0
libtpu: 0.0.40
codegen_flags: <defaults>
</compile_context>

<pallas_src>
import functools

import jax
import jax.numpy as jnp
from jax.experimental import pallas as pl
from jax.experimental.pallas import tpu as pltpu


LANES = 128            # lane-dense channel padding for all kernel tensors
KSIZE = 5              # conv kernel size
C1, C2 = 32, 64        # real output channels of conv1 / conv2
K1 = 32                # conv1 im2col K (25 taps padded to 32)
WPAD1 = 32             # conv1 padded width (W=28 -> 32)
WPAD2 = 24             # conv2 padded width (W=14 needs >=18; 24 keeps mult-of-8)
HP2 = 14 + KSIZE       # conv2 padded height (2 top + 14 + 3 bottom = 19)
FC1_K = 7 * 7 * C2     # 3136
FC1_TK, FC1_TN = 640, 512
FC1_KP, FC1_NP = 3200, 1024   # K padded to 5*640 (2% zeros, not 12.5%), N to 1024


def _round_up(x, m):
    return (x + m - 1) // m * m


# ----------------------------------------------------------------------------
# Fused conv('same', 5x5) + bias + ReLU + 2x2/stride-2 max-pool kernel.
# One image per grid step; the conv is a sum of `len(offsets)` shifted-window
# matmuls computed chunk-by-chunk (pl.loop) so each accumulator chunk stays in
# vregs through bias/ReLU/pool, instead of spilling a (HW,128) f32 buffer.
# Optionally zero-pads its own output so it can be the *next* conv's
# row-flattened padded input (layer-boundary fusion).
# ----------------------------------------------------------------------------
def _conv_relu_pool_kernel(x_ref, w_ref, b_ref, o_ref, scr_ref, *,
                           WPAD, W2, offsets, hb, n_chunks,
                           out_row_off, out_col_off, zero_border):
    # x_ref : (1, R, K)        f32   row-flattened (padded) input rows
    # w_ref : (T, K, 128)      bf16  per-tap weights (Cout zero-padded)
    # b_ref : (1, 128)         f32
    # o_ref : (1, Ho, Wo, 128)       pooled output (maybe padded for next layer)
    # scr_ref:(hb/2 * WPAD,128) f32  per-chunk scratch for the width pool
    Cp = o_ref.shape[-1]
    rows = hb * WPAD               # flattened conv-output rows per chunk
    hb2 = hb // 2                  # pooled rows produced per chunk
    half = (hb2 * WPAD) // 2

    if zero_border:                # border of the next layer's padded layout
        o_ref[...] = jnp.zeros_like(o_ref)

    bias = b_ref[...]              # (1, 128) f32

    @pl.loop(0, n_chunks)
    def _chunk(c):
        base = pl.multiple_of(c * rows, 8)
        # Shift-and-accumulate taps; acc (rows,128) f32 is only a few vregs.
        acc = jnp.zeros((rows, Cp), jnp.float32)
        for t, off in enumerate(offsets):
            xt = x_ref[0, pl.ds(base + off, rows), :]          # (rows, K) f32
            acc = acc + jnp.dot(xt.astype(jnp.bfloat16), w_ref[t],
                                preferred_element_type=jnp.float32)

        y = jnp.maximum(acc + bias, 0.0)                       # bias + ReLU

        # 2x2 / stride-2 max pool, fused before the store.
        y = y.reshape(hb2, 2 * WPAD, Cp)                       # layout-preserving
        rows_h = jnp.maximum(y[:, :WPAD, :], y[:, WPAD:, :])   # pool along H
        scr_ref[...] = rows_h.reshape(hb2 * WPAD, Cp)
        even = scr_ref[pl.ds(0, half, stride=2), :]            # cols 0,2,4,...
        odd = scr_ref[pl.ds(1, half, stride=2), :]             # cols 1,3,5,...
        pooled = jnp.maximum(even, odd).reshape(hb2, WPAD // 2, Cp)[:, :W2, :]

        o_ref[0, pl.ds(out_row_off + c * hb2, hb2),
              pl.ds(out_col_off, W2), :] = pooled.astype(o_ref.dtype)


def _conv_layer(x_flat, w_tap, b_pad, *, H, W, WPAD, offsets, hb,
                out_hw, out_off, zero_border, out_dtype):
    """x_flat: (B, R, K) f32; w_tap: (T, K, 128) bf16; b_pad: (1, 128) f32."""
    B, R, K = x_flat.shape
    T = len(offsets)
    assert H % hb == 0 and hb % 2 == 0 and W % 2 == 0 and W + 4 <= WPAD + 2
    Ho, Wo = out_hw
    kernel = functools.partial(
        _conv_relu_pool_kernel, WPAD=WPAD, W2=W // 2, offsets=offsets, hb=hb,
        n_chunks=H // hb, out_row_off=out_off[0], out_col_off=out_off[1],
        zero_border=zero_border)
    return pl.pallas_call(
        kernel,
        out_shape=jax.ShapeDtypeStruct((B, Ho, Wo, LANES), out_dtype),
        grid_spec=pltpu.PrefetchScalarGridSpec(
            num_scalar_prefetch=0,
            grid=(B,),
            in_specs=[
                pl.BlockSpec((1, R, K), lambda b: (b, 0, 0)),
                pl.BlockSpec((T, K, LANES), lambda b: (0, 0, 0)),
                pl.BlockSpec((1, LANES), lambda b: (0, 0)),
            ],
            out_specs=pl.BlockSpec((1, Ho, Wo, LANES), lambda b: (b, 0, 0, 0)),
            scratch_shapes=[pltpu.VMEM(((hb // 2) * WPAD, LANES), jnp.float32)],
        ),
        compiler_params=pltpu.CompilerParams(
            dimension_semantics=("parallel",)),
    )(x_flat, w_tap, b_pad)


def _im2col_conv1(x_nhwc):
    """Tiny 5x5 im2col for the single-channel first conv: (B,28,28,1) ->
    (B, 28*WPAD1, 32) f32; columns w >= 28 and taps >= 25 are zero."""
    B, H, W, _ = x_nhwc.shape
    xp = jnp.pad(x_nhwc[..., 0], ((0, 0), (2, 2), (2, 2)))
    cols = [xp[:, kh:kh + H, kw:kw + W]
            for kh in range(KSIZE) for kw in range(KSIZE)]
    xcol = jnp.stack(cols, axis=-1)                               # (B, H, W, 25)
    xcol = jnp.pad(xcol, ((0, 0), (0, 0), (0, WPAD1 - W), (0, K1 - KSIZE * KSIZE)))
    return xcol.reshape(B, H * WPAD1, K1)


# ----------------------------------------------------------------------------
# Tiled matmul + bias kernel for fc1: bf16 MXU operands, f32 VMEM accumulator,
# init on k==0, finalize (bias / cast / store) on the last K step.
# ----------------------------------------------------------------------------
def _linear_kernel(x_ref, w_ref, b_ref, o_ref, acc_ref):
    @pl.when(pl.program_id(2) == 0)
    def _init():
        acc_ref[...] = jnp.zeros_like(acc_ref)

    acc_ref[...] += jnp.dot(x_ref[...], w_ref[...],
                            preferred_element_type=jnp.float32)

    @pl.when(pl.program_id(2) == pl.num_programs(2) - 1)
    def _finalize():
        o_ref[...] = (acc_ref[...] + b_ref[...]).astype(o_ref.dtype)


def pallas_linear(x, w_pad, b_pad, *, tm=8, tn=FC1_TN, tk=FC1_TK,
                  out_dtype=jnp.bfloat16):
    """y = x @ w_pad + b_pad.  Weights/bias are PRE-padded & pre-cast (one-time
    prep); only the tiny activation is padded here.  Returns (M, Np)."""
    M, K = x.shape
    Kp, Np = w_pad.shape
    Mp = _round_up(max(M, 1), tm)
    assert Kp % tk == 0 and Np % tn == 0 and Kp >= K
    xp = jnp.pad(x.astype(jnp.bfloat16), ((0, Mp - M), (0, Kp - K)))

    grid = (Mp // tm, Np // tn, Kp // tk)
    out = pl.pallas_call(
        _linear_kernel,
        out_shape=jax.ShapeDtypeStruct((Mp, Np), out_dtype),
        grid_spec=pltpu.PrefetchScalarGridSpec(
            num_scalar_prefetch=0,
            grid=grid,
            in_specs=[
                pl.BlockSpec((tm, tk), lambda i, j, k: (i, k)),
                pl.BlockSpec((tk, tn), lambda i, j, k: (k, j)),
                pl.BlockSpec((1, tn), lambda i, j, k: (0, j)),
            ],
            out_specs=pl.BlockSpec((tm, tn), lambda i, j, k: (i, j)),
            scratch_shapes=[pltpu.VMEM((tm, tn), jnp.float32)],
        ),
        compiler_params=pltpu.CompilerParams(
            dimension_semantics=("parallel", "parallel", "arbitrary")),
    )(xp, w_pad, b_pad)
    return out[:M]


# ----------------------------------------------------------------------------
# One-time parameter formatting (runs OUTSIDE the jitted forward).
# ----------------------------------------------------------------------------
def prepare_params(params):
    # conv1: (5,5,1,32) -> (1, 32, 128) bf16 (taps padded 25->32, Cout ->128).
    w1 = params["w1"].reshape(KSIZE * KSIZE, C1)
    w1 = jnp.pad(w1, ((0, K1 - KSIZE * KSIZE), (0, LANES - C1)))
    w1 = w1.reshape(1, K1, LANES).astype(jnp.bfloat16)
    b1 = jnp.pad(params["b1"], (0, LANES - C1)).astype(jnp.float32).reshape(1, LANES)

    # conv2: (5,5,32,64) -> (25, 128, 128) bf16 (Cin/Cout zero-padded).
    w2 = params["w2"].reshape(KSIZE * KSIZE, C1, C2)
    w2 = jnp.pad(w2, ((0, 0), (0, LANES - C1), (0, LANES - C2))).astype(jnp.bfloat16)
    b2 = jnp.pad(params["b2"], (0, LANES - C2)).astype(jnp.float32).reshape(1, LANES)

    # fc1: permute rows from NCHW-flatten order (c*49 + h*7 + w) to the NHWC
    # order the conv kernel emits (h*7*64 + w*64 + c); pad K->3200, N->1024.
    K, N = params["wfc1"].shape
    wfc1 = params["wfc1"].reshape(C2, 7, 7, N).transpose(1, 2, 0, 3).reshape(K, N)
    wfc1 = jnp.pad(wfc1, ((0, FC1_KP - K), (0, FC1_NP - N))).astype(jnp.bfloat16)
    bfc1 = jnp.pad(params["bfc1"], (0, FC1_NP - N)).astype(jnp.float32).reshape(1, FC1_NP)

    # fc2: pad rows 1000->1024 (fc1's padded hidden columns are exactly zero).
    wfc2 = jnp.pad(params["wfc2"], ((0, FC1_NP - N), (0, 0))).astype(jnp.bfloat16)
    bfc2 = params["bfc2"].astype(jnp.float32)

    return dict(w1=w1, b1=b1, w2=w2, b2=b2,
                wfc1=wfc1, bfc1=bfc1, wfc2=wfc2, bfc2=bfc2)


# ----------------------------------------------------------------------------
# Forward pass (semantics of ConvNet.forward, eval mode).
# ----------------------------------------------------------------------------
def convnet_forward(pp, x_nchw):
    x = jnp.transpose(x_nchw, (0, 2, 3, 1)).astype(jnp.float32)   # NCHW -> NHWC
    B = x.shape[0]
    assert x.shape[1:] == (28, 28, 1), "fc1 = 7*7*64 requires 28x28x1 input"

    # layer1: conv(1->32) + ReLU + pool, as one MXU matmul per row chunk over
    # a tiny wrapper-built im2col; the output is written straight into
    # layer2's zero-padded, row-flattened input layout.
    xcol = _im2col_conv1(x)                                       # (B, 896, 32)
    out1 = _conv_layer(xcol, pp["w1"], pp["b1"],
                       H=28, W=28, WPAD=WPAD1, offsets=(0,), hb=4,
                       out_hw=(HP2, WPAD2), out_off=(2, 2),
                       zero_border=True, out_dtype=jnp.float32)
    x2 = out1.reshape(B, HP2 * WPAD2, LANES)                      # free reshape

    # layer2: conv(32->64) + ReLU + pool, 25 shifted-window matmuls per chunk.
    offs2 = tuple(kh * WPAD2 + kw for kh in range(KSIZE) for kw in range(KSIZE))
    out2 = _conv_layer(x2, pp["w2"], pp["b2"],
                       H=14, W=14, WPAD=WPAD2, offsets=offs2, hb=2,
                       out_hw=(7, 7), out_off=(0, 0),
                       zero_border=False, out_dtype=jnp.bfloat16)

    # Flatten stays in NHWC order (wfc1's rows were permuted at prep time).
    flat = out2[..., :C2].reshape(B, FC1_K)                       # (B, 3136) bf16
    # TODO(synk): nn.Dropout() (p=0.5, train mode) is stochastic; treated as
    # eval-mode identity here for a deterministic kernel.

    h = pallas_linear(flat, pp["wfc1"], pp["bfc1"],
                      tm=8, tn=FC1_TN, tk=FC1_TK,
                      out_dtype=jnp.bfloat16)                     # (B, 1024)
    # fc2 is ~20 KB of weights: a pallas_call launch costs more than the
    # compute, so leave it to XLA (review recommendation).
    logits = jnp.dot(h, pp["wfc2"], preferred_element_type=jnp.float32) + pp["bfc2"]
    return logits


# ----------------------------------------------------------------------------
# Deterministic parameter init (PyTorch-style uniform(-1/sqrt(fan_in), ...)).
# ----------------------------------------------------------------------------
def init_params(key, num_classes):
    ks = jax.random.split(key, 8)

    def u(k, shape, fan_in):
        bound = 1.0 / (fan_in ** 0.5)
        return jax.random.uniform(k, shape, jnp.float32, -bound, bound)

    return {
        "w1": u(ks[0], (5, 5, 1, C1), 5 * 5 * 1),            # HWIO
        "b1": u(ks[1], (C1,), 5 * 5 * 1),
        "w2": u(ks[2], (5, 5, C1, C2), 5 * 5 * C1),
        "b2": u(ks[3], (C2,), 5 * 5 * C1),
        "wfc1": u(ks[4], (FC1_K, 1000), FC1_K),              # (in, out)
        "bfc1": u(ks[5], (1000,), FC1_K),
        "wfc2": u(ks[6], (1000, num_classes), 1000),
        "bfc2": u(ks[7], (num_classes,), 1000),
    }


if __name__ == "__main__":
    key = jax.random.PRNGKey(0)
    kx, kp = jax.random.split(key)

    num_classes = 10          # e.g. np.unique(y).shape[0] for MNIST labels
    batch = 2
    # Input is NCHW like the PyTorch module; 28x28 is required by fc1 = 7*7*64.
    x = jax.random.normal(kx, (batch, 1, 28, 28), dtype=jnp.float32)
    params = init_params(kp, num_classes)

    prepped = prepare_params(params)          # one-time weight formatting
    fwd = jax.jit(convnet_forward)
    logits = fwd(prepped, x)
    jax.block_until_ready(logits)

    assert logits.shape == (batch, num_classes)
    assert logits.dtype == jnp.float32
    print("KERNEL_OK")
</pallas_src>

<mosaic_0001>
module attributes {stable_mosaic.version = 11 : i64} {
  func.func @_conv_relu_pool_kernel(%arg0: i32, %arg1: memref<1x896x32xf32, #tpu.memory_space<vmem>>, %arg2: memref<1x32x128xbf16, #tpu.memory_space<vmem>>, %arg3: memref<1x128xf32, #tpu.memory_space<vmem>>, %arg4: memref<1x19x24x128xf32, #tpu.memory_space<vmem>>, %arg5: memref<64x128xf32, #tpu.memory_space<vmem>>) attributes {dimension_semantics = [#tpu.dimension_semantics<parallel>], iteration_bounds = array<i64: 2>, scalar_prefetch = 0 : i64, scratch_operands = 1 : i64, tpu.core_type = #tpu.core_type<tc>, window_params = [{transform_indices = @transform_0, window_bounds = array<i64: 1, 896, 32>}, {pipeline_mode = #tpu.pipeline_mode<synchronous>, transform_indices = @transform_1, window_bounds = array<i64: 1, 32, 128>}, {pipeline_mode = #tpu.pipeline_mode<synchronous>, transform_indices = @transform_2, window_bounds = array<i64: 1, 128>}, {transform_indices = @transform_3, window_bounds = array<i64: 1, 19, 24, 128>}]} {
    %cst = arith.constant 0.000000e+00 : f32
    %0 = vector.broadcast %cst : f32 to vector<1x19x24x128xf32>
    %c0 = arith.constant 0 : index
    %c0_0 = arith.constant 0 : index
    %c0_1 = arith.constant 0 : index
    %c0_2 = arith.constant 0 : index
    %1 = vector.load %arg4[%c0, %c0_0, %c0_1, %c0_2] : memref<1x19x24x128xf32, #tpu.memory_space<vmem>>, vector<1x19x24x128xf32>
    tpu.vector_store %arg4[%c0, %c0_0, %c0_1, %c0_2], %0 {strides = array<i32>} : memref<1x19x24x128xf32, #tpu.memory_space<vmem>>, vector<1x19x24x128xf32>,
    %c0_3 = arith.constant 0 : index
    %c0_4 = arith.constant 0 : index
    %2 = vector.load %arg3[%c0_3, %c0_4] : memref<1x128xf32, #tpu.memory_space<vmem>>, vector<1x128xf32>
    %c0_i32 = arith.constant 0 : i32
    %c7_i32 = arith.constant 7 : i32
    %3 = arith.addi %c0_i32, %c7_i32 : i32
    %c1_i32 = arith.constant 1 : i32
    scf.for %arg6 = %c0_i32 to %3 step %c1_i32  : i32 {
      %c1_i32_6 = arith.constant 1 : i32
      %4 = arith.muli %arg6, %c1_i32_6 : i32
      %c0_i32_7 = arith.constant 0 : i32
      %5 = arith.addi %c0_i32_7, %4 : i32
      %c128_i32 = arith.constant 128 : i32
      %6 = arith.muli %5, %c128_i32 : i32
      %7 = tpu.assume_multiple %6, 8 : i32
      %cst_8 = arith.constant 0.000000e+00 : f32
      %8 = vector.broadcast %cst_8 : f32 to vector<128x128xf32>
      %c0_i32_9 = arith.constant 0 : i32
      %9 = arith.addi %7, %c0_i32_9 : i32
      %c0_10 = arith.constant 0 : index
      %10 = arith.index_cast %9 : i32 to index
      %c0_11 = arith.constant 0 : index
      %11 = vector.load %arg1[%c0_10, %10, %c0_11] : memref<1x896x32xf32, #tpu.memory_space<vmem>>, vector<1x128x32xf32>
      %12 = vector.shape_cast %11 : vector<1x128x32xf32> to vector<128x32xf32>
      %13 = arith.truncf %12 : vector<128x32xf32> to vector<128x32xbf16>
      %c0_12 = arith.constant 0 : index
      %c0_13 = arith.constant 0 : index
      %c0_14 = arith.constant 0 : index
      %14 = vector.load %arg2[%c0_12, %c0_13, %c0_14] : memref<1x32x128xbf16, #tpu.memory_space<vmem>>, vector<1x32x128xbf16>
      %15 = vector.shape_cast %14 : vector<1x32x128xbf16> to vector<32x128xbf16>
      %cst_15 = arith.constant dense<0.000000e+00> : vector<128x128xf32>
      %16 = tpu.matmul %13, %15, %cst_15 {dimension_numbers = #tpu.dot_dimension_numbers<[1], [0], [0], [1], [0, 0, 1, 1], [], []>} : vector<128x32xbf16>, vector<32x128xbf16>, vector<128x128xf32> -> vector<128x128xf32>
      %17 = arith.addf %8, %16 : vector<128x128xf32>
      %18 = vector.broadcast %2 : vector<1x128xf32> to vector<128x128xf32>
      %19 = arith.addf %17, %18 : vector<128x128xf32>
      %cst_16 = arith.constant 0.000000e+00 : f32
      %20 = vector.broadcast %cst_16 : f32 to vector<128x128xf32>
      %21 = arith.maximumf %19, %20 : vector<128x128xf32>
      %22 = vector.shape_cast %21 : vector<128x128xf32> to vector<2x64x128xf32>
      %23 = vector.extract_strided_slice %22 {offsets = [0, 0, 0], sizes = [2, 32, 128], strides = [1, 1, 1]} : vector<2x64x128xf32> to vector<2x32x128xf32>
      %24 = vector.extract_strided_slice %22 {offsets = [0, 32, 0], sizes = [2, 32, 128], strides = [1, 1, 1]} : vector<2x64x128xf32> to vector<2x32x128xf32>
      %25 = arith.maximumf %23, %24 : vector<2x32x128xf32>
      %26 = vector.shape_cast %25 : vector<2x32x128xf32> to vector<64x128xf32>
      %c0_17 = arith.constant 0 : index
      %c0_18 = arith.constant 0 : index
      %27 = vector.load %arg5[%c0_17, %c0_18] : memref<64x128xf32, #tpu.memory_space<vmem>>, vector<64x128xf32>
      tpu.vector_store %arg5[%c0_17, %c0_18], %26 {strides = array<i32>} : memref<64x128xf32, #tpu.memory_space<vmem>>, vector<64x128xf32>,
      %c0_19 = arith.constant 0 : index
      %c0_20 = arith.constant 0 : index
      %28 = tpu.strided_load %arg5[%c0_19, %c0_20] {strides = array<i32: 2, 1>} : memref<64x128xf32, #tpu.memory_space<vmem>>, vector<32x128xf32>
      %c1 = arith.constant 1 : index
      %c0_21 = arith.constant 0 : index
      %29 = tpu.strided_load %arg5[%c1, %c0_21] {strides = array<i32: 2, 1>} : memref<64x128xf32, #tpu.memory_space<vmem>>, vector<32x128xf32>
      %30 = arith.maximumf %28, %29 : vector<32x128xf32>
      %31 = vector.shape_cast %30 : vector<32x128xf32> to vector<2x16x128xf32>
      %32 = vector.extract_strided_slice %31 {offsets = [0, 0, 0], sizes = [2, 14, 128], strides = [1, 1, 1]} : vector<2x16x128xf32> to vector<2x14x128xf32>
      %c2_i32 = arith.constant 2 : i32
      %33 = arith.muli %5, %c2_i32 : i32
      %c2_i32_22 = arith.constant 2 : i32
      %34 = arith.addi %c2_i32_22, %33 : i32
      %c0_23 = arith.constant 0 : index
      %35 = arith.index_cast %34 : i32 to index
      %c2 = arith.constant 2 : index
      %c0_24 = arith.constant 0 : index
      %36 = vector.load %arg4[%c0_23, %35, %c2, %c0_24] : memref<1x19x24x128xf32, #tpu.memory_space<vmem>>, vector<1x2x14x128xf32>
      %37 = vector.shape_cast %36 : vector<1x2x14x128xf32> to vector<2x14x128xf32>
      %38 = vector.shape_cast %32 : vector<2x14x128xf32> to vector<1x2x14x128xf32>
      tpu.vector_store %arg4[%c0_23, %35, %c2, %c0_24], %38 {strides = array<i32>} : memref<1x19x24x128xf32, #tpu.memory_space<vmem>>, vector<1x2x14x128xf32>,
    }
    %c7_i32_5 = arith.constant 7 : i32
    return
  }
  func.func @transform_0(%arg0: i32) -> (i32, i32, i32) {
    %c0_i32 = arith.constant 0 : i32
    %c0_i32_0 = arith.constant 0 : i32
    %c0_i32_1 = arith.constant 0 : i32
    return %arg0, %c0_i32, %c0_i32_0 : i32, i32, i32
  }
  func.func @transform_1(%arg0: i32) -> (i32, i32, i32) {
    %c0_i32 = arith.constant 0 : i32
    %c0_i32_0 = arith.constant 0 : i32
    %c0_i32_1 = arith.constant 0 : i32
    %c0_i32_2 = arith.constant 0 : i32
    return %c0_i32, %c0_i32_0, %c0_i32_1 : i32, i32, i32
  }
  func.func @transform_2(%arg0: i32) -> (i32, i32) {
    %c0_i32 = arith.constant 0 : i32
    %c0_i32_0 = arith.constant 0 : i32
    %c0_i32_1 = arith.constant 0 : i32
    return %c0_i32, %c0_i32_0 : i32, i32
  }
  func.func @transform_3(%arg0: i32) -> (i32, i32, i32, i32) {
    %c0_i32 = arith.constant 0 : i32
    %c0_i32_0 = arith.constant 0 : i32
    %c0_i32_1 = arith.constant 0 : i32
    %c0_i32_2 = arith.constant 0 : i32
    return %arg0, %c0_i32, %c0_i32_0, %c0_i32_1 : i32, i32, i32, i32
  }
}

module attributes {stable_mosaic.version = 11 : i64} {
  func.func @_conv_relu_pool_kernel(%arg0: i32, %arg1: memref<1x456x128xf32, #tpu.memory_space<vmem>>, %arg2: memref<25x128x128xbf16, #tpu.memory_space<vmem>>, %arg3: memref<1x128xf32, #tpu.memory_space<vmem>>, %arg4: memref<1x7x7x128xbf16, #tpu.memory_space<vmem>>, %arg5: memref<24x128xf32, #tpu.memory_space<vmem>>) attributes {dimension_semantics = [#tpu.dimension_semantics<parallel>], iteration_bounds = array<i64: 2>, scalar_prefetch = 0 : i64, scratch_operands = 1 : i64, tpu.core_type = #tpu.core_type<tc>, window_params = [{transform_indices = @transform_0, window_bounds = array<i64: 1, 456, 128>}, {pipeline_mode = #tpu.pipeline_mode<synchronous>, transform_indices = @transform_1, window_bounds = array<i64: 25, 128, 128>}, {pipeline_mode = #tpu.pipeline_mode<synchronous>, transform_indices = @transform_2, window_bounds = array<i64: 1, 128>}, {transform_indices = @transform_3, window_bounds = array<i64: 1, 7, 7, 128>}]} {
    %c0 = arith.constant 0 : index
    %c0_0 = arith.constant 0 : index
    %0 = vector.load %arg3[%c0, %c0_0] : memref<1x128xf32, #tpu.memory_space<vmem>>, vector<1x128xf32>
    %c0_i32 = arith.constant 0 : i32
    %c7_i32 = arith.constant 7 : i32
    %1 = arith.addi %c0_i32, %c7_i32 : i32
    %c1_i32 = arith.constant 1 : i32
    scf.for %arg6 = %c0_i32 to %1 step %c1_i32  : i32 {
      %c1_i32_2 = arith.constant 1 : i32
      %2 = arith.muli %arg6, %c1_i32_2 : i32
      %c0_i32_3 = arith.constant 0 : i32
      %3 = arith.addi %c0_i32_3, %2 : i32
      %c48_i32 = arith.constant 48 : i32
      %4 = arith.muli %3, %c48_i32 : i32
      %5 = tpu.assume_multiple %4, 8 : i32
      %cst = arith.constant 0.000000e+00 : f32
      %6 = vector.broadcast %cst : f32 to vector<48x128xf32>
      %c0_i32_4 = arith.constant 0 : i32
      %7 = arith.addi %5, %c0_i32_4 : i32
      %c0_5 = arith.constant 0 : index
      %8 = arith.index_cast %7 : i32 to index
      %c0_6 = arith.constant 0 : index
      %9 = vector.load %arg1[%c0_5, %8, %c0_6] : memref<1x456x128xf32, #tpu.memory_space<vmem>>, vector<1x48x128xf32>
      %10 = vector.shape_cast %9 : vector<1x48x128xf32> to vector<48x128xf32>
      %11 = arith.truncf %10 : vector<48x128xf32> to vector<48x128xbf16>
      %c0_7 = arith.constant 0 : index
      %c0_8 = arith.constant 0 : index
      %c0_9 = arith.constant 0 : index
      %12 = vector.load %arg2[%c0_7, %c0_8, %c0_9] : memref<25x128x128xbf16, #tpu.memory_space<vmem>>, vector<1x128x128xbf16>
      %13 = vector.shape_cast %12 : vector<1x128x128xbf16> to vector<128x128xbf16>
      %cst_10 = arith.constant dense<0.000000e+00> : vector<48x128xf32>
      %14 = tpu.matmul %11, %13, %cst_10 {dimension_numbers = #tpu.dot_dimension_numbers<[1], [0], [0], [1], [0, 0, 1, 1], [], []>} : vector<48x128xbf16>, vector<128x128xbf16>, vector<48x128xf32> -> vector<48x128xf32>
      %15 = arith.addf %6, %14 : vector<48x128xf32>
      %c1_i32_11 = arith.constant 1 : i32
      %16 = arith.addi %5, %c1_i32_11 : i32
      %c0_12 = arith.constant 0 : index
      %17 = arith.index_cast %16 : i32 to index
      %c0_13 = arith.constant 0 : index
      %18 = vector.load %arg1[%c0_12, %17, %c0_13] : memref<1x456x128xf32, #tpu.memory_space<vmem>>, vector<1x48x128xf32>
      %19 = vector.shape_cast %18 : vector<1x48x128xf32> to vector<48x128xf32>
      %20 = arith.truncf %19 : vector<48x128xf32> to vector<48x128xbf16>
      %c1 = arith.constant 1 : index
      %c0_14 = arith.constant 0 : index
      %c0_15 = arith.constant 0 : index
      %21 = vector.load %arg2[%c1, %c0_14, %c0_15] : memref<25x128x128xbf16, #tpu.memory_space<vmem>>, vector<1x128x128xbf16>
      %22 = vector.shape_cast %21 : vector<1x128x128xbf16> to vector<128x128xbf16>
      %cst_16 = arith.constant dense<0.000000e+00> : vector<48x128xf32>
      %23 = tpu.matmul %20, %22, %cst_16 {dimension_numbers = #tpu.dot_dimension_numbers<[1], [0], [0], [1], [0, 0, 1, 1], [], []>} : vector<48x128xbf16>, vector<128x128xbf16>, vector<48x128xf32> -> vector<48x128xf32>
      %24 = arith.addf %15, %23 : vector<48x128xf32>
      %c2_i32 = arith.constant 2 : i32
      %25 = arith.addi %5, %c2_i32 : i32
      %c0_17 = arith.constant 0 : index
      %26 = arith.index_cast %25 : i32 to index
      %c0_18 = arith.constant 0 : index
      %27 = vector.load %arg1[%c0_17, %26, %c0_18] : memref<1x456x128xf32, #tpu.memory_space<vmem>>, vector<1x48x128xf32>
      %28 = vector.shape_cast %27 : vector<1x48x128xf32> to vector<48x128xf32>
      %29 = arith.truncf %28 : vector<48x128xf32> to vector<48x128xbf16>
      %c2 = arith.constant 2 : index
      %c0_19 = arith.constant 0 : index
      %c0_20 = arith.constant 0 : index
      %30 = vector.load %arg2[%c2, %c0_19, %c0_20] : memref<25x128x128xbf16, #tpu.memory_space<vmem>>, vector<1x128x128xbf16>
      %31 = vector.shape_cast %30 : vector<1x128x128xbf16> to vector<128x128xbf16>
      %cst_21 = arith.constant dense<0.000000e+00> : vector<48x128xf32>
      %32 = tpu.matmul %29, %31, %cst_21 {dimension_numbers = #tpu.dot_dimension_numbers<[1], [0], [0], [1], [0, 0, 1, 1], [], []>} : vector<48x128xbf16>, vector<128x128xbf16>, vector<48x128xf32> -> vector<48x128xf32>
      %33 = arith.addf %24, %32 : vector<48x128xf32>
      %c3_i32 = arith.constant 3 : i32
      %34 = arith.addi %5, %c3_i32 : i32
      %c0_22 = arith.constant 0 : index
      %35 = arith.index_cast %34 : i32 to index
      %c0_23 = arith.constant 0 : index
      %36 = vector.load %arg1[%c0_22, %35, %c0_23] : memref<1x456x128xf32, #tpu.memory_space<vmem>>, vector<1x48x128xf32>
      %37 = vector.shape_cast %36 : vector<1x48x128xf32> to vector<48x128xf32>
      %38 = arith.truncf %37 : vector<48x128xf32> to vector<48x128xbf16>
      %c3 = arith.constant 3 : index
      %c0_24 = arith.constant 0 : index
      %c0_25 = arith.constant 0 : index
      %39 = vector.load %arg2[%c3, %c0_24, %c0_25] : memref<25x128x128xbf16, #tpu.memory_space<vmem>>, vector<1x128x128xbf16>
      %40 = vector.shape_cast %39 : vector<1x128x128xbf16> to vector<128x128xbf16>
      %cst_26 = arith.constant dense<0.000000e+00> : vector<48x128xf32>
      %41 = tpu.matmul %38, %40, %cst_26 {dimension_numbers = #tpu.dot_dimension_numbers<[1], [0], [0], [1], [0, 0, 1, 1], [], []>} : vector<48x128xbf16>, vector<128x128xbf16>, vector<48x128xf32> -> vector<48x128xf32>
      %42 = arith.addf %33, %41 : vector<48x128xf32>
      %c4_i32 = arith.constant 4 : i32
      %43 = arith.addi %5, %c4_i32 : i32
      %c0_27 = arith.constant 0 : index
      %44 = arith.index_cast %43 : i32 to index
      %c0_28 = arith.constant 0 : index
      %45 = vector.load %arg1[%c0_27, %44, %c0_28] : memref<1x456x128xf32, #tpu.memory_space<vmem>>, vector<1x48x128xf32>
      %46 = vector.shape_cast %45 : vector<1x48x128xf32> to vector<48x128xf32>
      %47 = arith.truncf %46 : vector<48x128xf32> to vector<48x128xbf16>
      %c4 = arith.constant 4 : index
      %c0_29 = arith.constant 0 : index
      %c0_30 = arith.constant 0 : index
      %48 = vector.load %arg2[%c4, %c0_29, %c0_30] : memref<25x128x128xbf16, #tpu.memory_space<vmem>>, vector<1x128x128xbf16>
      %49 = vector.shape_cast %48 : vector<1x128x128xbf16> to vector<128x128xbf16>
      %cst_31 = arith.constant dense<0.000000e+00> : vector<48x128xf32>
      %50 = tpu.matmul %47, %49, %cst_31 {dimension_numbers = #tpu.dot_dimension_numbers<[1], [0], [0], [1], [0, 0, 1, 1], [], []>} : vector<48x128xbf16>, vector<128x128xbf16>, vector<48x128xf32> -> vector<48x128xf32>
      %51 = arith.addf %42, %50 : vector<48x128xf32>
      %c24_i32 = arith.constant 24 : i32
      %52 = arith.addi %5, %c24_i32 : i32
      %c0_32 = arith.constant 0 : index
      %53 = arith.index_cast %52 : i32 to index
      %c0_33 = arith.constant 0 : index
      %54 = vector.load %arg1[%c0_32, %53, %c0_33] : memref<1x456x128xf32, #tpu.memory_space<vmem>>, vector<1x48x128xf32>
      %55 = vector.shape_cast %54 : vector<1x48x128xf32> to vector<48x128xf32>
      %56 = arith.truncf %55 : vector<48x128xf32> to vector<48x128xbf16>
      %c5 = arith.constant 5 : index
      %c0_34 = arith.constant 0 : index
      %c0_35 = arith.constant 0 : index
      %57 = vector.load %arg2[%c5, %c0_34, %c0_35] : memref<25x128x128xbf16, #tpu.memory_space<vmem>>, vector<1x128x128xbf16>
      %58 = vector.shape_cast %57 : vector<1x128x128xbf16> to vector<128x128xbf16>
      %cst_36 = arith.constant dense<0.000000e+00> : vector<48x128xf32>
      %59 = tpu.matmul %56, %58, %cst_36 {dimension_numbers = #tpu.dot_dimension_numbers<[1], [0], [0], [1], [0, 0, 1, 1], [], []>} : vector<48x128xbf16>, vector<128x128xbf16>, vector<48x128xf32> -> vector<48x128xf32>
      %60 = arith.addf %51, %59 : vector<48x128xf32>
      %c25_i32 = arith.constant 25 : i32
      %61 = arith.addi %5, %c25_i32 : i32
      %c0_37 = arith.constant 0 : index
      %62 = arith.index_cast %61 : i32 to index
      %c0_38 = arith.constant 0 : index
      %63 = vector.load %arg1[%c0_37, %62, %c0_38] : memref<1x456x128xf32, #tpu.memory_space<vmem>>, vector<1x48x128xf32>
      %64 = vector.shape_cast %63 : vector<1x48x128xf32> to vector<48x128xf32>
      %65 = arith.truncf %64 : vector<48x128xf32> to vector<48x128xbf16>
      %c6 = arith.constant 6 : index
      %c0_39 = arith.constant 0 : index
      %c0_40 = arith.constant 0 : index
      %66 = vector.load %arg2[%c6, %c0_39, %c0_40] : memref<25x128x128xbf16, #tpu.memory_space<vmem>>, vector<1x128x128xbf16>
      %67 = vector.shape_cast %66 : vector<1x128x128xbf16> to vector<128x128xbf16>
      %cst_41 = arith.constant dense<0.000000e+00> : vector<48x128xf32>
      %68 = tpu.matmul %65, %67, %cst_41 {dimension_numbers = #tpu.dot_dimension_numbers<[1], [0], [0], [1], [0, 0, 1, 1], [], []>} : vector<48x128xbf16>, vector<128x128xbf16>, vector<48x128xf32> -> vector<48x128xf32>
      %69 = arith.addf %60, %68 : vector<48x128xf32>
      %c26_i32 = arith.constant 26 : i32
      %70 = arith.addi %5, %c26_i32 : i32
      %c0_42 = arith.constant 0 : index
      %71 = arith.index_cast %70 : i32 to index
      %c0_43 = arith.constant 0 : index
      %72 = vector.load %arg1[%c0_42, %71, %c0_43] : memref<1x456x128xf32, #tpu.memory_space<vmem>>, vector<1x48x128xf32>
      %73 = vector.shape_cast %72 : vector<1x48x128xf32> to vector<48x128xf32>
      %74 = arith.truncf %73 : vector<48x128xf32> to vector<48x128xbf16>
      %c7 = arith.constant 7 : index
      %c0_44 = arith.constant 0 : index
      %c0_45 = arith.constant 0 : index
      %75 = vector.load %arg2[%c7, %c0_44, %c0_45] : memref<25x128x128xbf16, #tpu.memory_space<vmem>>, vector<1x128x128xbf16>
      %76 = vector.shape_cast %75 : vector<1x128x128xbf16> to vector<128x128xbf16>
      %cst_46 = arith.constant dense<0.000000e+00> : vector<48x128xf32>
      %77 = tpu.matmul %74, %76, %cst_46 {dimension_numbers = #tpu.dot_dimension_numbers<[1], [0], [0], [1], [0, 0, 1, 1], [], []>} : vector<48x128xbf16>, vector<128x128xbf16>, vector<48x128xf32> -> vector<48x128xf32>
      %78 = arith.addf %69, %77 : vector<48x128xf32>
      %c27_i32 = arith.constant 27 : i32
      %79 = arith.addi %5, %c27_i32 : i32
      %c0_47 = arith.constant 0 : index
      %80 = arith.index_cast %79 : i32 to index
      %c0_48 = arith.constant 0 : index
      %81 = vector.load %arg1[%c0_47, %80, %c0_48] : memref<1x456x128xf32, #tpu.memory_space<vmem>>, vector<1x48x128xf32>
      %82 = vector.shape_cast %81 : vector<1x48x128xf32> to vector<48x128xf32>
      %83 = arith.truncf %82 : vector<48x128xf32> to vector<48x128xbf16>
      %c8 = arith.constant 8 : index
      %c0_49 = arith.constant 0 : index
      %c0_50 = arith.constant 0 : index
      %84 = vector.load %arg2[%c8, %c0_49, %c0_50] : memref<25x128x128xbf16, #tpu.memory_space<vmem>>, vector<1x128x128xbf16>
      %85 = vector.shape_cast %84 : vector<1x128x128xbf16> to vector<128x128xbf16>
      %cst_51 = arith.constant dense<0.000000e+00> : vector<48x128xf32>
      %86 = tpu.matmul %83, %85, %cst_51 {dimension_numbers = #tpu.dot_dimension_numbers<[1], [0], [0], [1], [0, 0, 1, 1], [], []>} : vector<48x128xbf16>, vector<128x128xbf16>, vector<48x128xf32> -> vector<48x128xf32>
      %87 = arith.addf %78, %86 : vector<48x128xf32>
      %c28_i32 = arith.constant 28 : i32
      %88 = arith.addi %5, %c28_i32 : i32
      %c0_52 = arith.constant 0 : index
      %89 = arith.index_cast %88 : i32 to index
      %c0_53 = arith.constant 0 : index
      %90 = vector.load %arg1[%c0_52, %89, %c0_53] : memref<1x456x128xf32, #tpu.memory_space<vmem>>, vector<1x48x128xf32>
      %91 = vector.shape_cast %90 : vector<1x48x128xf32> to vector<48x128xf32>
      %92 = arith.truncf %91 : vector<48x128xf32> to vector<48x128xbf16>
      %c9 = arith.constant 9 : index
      %c0_54 = arith.constant 0 : index
      %c0_55 = arith.constant 0 : index
      %93 = vector.load %arg2[%c9, %c0_54, %c0_55] : memref<25x128x128xbf16, #tpu.memory_space<vmem>>, vector<1x128x128xbf16>
      %94 = vector.shape_cast %93 : vector<1x128x128xbf16> to vector<128x128xbf16>
      %cst_56 = arith.constant dense<0.000000e+00> : vector<48x128xf32>
      %95 = tpu.matmul %92, %94, %cst_56 {dimension_numbers = #tpu.dot_dimension_numbers<[1], [0], [0], [1], [0, 0, 1, 1], [], []>} : vector<48x128xbf16>, vector<128x128xbf16>, vector<48x128xf32> -> vector<48x128xf32>
      %96 = arith.addf %87, %95 : vector<48x128xf32>
      %c48_i32_57 = arith.constant 48 : i32
      %97 = arith.addi %5, %c48_i32_57 : i32
      %c0_58 = arith.constant 0 : index
      %98 = arith.index_cast %97 : i32 to index
      %c0_59 = arith.constant 0 : index
      %99 = vector.load %arg1[%c0_58, %98, %c0_59] : memref<1x456x128xf32, #tpu.memory_space<vmem>>, vector<1x48x128xf32>
      %100 = vector.shape_cast %99 : vector<1x48x128xf32> to vector<48x128xf32>
      %101 = arith.truncf %100 : vector<48x128xf32> to vector<48x128xbf16>
      %c10 = arith.constant 10 : index
      %c0_60 = arith.constant 0 : index
      %c0_61 = arith.constant 0 : index
      %102 = vector.load %arg2[%c10, %c0_60, %c0_61] : memref<25x128x128xbf16, #tpu.memory_space<vmem>>, vector<1x128x128xbf16>
      %103 = vector.shape_cast %102 : vector<1x128x128xbf16> to vector<128x128xbf16>
      %cst_62 = arith.constant dense<0.000000e+00> : vector<48x128xf32>
      %104 = tpu.matmul %101, %103, %cst_62 {dimension_numbers = #tpu.dot_dimension_numbers<[1], [0], [0], [1], [0, 0, 1, 1], [], []>} : vector<48x128xbf16>, vector<128x128xbf16>, vector<48x128xf32> -> vector<48x128xf32>
      %105 = arith.addf %96, %104 : vector<48x128xf32>
      %c49_i32 = arith.constant 49 : i32
      %106 = arith.addi %5, %c49_i32 : i32
      %c0_63 = arith.constant 0 : index
      %107 = arith.index_cast %106 : i32 to index
      %c0_64 = arith.constant 0 : index
      %108 = vector.load %arg1[%c0_63, %107, %c0_64] : memref<1x456x128xf32, #tpu.memory_space<vmem>>, vector<1x48x128xf32>
      %109 = vector.shape_cast %108 : vector<1x48x128xf32> to vector<48x128xf32>
      %110 = arith.truncf %109 : vector<48x128xf32> to vector<48x128xbf16>
      %c11 = arith.constant 11 : index
      %c0_65 = arith.constant 0 : index
      %c0_66 = arith.constant 0 : index
      %111 = vector.load %arg2[%c11, %c0_65, %c0_66] : memref<25x128x128xbf16, #tpu.memory_space<vmem>>, vector<1x128x128xbf16>
      %112 = vector.shape_cast %111 : vector<1x128x128xbf16> to vector<128x128xbf16>
      %cst_67 = arith.constant dense<0.000000e+00> : vector<48x128xf32>
      %113 = tpu.matmul %110, %112, %cst_67 {dimension_numbers = #tpu.dot_dimension_numbers<[1], [0], [0], [1], [0, 0, 1, 1], [], []>} : vector<48x128xbf16>, vector<128x128xbf16>, vector<48x128xf32> -> vector<48x128xf32>
      %114 = arith.addf %105, %113 : vector<48x128xf32>
      %c50_i32 = arith.constant 50 : i32
      %115 = arith.addi %5, %c50_i32 : i32
      %c0_68 = arith.constant 0 : index
      %116 = arith.index_cast %115 : i32 to index
      %c0_69 = arith.constant 0 : index
      %117 = vector.load %arg1[%c0_68, %116, %c0_69] : memref<1x456x128xf32, #tpu.memory_space<vmem>>, vector<1x48x128xf32>
      %118 = vector.shape_cast %117 : vector<1x48x128xf32> to vector<48x128xf32>
      %119 = arith.truncf %118 : vector<48x128xf32> to vector<48x128xbf16>
      %c12 = arith.constant 12 : index
      %c0_70 = arith.constant 0 : index
      %c0_71 = arith.constant 0 : index
      %120 = vector.load %arg2[%c12, %c0_70, %c0_71] : memref<25x128x128xbf16, #tpu.memory_space<vmem>>, vector<1x128x128xbf16>
      %121 = vector.shape_cast %120 : vector<1x128x128xbf16> to vector<128x128xbf16>
      %cst_72 = arith.constant dense<0.000000e+00> : vector<48x128xf32>
      %122 = tpu.matmul %119, %121, %cst_72 {dimension_numbers = #tpu.dot_dimension_numbers<[1], [0], [0], [1], [0, 0, 1, 1], [], []>} : vector<48x128xbf16>, vector<128x128xbf16>, vector<48x128xf32> -> vector<48x128xf32>
      %123 = arith.addf %114, %122 : vector<48x128xf32>
      %c51_i32 = arith.constant 51 : i32
      %124 = arith.addi %5, %c51_i32 : i32
      %c0_73 = arith.constant 0 : index
      %125 = arith.index_cast %124 : i32 to index
      %c0_74 = arith.constant 0 : index
      %126 = vector.load %arg1[%c0_73, %125, %c0_74] : memref<1x456x128xf32, #tpu.memory_space<vmem>>, vector<1x48x128xf32>
      %127 = vector.shape_cast %126 : vector<1x48x128xf32> to vector<48x128xf32>
      %128 = arith.truncf %127 : vector<48x128xf32> to vector<48x128xbf16>
      %c13 = arith.constant 13 : index
      %c0_75 = arith.constant 0 : index
      %c0_76 = arith.constant 0 : index
      %129 = vector.load %arg2[%c13, %c0_75, %c0_76] : memref<25x128x128xbf16, #tpu.memory_space<vmem>>, vector<1x128x128xbf16>
      %130 = vector.shape_cast %129 : vector<1x128x128xbf16> to vector<128x128xbf16>
      %cst_77 = arith.constant dense<0.000000e+00> : vector<48x128xf32>
      %131 = tpu.matmul %128, %130, %cst_77 {dimension_numbers = #tpu.dot_dimension_numbers<[1], [0], [0], [1], [0, 0, 1, 1], [], []>} : vector<48x128xbf16>, vector<128x128xbf16>, vector<48x128xf32> -> vector<48x128xf32>
      %132 = arith.addf %123, %131 : vector<48x128xf32>
      %c52_i32 = arith.constant 52 : i32
      %133 = arith.addi %5, %c52_i32 : i32
      %c0_78 = arith.constant 0 : index
      %134 = arith.index_cast %133 : i32 to index
      %c0_79 = arith.constant 0 : index
      %135 = vector.load %arg1[%c0_78, %134, %c0_79] : memref<1x456x128xf32, #tpu.memory_space<vmem>>, vector<1x48x128xf32>
      %136 = vector.shape_cast %135 : vector<1x48x128xf32> to vector<48x128xf32>
      %137 = arith.truncf %136 : vector<48x128xf32> to vector<48x128xbf16>
      %c14 = arith.constant 14 : index
      %c0_80 = arith.constant 0 : index
      %c0_81 = arith.constant 0 : index
      %138 = vector.load %arg2[%c14, %c0_80, %c0_81] : memref<25x128x128xbf16, #tpu.memory_space<vmem>>, vector<1x128x128xbf16>
      %139 = vector.shape_cast %138 : vector<1x128x128xbf16> to vector<128x128xbf16>
      %cst_82 = arith.constant dense<0.000000e+00> : vector<48x128xf32>
      %140 = tpu.matmul %137, %139, %cst_82 {dimension_numbers = #tpu.dot_dimension_numbers<[1], [0], [0], [1], [0, 0, 1, 1], [], []>} : vector<48x128xbf16>, vector<128x128xbf16>, vector<48x128xf32> -> vector<48x128xf32>
      %141 = arith.addf %132, %140 : vector<48x128xf32>
      %c72_i32 = arith.constant 72 : i32
      %142 = arith.addi %5, %c72_i32 : i32
      %c0_83 = arith.constant 0 : index
      %143 = arith.index_cast %142 : i32 to index
      %c0_84 = arith.constant 0 : index
      %144 = vector.load %arg1[%c0_83, %143, %c0_84] : memref<1x456x128xf32, #tpu.memory_space<vmem>>, vector<1x48x128xf32>
      %145 = vector.shape_cast %144 : vector<1x48x128xf32> to vector<48x128xf32>
      %146 = arith.truncf %145 : vector<48x128xf32> to vector<48x128xbf16>
      %c15 = arith.constant 15 : index
      %c0_85 = arith.constant 0 : index
      %c0_86 = arith.constant 0 : index
      %147 = vector.load %arg2[%c15, %c0_85, %c0_86] : memref<25x128x128xbf16, #tpu.memory_space<vmem>>, vector<1x128x128xbf16>
      %148 = vector.shape_cast %147 : vector<1x128x128xbf16> to vector<128x128xbf16>
      %cst_87 = arith.constant dense<0.000000e+00> : vector<48x128xf32>
      %149 = tpu.matmul %146, %148, %cst_87 {dimension_numbers = #tpu.dot_dimension_numbers<[1], [0], [0], [1], [0, 0, 1, 1], [], []>} : vector<48x128xbf16>, vector<128x128xbf16>, vector<48x128xf32> -> vector<48x128xf32>
      %150 = arith.addf %141, %149 : vector<48x128xf32>
      %c73_i32 = arith.constant 73 : i32
      %151 = arith.addi %5, %c73_i32 : i32
      %c0_88 = arith.constant 0 : index
      %152 = arith.index_cast %151 : i32 to index
      %c0_89 = arith.constant 0 : index
      %153 = vector.load %arg1[%c0_88, %152, %c0_89] : memref<1x456x128xf32, #tpu.memory_space<vmem>>, vector<1x48x128xf32>
      %154 = vector.shape_cast %153 : vector<1x48x128xf32> to vector<48x128xf32>
      %155 = arith.truncf %154 : vector<48x128xf32> to vector<48x128xbf16>
      %c16 = arith.constant 16 : index
      %c0_90 = arith.constant 0 : index
      %c0_91 = arith.constant 0 : index
      %156 = vector.load %arg2[%c16, %c0_90, %c0_91] : memref<25x128x128xbf16, #tpu.memory_space<vmem>>, vector<1x128x128xbf16>
      %157 = vector.shape_cast %156 : vector<1x128x128xbf16> to vector<128x128xbf16>
      %cst_92 = arith.constant dense<0.000000e+00> : vector<48x128xf32>
      %158 = tpu.matmul %155, %157, %cst_92 {dimension_numbers = #tpu.dot_dimension_numbers<[1], [0], [0], [1], [0, 0, 1, 1], [], []>} : vector<48x128xbf16>, vector<128x128xbf16>, vector<48x128xf32> -> vector<48x128xf32>
      %159 = arith.addf %150, %158 : vector<48x128xf32>
      %c74_i32 = arith.constant 74 : i32
      %160 = arith.addi %5, %c74_i32 : i32
      %c0_93 = arith.constant 0 : index
      %161 = arith.index_cast %160 : i32 to index
      %c0_94 = arith.constant 0 : index
      %162 = vector.load %arg1[%c0_93, %161, %c0_94] : memref<1x456x128xf32, #tpu.memory_space<vmem>>, vector<1x48x128xf32>
      %163 = vector.shape_cast %162 : vector<1x48x128xf32> to vector<48x128xf32>
      %164 = arith.truncf %163 : vector<48x128xf32> to vector<48x128xbf16>
      %c17 = arith.constant 17 : index
      %c0_95 = arith.constant 0 : index
      %c0_96 = arith.constant 0 : index
      %165 = vector.load %arg2[%c17, %c0_95, %c0_96] : memref<25x128x128xbf16, #tpu.memory_space<vmem>>, vector<1x128x128xbf16>
      %166 = vector.shape_cast %165 : vector<1x128x128xbf16> to vector<128x128xbf16>
      %cst_97 = arith.constant dense<0.000000e+00> : vector<48x128xf32>
      %167 = tpu.matmul %164, %166, %cst_97 {dimension_numbers = #tpu.dot_dimension_numbers<[1], [0], [0], [1], [0, 0, 1, 1], [], []>} : vector<48x128xbf16>, vector<128x128xbf16>, vector<48x128xf32> -> vector<48x128xf32>
      %168 = arith.addf %159, %167 : vector<48x128xf32>
      %c75_i32 = arith.constant 75 : i32
      %169 = arith.addi %5, %c75_i32 : i32
      %c0_98 = arith.constant 0 : index
      %170 = arith.index_cast %169 : i32 to index
      %c0_99 = arith.constant 0 : index
      %171 = vector.load %arg1[%c0_98, %170, %c0_99] : memref<1x456x128xf32, #tpu.memory_space<vmem>>, vector<1x48x128xf32>
      %172 = vector.shape_cast %171 : vector<1x48x128xf32> to vector<48x128xf32>
      %173 = arith.truncf %172 : vector<48x128xf32> to vector<48x128xbf16>
      %c18 = arith.constant 18 : index
      %c0_100 = arith.constant 0 : index
      %c0_101 = arith.constant 0 : index
      %174 = vector.load %arg2[%c18, %c0_100, %c0_101] : memref<25x128x128xbf16, #tpu.memory_space<vmem>>, vector<1x128x128xbf16>
      %175 = vector.shape_cast %174 : vector<1x128x128xbf16> to vector<128x128xbf16>
      %cst_102 = arith.constant dense<0.000000e+00> : vector<48x128xf32>
      %176 = tpu.matmul %173, %175, %cst_102 {dimension_numbers = #tpu.dot_dimension_numbers<[1], [0], [0], [1], [0, 0, 1, 1], [], []>} : vector<48x128xbf16>, vector<128x128xbf16>, vector<48x128xf32> -> vector<48x128xf32>
      %177 = arith.addf %168, %176 : vector<48x128xf32>
      %c76_i32 = arith.constant 76 : i32
      %178 = arith.addi %5, %c76_i32 : i32
      %c0_103 = arith.constant 0 : index
      %179 = arith.index_cast %178 : i32 to index
      %c0_104 = arith.constant 0 : index
      %180 = vector.load %arg1[%c0_103, %179, %c0_104] : memref<1x456x128xf32, #tpu.memory_space<vmem>>, vector<1x48x128xf32>
      %181 = vector.shape_cast %180 : vector<1x48x128xf32> to vector<48x128xf32>
      %182 = arith.truncf %181 : vector<48x128xf32> to vector<48x128xbf16>
      %c19 = arith.constant 19 : index
      %c0_105 = arith.constant 0 : index
      %c0_106 = arith.constant 0 : index
      %183 = vector.load %arg2[%c19, %c0_105, %c0_106] : memref<25x128x128xbf16, #tpu.memory_space<vmem>>, vector<1x128x128xbf16>
      %184 = vector.shape_cast %183 : vector<1x128x128xbf16> to vector<128x128xbf16>
      %cst_107 = arith.constant dense<0.000000e+00> : vector<48x128xf32>
      %185 = tpu.matmul %182, %184, %cst_107 {dimension_numbers = #tpu.dot_dimension_numbers<[1], [0], [0], [1], [0, 0, 1, 1], [], []>} : vector<48x128xbf16>, vector<128x128xbf16>, vector<48x128xf32> -> vector<48x128xf32>
      %186 = arith.addf %177, %185 : vector<48x128xf32>
      %c96_i32 = arith.constant 96 : i32
      %187 = arith.addi %5, %c96_i32 : i32
      %c0_108 = arith.constant 0 : index
      %188 = arith.index_cast %187 : i32 to index
      %c0_109 = arith.constant 0 : index
      %189 = vector.load %arg1[%c0_108, %188, %c0_109] : memref<1x456x128xf32, #tpu.memory_space<vmem>>, vector<1x48x128xf32>
      %190 = vector.shape_cast %189 : vector<1x48x128xf32> to vector<48x128xf32>
      %191 = arith.truncf %190 : vector<48x128xf32> to vector<48x128xbf16>
      %c20 = arith.constant 20 : index
      %c0_110 = arith.constant 0 : index
      %c0_111 = arith.constant 0 : index
      %192 = vector.load %arg2[%c20, %c0_110, %c0_111] : memref<25x128x128xbf16, #tpu.memory_space<vmem>>, vector<1x128x128xbf16>
      %193 = vector.shape_cast %192 : vector<1x128x128xbf16> to vector<128x128xbf16>
      %cst_112 = arith.constant dense<0.000000e+00> : vector<48x128xf32>
      %194 = tpu.matmul %191, %193, %cst_112 {dimension_numbers = #tpu.dot_dimension_numbers<[1], [0], [0], [1], [0, 0, 1, 1], [], []>} : vector<48x128xbf16>, vector<128x128xbf16>, vector<48x128xf32> -> vector<48x128xf32>
      %195 = arith.addf %186, %194 : vector<48x128xf32>
      %c97_i32 = arith.constant 97 : i32
      %196 = arith.addi %5, %c97_i32 : i32
      %c0_113 = arith.constant 0 : index
      %197 = arith.index_cast %196 : i32 to index
      %c0_114 = arith.constant 0 : index
      %198 = vector.load %arg1[%c0_113, %197, %c0_114] : memref<1x456x128xf32, #tpu.memory_space<vmem>>, vector<1x48x128xf32>
      %199 = vector.shape_cast %198 : vector<1x48x128xf32> to vector<48x128xf32>
      %200 = arith.truncf %199 : vector<48x128xf32> to vector<48x128xbf16>
      %c21 = arith.constant 21 : index
      %c0_115 = arith.constant 0 : index
      %c0_116 = arith.constant 0 : index
      %201 = vector.load %arg2[%c21, %c0_115, %c0_116] : memref<25x128x128xbf16, #tpu.memory_space<vmem>>, vector<1x128x128xbf16>
      %202 = vector.shape_cast %201 : vector<1x128x128xbf16> to vector<128x128xbf16>
      %cst_117 = arith.constant dense<0.000000e+00> : vector<48x128xf32>
      %203 = tpu.matmul %200, %202, %cst_117 {dimension_numbers = #tpu.dot_dimension_numbers<[1], [0], [0], [1], [0, 0, 1, 1], [], []>} : vector<48x128xbf16>, vector<128x128xbf16>, vector<48x128xf32> -> vector<48x128xf32>
      %204 = arith.addf %195, %203 : vector<48x128xf32>
      %c98_i32 = arith.constant 98 : i32
      %205 = arith.addi %5, %c98_i32 : i32
      %c0_118 = arith.constant 0 : index
      %206 = arith.index_cast %205 : i32 to index
      %c0_119 = arith.constant 0 : index
      %207 = vector.load %arg1[%c0_118, %206, %c0_119] : memref<1x456x128xf32, #tpu.memory_space<vmem>>, vector<1x48x128xf32>
      %208 = vector.shape_cast %207 : vector<1x48x128xf32> to vector<48x128xf32>
      %209 = arith.truncf %208 : vector<48x128xf32> to vector<48x128xbf16>
      %c22 = arith.constant 22 : index
      %c0_120 = arith.constant 0 : index
      %c0_121 = arith.constant 0 : index
      %210 = vector.load %arg2[%c22, %c0_120, %c0_121] : memref<25x128x128xbf16, #tpu.memory_space<vmem>>, vector<1x128x128xbf16>
      %211 = vector.shape_cast %210 : vector<1x128x128xbf16> to vector<128x128xbf16>
      %cst_122 = arith.constant dense<0.000000e+00> : vector<48x128xf32>
      %212 = tpu.matmul %209, %211, %cst_122 {dimension_numbers = #tpu.dot_dimension_numbers<[1], [0], [0], [1], [0, 0, 1, 1], [], []>} : vector<48x128xbf16>, vector<128x128xbf16>, vector<48x128xf32> -> vector<48x128xf32>
      %213 = arith.addf %204, %212 : vector<48x128xf32>
      %c99_i32 = arith.constant 99 : i32
      %214 = arith.addi %5, %c99_i32 : i32
      %c0_123 = arith.constant 0 : index
      %215 = arith.index_cast %214 : i32 to index
      %c0_124 = arith.constant 0 : index
      %216 = vector.load %arg1[%c0_123, %215, %c0_124] : memref<1x456x128xf32, #tpu.memory_space<vmem>>, vector<1x48x128xf32>
      %217 = vector.shape_cast %216 : vector<1x48x128xf32> to vector<48x128xf32>
      %218 = arith.truncf %217 : vector<48x128xf32> to vector<48x128xbf16>
      %c23 = arith.constant 23 : index
      %c0_125 = arith.constant 0 : index
      %c0_126 = arith.constant 0 : index
      %219 = vector.load %arg2[%c23, %c0_125, %c0_126] : memref<25x128x128xbf16, #tpu.memory_space<vmem>>, vector<1x128x128xbf16>
      %220 = vector.shape_cast %219 : vector<1x128x128xbf16> to vector<128x128xbf16>
      %cst_127 = arith.constant dense<0.000000e+00> : vector<48x128xf32>
      %221 = tpu.matmul %218, %220, %cst_127 {dimension_numbers = #tpu.dot_dimension_numbers<[1], [0], [0], [1], [0, 0, 1, 1], [], []>} : vector<48x128xbf16>, vector<128x128xbf16>, vector<48x128xf32> -> vector<48x128xf32>
      %222 = arith.addf %213, %221 : vector<48x128xf32>
      %c100_i32 = arith.constant 100 : i32
      %223 = arith.addi %5, %c100_i32 : i32
      %c0_128 = arith.constant 0 : index
      %224 = arith.index_cast %223 : i32 to index
      %c0_129 = arith.constant 0 : index
      %225 = vector.load %arg1[%c0_128, %224, %c0_129] : memref<1x456x128xf32, #tpu.memory_space<vmem>>, vector<1x48x128xf32>
      %226 = vector.shape_cast %225 : vector<1x48x128xf32> to vector<48x128xf32>
      %227 = arith.truncf %226 : vector<48x128xf32> to vector<48x128xbf16>
      %c24 = arith.constant 24 : index
      %c0_130 = arith.constant 0 : index
      %c0_131 = arith.constant 0 : index
      %228 = vector.load %arg2[%c24, %c0_130, %c0_131] : memref<25x128x128xbf16, #tpu.memory_space<vmem>>, vector<1x128x128xbf16>
      %229 = vector.shape_cast %228 : vector<1x128x128xbf16> to vector<128x128xbf16>
      %cst_132 = arith.constant dense<0.000000e+00> : vector<48x128xf32>
      %230 = tpu.matmul %227, %229, %cst_132 {dimension_numbers = #tpu.dot_dimension_numbers<[1], [0], [0], [1], [0, 0, 1, 1], [], []>} : vector<48x128xbf16>, vector<128x128xbf16>, vector<48x128xf32> -> vector<48x128xf32>
      %231 = arith.addf %222, %230 : vector<48x128xf32>
      %232 = vector.broadcast %0 : vector<1x128xf32> to vector<48x128xf32>
      %233 = arith.addf %231, %232 : vector<48x128xf32>
      %cst_133 = arith.constant 0.000000e+00 : f32
      %234 = vector.broadcast %cst_133 : f32 to vector<48x128xf32>
      %235 = arith.maximumf %233, %234 : vector<48x128xf32>
      %236 = vector.shape_cast %235 : vector<48x128xf32> to vector<1x48x128xf32>
      %237 = vector.extract_strided_slice %236 {offsets = [0, 0, 0], sizes = [1, 24, 128], strides = [1, 1, 1]} : vector<1x48x128xf32> to vector<1x24x128xf32>
      %238 = vector.extract_strided_slice %236 {offsets = [0, 24, 0], sizes = [1, 24, 128], strides = [1, 1, 1]} : vector<1x48x128xf32> to vector<1x24x128xf32>
      %239 = arith.maximumf %237, %238 : vector<1x24x128xf32>
      %240 = vector.shape_cast %239 : vector<1x24x128xf32> to vector<24x128xf32>
      %c0_134 = arith.constant 0 : index
      %c0_135 = arith.constant 0 : index
      %241 = vector.load %arg5[%c0_134, %c0_135] : memref<24x128xf32, #tpu.memory_space<vmem>>, vector<24x128xf32>
      tpu.vector_store %arg5[%c0_134, %c0_135], %240 {strides = array<i32>} : memref<24x128xf32, #tpu.memory_space<vmem>>, vector<24x128xf32>,
      %c0_136 = arith.constant 0 : index
      %c0_137 = arith.constant 0 : index
      %242 = tpu.strided_load %arg5[%c0_136, %c0_137] {strides = array<i32: 2, 1>} : memref<24x128xf32, #tpu.memory_space<vmem>>, vector<12x128xf32>
      %c1_138 = arith.constant 1 : index
      %c0_139 = arith.constant 0 : index
      %243 = tpu.strided_load %arg5[%c1_138, %c0_139] {strides = array<i32: 2, 1>} : memref<24x128xf32, #tpu.memory_space<vmem>>, vector<12x128xf32>
      %244 = arith.maximumf %242, %243 : vector<12x128xf32>
      %245 = vector.shape_cast %244 : vector<12x128xf32> to vector<1x12x128xf32>
      %246 = vector.extract_strided_slice %245 {offsets = [0, 0, 0], sizes = [1, 7, 128], strides = [1, 1, 1]} : vector<1x12x128xf32> to vector<1x7x128xf32>
      %247 = arith.truncf %246 : vector<1x7x128xf32> to vector<1x7x128xbf16>
      %c1_i32_140 = arith.constant 1 : i32
      %248 = arith.muli %3, %c1_i32_140 : i32
      %c0_i32_141 = arith.constant 0 : i32
      %249 = arith.addi %c0_i32_141, %248 : i32
      %c0_142 = arith.constant 0 : index
      %250 = arith.index_cast %249 : i32 to index
      %c0_143 = arith.constant 0 : index
      %c0_144 = arith.constant 0 : index
      %251 = vector.load %arg4[%c0_142, %250, %c0_143, %c0_144] : memref<1x7x7x128xbf16, #tpu.memory_space<vmem>>, vector<1x1x7x128xbf16>
      %252 = vector.shape_cast %251 : vector<1x1x7x128xbf16> to vector<1x7x128xbf16>
      %253 = vector.shape_cast %247 : vector<1x7x128xbf16> to vector<1x1x7x128xbf16>
      tpu.vector_store %arg4[%c0_142, %250, %c0_143, %c0_144], %253 {strides = array<i32>} : memref<1x7x7x128xbf16, #tpu.memory_space<vmem>>, vector<1x1x7x128xbf16>,
    }
    %c7_i32_1 = arith.constant 7 : i32
    return
  }
  func.func @transform_0(%arg0: i32) -> (i32, i32, i32) {
    %c0_i32 = arith.constant 0 : i32
    %c0_i32_0 = arith.constant 0 : i32
    %c0_i32_1 = arith.constant 0 : i32
    return %arg0, %c0_i32, %c0_i32_0 : i32, i32, i32
  }
  func.func @transform_1(%arg0: i32) -> (i32, i32, i32) {
    %c0_i32 = arith.constant 0 : i32
    %c0_i32_0 = arith.constant 0 : i32
    %c0_i32_1 = arith.constant 0 : i32
    %c0_i32_2 = arith.constant 0 : i32
    return %c0_i32, %c0_i32_0, %c0_i32_1 : i32, i32, i32
  }
  func.func @transform_2(%arg0: i32) -> (i32, i32) {
    %c0_i32 = arith.constant 0 : i32
    %c0_i32_0 = arith.constant 0 : i32
    %c0_i32_1 = arith.constant 0 : i32
    return %c0_i32, %c0_i32_0 : i32, i32
  }
  func.func @transform_3(%arg0: i32) -> (i32, i32, i32, i32) {
    %c0_i32 = arith.constant 0 : i32
    %c0_i32_0 = arith.constant 0 : i32
    %c0_i32_1 = arith.constant 0 : i32
    %c0_i32_2 = arith.constant 0 : i32
    return %arg0, %c0_i32, %c0_i32_0, %c0_i32_1 : i32, i32, i32, i32
  }
}

module attributes {stable_mosaic.version = 11 : i64} {
  func.func @_linear_kernel(%arg0: i32, %arg1: i32, %arg2: i32, %arg3: memref<8x640xbf16, #tpu.memory_space<vmem>>, %arg4: memref<640x512xbf16, #tpu.memory_space<vmem>>, %arg5: memref<1x512xf32, #tpu.memory_space<vmem>>, %arg6: memref<8x512xbf16, #tpu.memory_space<vmem>>, %arg7: memref<8x512xf32, #tpu.memory_space<vmem>>) attributes {dimension_semantics = [#tpu.dimension_semantics<parallel>, #tpu.dimension_semantics<parallel>, #tpu.dimension_semantics<arbitrary>], iteration_bounds = array<i64: 1, 2, 5>, scalar_prefetch = 0 : i64, scratch_operands = 1 : i64, tpu.core_type = #tpu.core_type<tc>, window_params = [{transform_indices = @transform_0, window_bounds = array<i64: 8, 640>}, {transform_indices = @transform_1, window_bounds = array<i64: 640, 512>}, {transform_indices = @transform_2, window_bounds = array<i64: 1, 512>}, {transform_indices = @transform_3, window_bounds = array<i64: 8, 512>}]} {
    %c0_i32 = arith.constant 0 : i32
    %0 = arith.cmpi eq, %arg2, %c0_i32 : i32
    %1 = arith.extui %0 : i1 to i32
    %c0_i32_0 = arith.constant 0 : i32
    %2 = arith.cmpi ne, %1, %c0_i32_0 : i32
    scf.if %2 {
      %cst_9 = arith.constant 0.000000e+00 : f32
      %12 = vector.broadcast %cst_9 : f32 to vector<8x512xf32>
      %c0_10 = arith.constant 0 : index
      %c0_11 = arith.constant 0 : index
      %13 = vector.load %arg7[%c0_10, %c0_11] : memref<8x512xf32, #tpu.memory_space<vmem>>, vector<8x512xf32>
      tpu.vector_store %arg7[%c0_10, %c0_11], %12 {strides = array<i32>} : memref<8x512xf32, #tpu.memory_space<vmem>>, vector<8x512xf32>,
    } else {
    }
    %c0 = arith.constant 0 : index
    %c0_1 = arith.constant 0 : index
    %3 = vector.load %arg7[%c0, %c0_1] : memref<8x512xf32, #tpu.memory_space<vmem>>, vector<8x512xf32>
    %c0_2 = arith.constant 0 : index
    %c0_3 = arith.constant 0 : index
    %4 = vector.load %arg3[%c0_2, %c0_3] : memref<8x640xbf16, #tpu.memory_space<vmem>>, vector<8x640xbf16>
    %c0_4 = arith.constant 0 : index
    %c0_5 = arith.constant 0 : index
    %5 = vector.load %arg4[%c0_4, %c0_5] : memref<640x512xbf16, #tpu.memory_space<vmem>>, vector<640x512xbf16>
    %cst = arith.constant dense<0.000000e+00> : vector<8x512xf32>
    %6 = tpu.matmul %4, %5, %cst {dimension_numbers = #tpu.dot_dimension_numbers<[1], [0], [0], [1], [0, 0, 1, 1], [], []>} : vector<8x640xbf16>, vector<640x512xbf16>, vector<8x512xf32> -> vector<8x512xf32>
    %7 = arith.addf %3, %6 : vector<8x512xf32>
    %c0_6 = arith.constant 0 : index
    %c0_7 = arith.constant 0 : index
    %8 = vector.load %arg7[%c0_6, %c0_7] : memref<8x512xf32, #tpu.memory_space<vmem>>, vector<8x512xf32>
    tpu.vector_store %arg7[%c0_6, %c0_7], %7 {strides = array<i32>} : memref<8x512xf32, #tpu.memory_space<vmem>>, vector<8x512xf32>,
    %c4_i32 = arith.constant 4 : i32
    %9 = arith.cmpi eq, %arg2, %c4_i32 : i32
    %10 = arith.extui %9 : i1 to i32
    %c0_i32_8 = arith.constant 0 : i32
    %11 = arith.cmpi ne, %10, %c0_i32_8 : i32
    scf.if %11 {
      %c0_9 = arith.constant 0 : index
      %c0_10 = arith.constant 0 : index
      %12 = vector.load %arg7[%c0_9, %c0_10] : memref<8x512xf32, #tpu.memory_space<vmem>>, vector<8x512xf32>
      %c0_11 = arith.constant 0 : index
      %c0_12 = arith.constant 0 : index
      %13 = vector.load %arg5[%c0_11, %c0_12] : memref<1x512xf32, #tpu.memory_space<vmem>>, vector<1x512xf32>
      %14 = vector.broadcast %13 : vector<1x512xf32> to vector<8x512xf32>
      %15 = arith.addf %12, %14 : vector<8x512xf32>
      %16 = arith.truncf %15 : vector<8x512xf32> to vector<8x512xbf16>
      %c0_13 = arith.constant 0 : index
      %c0_14 = arith.constant 0 : index
      %17 = vector.load %arg6[%c0_13, %c0_14] : memref<8x512xbf16, #tpu.memory_space<vmem>>, vector<8x512xbf16>
      tpu.vector_store %arg6[%c0_13, %c0_14], %16 {strides = array<i32>} : memref<8x512xbf16, #tpu.memory_space<vmem>>, vector<8x512xbf16>,
    } else {
    }
    return
  }
  func.func @transform_0(%arg0: i32, %arg1: i32, %arg2: i32) -> (i32, i32) {
    %c0_i32 = arith.constant 0 : i32
    return %arg0, %arg2 : i32, i32
  }
  func.func @transform_1(%arg0: i32, %arg1: i32, %arg2: i32) -> (i32, i32) {
    %c0_i32 = arith.constant 0 : i32
    return %arg2, %arg1 : i32, i32
  }
  func.func @transform_2(%arg0: i32, %arg1: i32, %arg2: i32) -> (i32, i32) {
    %c0_i32 = arith.constant 0 : i32
    %c0_i32_0 = arith.constant 0 : i32
    return %c0_i32, %arg1 : i32, i32
  }
  func.func @transform_3(%arg0: i32, %arg1: i32, %arg2: i32) -> (i32, i32) {
    %c0_i32 = arith.constant 0 : i32
    return %arg0, %arg1 : i32, i32
  }
}

</mosaic_0001>

<bundles_post_ra>
// kernel: convnet_forward.3
= control target key start
LH: loop header
LB: loop body
LE: loop exit
PB: predicated region body
PF: predicated region fallthrough
CT: control target
= control target key end

     0   :  { %8 = vsyncpa [#allocation4], 0  ;;  %s1006_s0 = inlined_call_operand.vmem [shape: f32[2,896,32], index: 0, kind: input, shape index: {}]   ;;  %s1007_s1 = inlined_call_operand.hbm [shape: bf16[1,32,128], index: 1, kind: input, shape index: {}]   ;;  %s1008_s2 = inlined_call_operand.hbm [shape: f32[1,128], index: 2, kind: input, shape index: {}]   ;;  %s1009_s3 = inlined_call_operand.vmem [shape: f32[2,19,24,128], index: 3, kind: output, shape index: {}]  }
   0x1   :  { %9 = vsyncpa [#allocation6], 0  ;;  %s795_s12 = smov 0  }
   0x2 LB: > { %s801_s13 = sadd.s32 4294967295, %s764_s12   ;;  %p583_p0 = scmp.ge.s32.totalorder %s764_s12, 1  ;;  %s764_s12 = sphi %s795_s12, %s15_s12  }
   0x3   : > { %p114_p1 = scmp.lt.s32.totalorder %s764_s12, 3  ;;  %s770_s14 = smov [#allocation3]  }
   0x4   : > { %s126_s15 = sshll.u32 %s770_s14, 4  ;;  %p1010_p3 = scmp.eq.s32.totalorder %s801_s13, 0  ;;  %s127_s15 = int_to_ptr.vmem [resolvable:$true] %s126_s15 }
   0x5   : > { %p805_p2 = pnand %p583_p0, %p114_p1  ;;  %s771_s17 = smov [#allocation5]  }
   0x6   : > { %s140_s18 = sshll.u32 %s771_s17, 4  ;;  %s690_s22 = scalar_lea.hbm %s1007_s1, 256  ;;  %s818_s18 = int_to_ptr.vmem [resolvable:$true] %s140_s18 }
   0x7   : > { %s1012_s16 = scalar_select %p805_p2, 1, 0 }
   0x8   : > { %p656_p4 = pneg %p805_p2  ;;  %p691_p6 = scmp.ne.s32.totalorder %s1007_s1, %s690_s22 }
   0x9   : > { %p697_p10 = scmp.lt.u32.totalorder %s690_s22, %s1007_s1 }
   0xa   : > { %p814_p5 = pnand %p1010_p3, %p656_p4 }
   0xc   : > { %p692_p7 = pneg %p814_p5 }
   0xe   : > { %p693_p8 = pnand %p692_p7, %p691_p6 }
  0x10   : > { %p694_p9 = pneg %p693_p8 }
  0x12   : > { %p699_p11 = pnand %p697_p10, %p694_p9 }
  0x14   : > { %702 = shalt.err (!%p699_p11)
}
  0x15   : > { %s703_s27 = scalar_lea.vmem %s127_s15, 256  ;;  %p711_p1 = scmp.lt.s32.totalorder %s127_s15, %s127_s15 }
  0x16   : > { %p704_p12 = scmp.ne.s32.totalorder %s127_s15, %s703_s27  ;;  %p712_p4 = scmp.lt.s32.totalorder %s703_s27, %s703_s27 }
  0x18   : > { %p706_p13 = pnand %p704_p12, %p692_p7  ;;  %p713_p3 = por %p712_p4, %p711_p1 }
  0x1a   : > { %p707_p0 = pneg %p706_p13 }
  0x1c   : > { %p714_p2 = pnand %p713_p3, %p707_p0 }
  0x1e   : > { %717 = shalt.err (!%p714_p2)
}
  0x1f   : > { %s772_s28 = smov 64   ;;  %s773_s29 = smov 4  }
  0x20   : > { %659 = dma.hbm_to_vmem [thread:$0]  (!%p814_p5), %s1007_s1, 256, %s127_s15, [#allocation4], %s772_s28, %s772_s28, %s773_s29  }
  0x21   : > { %s718_s7 = scalar_lea.hbm %s1008_s2, 16 }
  0x22   : > { %p719_p6 = scmp.ne.s32.totalorder %s1008_s2, %s718_s7  ;;  %p725_p8 = scmp.lt.u32.totalorder %s718_s7, %s1008_s2 }
  0x24   : > { %p721_p2 = pnand %p719_p6, %p692_p7 }
  0x26   : > { %p722_p3 = pneg %p721_p2 }
  0x28   : > { %p727_p9 = pnand %p725_p8, %p722_p3 }
  0x2a   : > { %730 = shalt.err (!%p727_p9)
}
  0x2b   : > { %s731_s14 = scalar_lea.vmem %s818_s18, 16  ;;  %s738_s15 = scalar_lea.vmem %s818_s18, 32 }
  0x2c   : > { %p732_p10 = scmp.ne.s32.totalorder %s818_s18, %s731_s14  ;;  %p739_p13 = scmp.lt.s32.totalorder %s818_s18, %s818_s18 }
  0x2d   : > { %p740_p0 = scmp.lt.s32.totalorder %s738_s15, %s731_s14 }
  0x2e   : > { %p734_p11 = pnand %p732_p10, %p692_p7 }
  0x2f   : > { %p741_p1 = por %p740_p0, %p739_p13 }
  0x30   : > { %p735_p12 = pneg %p734_p11 }
  0x32   : > { %p742_p4 = pnand %p741_p1, %p735_p12 }
  0x34   : > { %745 = shalt.err (!%p742_p4)
}
  0x35   : > { %662 = dma.hbm_to_vmem [thread:$0]  (!%p814_p5), %s1008_s2, 16, %s818_s18, [#allocation6]  }
  0x36   : > { %p1014_p6 = scmp.ne.s32.totalorder %s1012_s16, 0 }
  0x37   : > { %p1015_p7 = scmp.eq.s32.totalorder (!%p1014_p6), %s801_s13, 0 }
  0x38   : > { %161 = sbr.rel (%p1014_p6) target bundleno = 355 (0x163), region = 32 }
  0x3f   : > { %755 = dma.done.wait (%p1015_p7), [#allocation4], 256   ;;  %p1016_p2 = pmov %p1015_p7 }
  0x41   : > { %757 = vsyncadd (%p1016_p2), [#allocation4], 4294967040  ;;  %p1017_p3 = pmov %p1016_p2 }
  0x42   : > { %p1018_p8 = pmov %p1016_p2 }
  0x43   : > { %759 = dma.done.wait (%p1017_p3), [#allocation6], 16  }
  0x44   : > { %761 = vsyncadd (%p1018_p8), [#allocation6], 4294967280  ;;  %p189_p9 = scmp.lt.s32.totalorder %s801_s13, 1  ;;  %v885_v0 = vld [vmem:[#allocation5] ss:$0 sm:$0xff]  ;;  %v774_v1 = vmov 0.0  }
  0x46   : > { %s1020_s13 = smov (!%p189_p9, %s801_s13), 1 }
  0x47   : > { %s646_s18 = smul.u32 896, %s1020_s13 }
  0x48   : > { %s647_s19 = smul.u32 456, %s1020_s13  ;;  %s949_s13 = smov 0  }
  0x49   : > { %s883_s22 = scalar_lea.vmem %s1006_s0, %s646_s18 }
  0x4a   : > { %s890_s25 = scalar_lea.vmem %s1009_s3, %s647_s19 }
  0x4b   : > { %200 = vst [vmem:[%s890_s25] sm:$0xff] %v774_v1  ;;  %201 = vst [vmem:[%s890_s25 + $0x8] sm:$0xff] %v774_v1 }
  0x4c   : > { %202 = vst [vmem:[%s890_s25 + $0x10] sm:$0xff] %v774_v1  ;;  %203 = vst [vmem:[%s890_s25 + $0x18] sm:$0xff] %v774_v1 }
  0x4d   : > { %204 = vst [vmem:[%s890_s25 + $0x20] sm:$0xff] %v774_v1  ;;  %205 = vst [vmem:[%s890_s25 + $0x28] sm:$0xff] %v774_v1 }
  0x4e   : > { %206 = vst [vmem:[%s890_s25 + $0x30] sm:$0xff] %v774_v1  ;;  %207 = vst [vmem:[%s890_s25 + $0x38] sm:$0xff] %v774_v1 }
  0x4f   : > { %208 = vst [vmem:[%s890_s25 + $0x40] sm:$0xff] %v774_v1  ;;  %209 = vst [vmem:[%s890_s25 + $0x48] sm:$0xff] %v774_v1 }
  0x50   : > { %210 = vst [vmem:[%s890_s25 + $0x50] sm:$0xff] %v774_v1  ;;  %211 = vst [vmem:[%s890_s25 + $0x58] sm:$0xff] %v774_v1 }
  0x51   : > { %212 = vst [vmem:[%s890_s25 + $0x60] sm:$0xff] %v774_v1  ;;  %213 = vst [vmem:[%s890_s25 + $0x68] sm:$0xff] %v774_v1 }
  0x52   : > { %214 = vst [vmem:[%s890_s25 + $0x70] sm:$0xff] %v774_v1  ;;  %215 = vst [vmem:[%s890_s25 + $0x78] sm:$0xff] %v774_v1 }
  0x53   : > { %216 = vst [vmem:[%s890_s25 + $0x80] sm:$0xff] %v774_v1  ;;  %217 = vst [vmem:[%s890_s25 + $0x88] sm:$0xff] %v774_v1 }
  0x54   : > { %218 = vst [vmem:[%s890_s25 + $0x90] sm:$0xff] %v774_v1  ;;  %219 = vst [vmem:[%s890_s25 + $0x98] sm:$0xff] %v774_v1 }
  0x55   : > { %220 = vst [vmem:[%s890_s25 + $0xa0] sm:$0xff] %v774_v1  ;;  %221 = vst [vmem:[%s890_s25 + $0xa8] sm:$0xff] %v774_v1 }
  0x56   : > { %222 = vst [vmem:[%s890_s25 + $0xb0] sm:$0xff] %v774_v1  ;;  %223 = vst [vmem:[%s890_s25 + $0xb8] sm:$0xff] %v774_v1 }
  0x57   : > { %224 = vst [vmem:[%s890_s25 + $0xc0] sm:$0xff] %v774_v1  ;;  %225 = vst [vmem:[%s890_s25 + $0xc8] sm:$0xff] %v774_v1 }
  0x58   : > { %226 = vst [vmem:[%s890_s25 + $0xd0] sm:$0xff] %v774_v1  ;;  %227 = vst [vmem:[%s890_s25 + $0xd8] sm:$0xff] %v774_v1 }
  0x59   : > { %228 = vst [vmem:[%s890_s25 + $0xe0] sm:$0xff] %v774_v1  ;;  %229 = vst [vmem:[%s890_s25 + $0xe8] sm:$0xff] %v774_v1 }
  0x5a   : > { %230 = vst [vmem:[%s890_s25 + $0xf0] sm:$0xff] %v774_v1  ;;  %231 = vst [vmem:[%s890_s25 + $0xf8] sm:$0xff] %v774_v1 }
  0x5b   : > { %232 = vst [vmem:[%s890_s25 + $0x100] sm:$0xff] %v774_v1  ;;  %233 = vst [vmem:[%s890_s25 + $0x108] sm:$0xff] %v774_v1 }
  0x5c   : > { %234 = vst [vmem:[%s890_s25 + $0x110] sm:$0xff] %v774_v1  ;;  %235 = vst [vmem:[%s890_s25 + $0x118] sm:$0xff] %v774_v1 }
  0x5d   : > { %236 = vst [vmem:[%s890_s25 + $0x120] sm:$0xff] %v774_v1  ;;  %237 = vst [vmem:[%s890_s25 + $0x128] sm:$0xff] %v774_v1 }
  0x5e   : > { %238 = vst [vmem:[%s890_s25 + $0x130] sm:$0xff] %v774_v1  ;;  %239 = vst [vmem:[%s890_s25 + $0x138] sm:$0xff] %v774_v1 }
  0x5f   : > { %240 = vst [vmem:[%s890_s25 + $0x140] sm:$0xff] %v774_v1  ;;  %241 = vst [vmem:[%s890_s25 + $0x148] sm:$0xff] %v774_v1 }
  0x60   : > { %242 = vst [vmem:[%s890_s25 + $0x150] sm:$0xff] %v774_v1  ;;  %243 = vst [vmem:[%s890_s25 + $0x158] sm:$0xff] %v774_v1 }
  0x61   : > { %244 = vst [vmem:[%s890_s25 + $0x160] sm:$0xff] %v774_v1  ;;  %245 = vst [vmem:[%s890_s25 + $0x168] sm:$0xff] %v774_v1 }
  0x62   : > { %246 = vst [vmem:[%s890_s25 + $0x170] sm:$0xff] %v774_v1  ;;  %247 = vst [vmem:[%s890_s25 + $0x178] sm:$0xff] %v774_v1 }
  0x63   : > { %248 = vst [vmem:[%s890_s25 + $0x180] sm:$0xff] %v774_v1  ;;  %249 = vst [vmem:[%s890_s25 + $0x188] sm:$0xff] %v774_v1 }
  0x64   : > { %250 = vst [vmem:[%s890_s25 + $0x190] sm:$0xff] %v774_v1  ;;  %251 = vst [vmem:[%s890_s25 + $0x198] sm:$0xff] %v774_v1 }
  0x65   : > { %252 = vst [vmem:[%s890_s25 + $0x1a0] sm:$0xff] %v774_v1  ;;  %253 = vst [vmem:[%s890_s25 + $0x1a8] sm:$0xff] %v774_v1 }
  0x66   : > { %254 = vst [vmem:[%s890_s25 + $0x1b0] sm:$0xff] %v774_v1  ;;  %255 = vst [vmem:[%s890_s25 + $0x1b8] sm:$0xff] %v774_v1 }
  0x67   : > { %256 = vst [vmem:[%s890_s25 + $0x1c0] sm:$0xff] %v774_v1 }
  0x68 LB: >> { %v688_v2 = vld [vmem:[#allocation3] sm:$0xff]   ;;  %v689_v3 = vld [vmem:[#allocation3 + $0x8] sm:$0xff]   ;;  %s592_s26 = sshll.u32 %s768_s13, 7  ;;  %vm312_vm0 = vcmask 261120   ;;  %s605_s28 = smul.u32 48, %s768_s13  ;;  %s768_s13 = sphi %s949_s13, %s263_s13  }
  0x69   : >> { %622 = vmatprep.subr.bf16.mxu0 %v688_v2  ;;  %642 = vmatprep.subr.bf16.mxu1 %v688_v2  ;;  %s956_s27 = scalar_lea.vmem %s883_s22, %s592_s26  ;;  %s263_s13 = sadd.s32 1, %s768_s13  }
  0x6a   : >> { %623 = vmatpush3.bf16.msra.mxu0 %v688_v2  ;;  %644 = vmatpush3.bf16.msra.mxu1 %v688_v2  ;;  %v266_v4 = vld [vmem:[%s956_s27] sm:$0xff]  ;;  %v267_v5 = vld [vmem:[%s956_s27 + $0x8] sm:$0xff]  ;;  %v268_v9 = vld [vmem:[%s956_s27 + $0x10] sm:$0xff]  ;;  %s532_s29 = scalar_lea.vmem %s890_s25, %s605_s28  ;;  %p260_p5 = scmp.ge.s32.totalorder %s263_s13, 7  }
  0x6b   : >> { %624 = vmatprep.subr.bf16.mxu0 %v689_v3  ;;  %643 = vmatprep.subr.bf16.mxu1 %v689_v3  ;;  %v274_v6 = vld [vmem:[%s956_s27 + $0x40] sm:$0xff]  ;;  %v282_v7 = vpack.c.bf16 %v267_v5, %v266_v4  ;;  %v275_v8 = vld [vmem:[%s956_s27 + $0x48] sm:$0xff]  ;;  %v269_v10 = vld [vmem:[%s956_s27 + $0x18] sm:$0xff] }
  0x6c   : >> { %v286_v11 = vpack.c.bf16 %v275_v8, %v274_v6  ;;  %v283_v12 = vpack.c.bf16 %v269_v10, %v268_v9  ;;  %v276_v13 = vld [vmem:[%s956_s27 + $0x50] sm:$0xff]  ;;  %v277_v14 = vld [vmem:[%s956_s27 + $0x58] sm:$0xff]  ;;  %v270_v15 = vld [vmem:[%s956_s27 + $0x20] sm:$0xff] }
  0x6d   : >> { %v287_v16 = vpack.c.bf16 %v277_v14, %v276_v13  ;;  %v271_v17 = vld [vmem:[%s956_s27 + $0x28] sm:$0xff]  ;;  %v278_v18 = vld [vmem:[%s956_s27 + $0x60] sm:$0xff]  ;;  %626 = vmatprep.mubr.msk.bf16.mxu0 %vm312_vm0, %v282_v7  ;;  %v272_v22 = vld [vmem:[%s956_s27 + $0x30] sm:$0xff] }
  0x6e   : >> { %625 = vmatpush3.bf16.msra.mxu0 %v689_v3  ;;  %645 = vmatpush3.bf16.msra.mxu1 %v689_v3  ;;  %v279_v19 = vld [vmem:[%s956_s27 + $0x68] sm:$0xff]  ;;  %v284_v20 = vpack.c.bf16 %v271_v17, %v270_v15  ;;  %v273_v23 = vld [vmem:[%s956_s27 + $0x38] sm:$0xff]  ;;  %v280_v24 = vld [vmem:[%s956_s27 + $0x70] sm:$0xff] }
  0x6f   : >> { %634 = vmatprep.mubr.msk.bf16.mxu1 %vm312_vm0, %v286_v11  ;;  %v288_v21 = vpack.c.bf16 %v279_v19, %v278_v18  ;;  %v281_v25 = vld [vmem:[%s956_s27 + $0x78] sm:$0xff]  ;;  %v285_v26 = vpack.c.bf16 %v273_v23, %v272_v22 }
  0x70   : >> { %v289_v27 = vpack.c.bf16 %v281_v25, %v280_v24 }
  0x71   : >> { %627 = vmatmul.mubr.msk.bf16.vlgmr.msra.gmra.mrb[0].mxu0 %vm312_vm0, %v283_v12  ;;  %635 = vmatmul.mubr.msk.bf16.vlgmr.msra.gmra.mrb[0].mxu1 %vm312_vm0, %v287_v16 }
  0x72   : >> { %630 = vmatprep.mubr.msk.bf16.mxu0 %vm312_vm0, %v284_v20  ;;  %638 = vmatprep.mubr.msk.bf16.mxu1 %vm312_vm0, %v288_v21 }
  0x79   : >> { %631 = vmatmul.mubr.msk.bf16.gmra.mrb[4].mxu0 %vm312_vm0, %v285_v26  ;;  %639 = vmatmul.mubr.msk.bf16.gmra.mrb[4].mxu1 %vm312_vm0, %v289_v27 }
 0x144   : >> { %v628_v28 = vpop.f32.mrb[0].mxu0  ;;  %v636_v29 = vpop.f32.mrb[0].mxu1 }
 0x145   : >> { %v371_v30 = vpop.f32.mrb[1].mxu0  ;;  %v403_v31 = vpop.f32.mrb[1].mxu1  ;;  %v380_v36 = vadd.f32 %v628_v28, %v885_v0  ;;  %v412_v37 = vadd.f32 %v636_v29, %v885_v0 }
 0x146   : >> { %v629_v32 = vpop.f32.mrb[2].mxu0  ;;  %v637_v33 = vpop.f32.mrb[2].mxu1  ;;  %v372_v38 = vadd.f32 %v885_v0, %v371_v30  ;;  %v404_v39 = vadd.f32 %v885_v0, %v403_v31 }
 0x147   : >> { %v374_v34 = vpop.f32.mrb[3].mxu0  ;;  %v406_v35 = vpop.f32.mrb[3].mxu1  ;;  %v383_v40 = vadd.f32 %v629_v32, %v885_v0  ;;  %v415_v41 = vadd.f32 %v637_v33, %v885_v0  ;;  %v436_v44 = vmax.f32 %v380_v36, 0.0  ;;  %v444_v45 = vmax.f32 %v412_v37, 0.0 }
 0x148   : >> { %v375_v42 = vadd.f32 %v885_v0, %v374_v34  ;;  %v407_v43 = vadd.f32 %v885_v0, %v406_v35  ;;  %v434_v46 = vmax.f32 %v372_v38, 0.0  ;;  %v442_v47 = vmax.f32 %v404_v39, 0.0 }
 0x149   : >> { %v437_v50 = vmax.f32 %v383_v40, 0.0  ;;  %v445_v51 = vmax.f32 %v415_v41, 0.0 }
 0x14a   : >> { %v435_v56 = vmax.f32 %v375_v42, 0.0  ;;  %v443_v57 = vmax.f32 %v407_v43, 0.0 }
 0x14c   : >> { %v632_v48 = vpop.f32.mrb[4].mxu0  ;;  %v640_v49 = vpop.f32.mrb[4].mxu1 }
 0x14d   : >> { %v396_v52 = vadd.f32 %v632_v48, %v885_v0  ;;  %v428_v53 = vadd.f32 %v640_v49, %v885_v0  ;;  %v387_v54 = vpop.f32.mrb[5].mxu0  ;;  %v419_v55 = vpop.f32.mrb[5].mxu1 }
 0x14e   : >> { %v388_v58 = vadd.f32 %v885_v0, %v387_v54  ;;  %v420_v59 = vadd.f32 %v885_v0, %v419_v55  ;;  %v633_v60 = vpop.f32.mrb[6].mxu0  ;;  %v641_v61 = vpop.f32.mrb[6].mxu1 }
 0x14f   : >> { %v440_v62 = vmax.f32 %v396_v52, 0.0  ;;  %v448_v63 = vmax.f32 %v428_v53, 0.0  ;;  %v399_v1 = vadd.f32 %v633_v60, %v885_v0  ;;  %v431_v2 = vadd.f32 %v641_v61, %v885_v0  ;;  %v390_v3 = vpop.f32.mrb[7].mxu0  ;;  %v422_v4 = vpop.f32.mrb[7].mxu1 }
 0x150   : >> { %v438_v5 = vmax.f32 %v388_v58, 0.0  ;;  %v446_v6 = vmax.f32 %v420_v59, 0.0  ;;  %v391_v7 = vadd.f32 %v885_v0, %v390_v3  ;;  %v423_v8 = vadd.f32 %v885_v0, %v422_v4 }
 0x151   : >> { %v452_v9 = vmax.f32 %v436_v44, %v440_v62  ;;  %v456_v10 = vmax.f32 %v444_v45, %v448_v63  ;;  %v441_v11 = vmax.f32 %v399_v1, 0.0  ;;  %v449_v12 = vmax.f32 %v431_v2, 0.0 }
 0x152   : >> { %v450_v13 = vmax.f32 %v434_v46, %v438_v5  ;;  %v454_v14 = vmax.f32 %v442_v47, %v446_v6  ;;  %v439_v15 = vmax.f32 %v391_v7, 0.0  ;;  %v447_v16 = vmax.f32 %v423_v8, 0.0 }
 0x153   : >> { %460 = vst [vmem:[#allocation2 + $0x10] sm:$0xff] %v452_v9  ;;  %464 = vst [vmem:[#allocation2 + $0x30] sm:$0xff] %v456_v10  ;;  %v453_v17 = vmax.f32 %v437_v50, %v441_v11  ;;  %v457_v18 = vmax.f32 %v445_v51, %v449_v12 }
 0x154   : >> { %458 = vst [vmem:[#allocation2] sm:$0xff] %v450_v13  ;;  %462 = vst [vmem:[#allocation2 + $0x20] sm:$0xff] %v454_v14  ;;  %v451_v19 = vmax.f32 %v435_v56, %v439_v15  ;;  %v455_v20 = vmax.f32 %v443_v57, %v447_v16 }
 0x155   : >> { %461 = vst [vmem:[#allocation2 + $0x18] sm:$0xff] %v453_v17  ;;  %465 = vst [vmem:[#allocation2 + $0x38] sm:$0xff] %v457_v18 }
 0x156   : >> { %459 = vst [vmem:[#allocation2 + $0x8] sm:$0xff] %v451_v19  ;;  %463 = vst [vmem:[#allocation2 + $0x28] sm:$0xff] %v455_v20 }
 0x15c   : >> { %v468_v21 = vld [vmem:[#allocation2 + $0x10] ss:$2 sm:$0xff]  ;;  %v476_v22 = vld [vmem:[#allocation2 + $0x11] ss:$2 sm:$0xff]  ;;  %262 = sbr.rel (!%p260_p5) target bundleno = 104 (0x68), region = 87 }
 0x15d   : >> { %v472_v23 = vld [vmem:[#allocation2 + $0x30] ss:$2 sm:$0xff]  ;;  %v482_v24 = vmax.f32 %v468_v21, %v476_v22  ;;  %v480_v25 = vld [vmem:[#allocation2 + $0x31] ss:$2 sm:$0xff]  ;;  %v466_v26 = vld [vmem:[#allocation2] ss:$2 sm:$0xff] }
 0x15e   : >> { %v474_v27 = vld [vmem:[#allocation2 + $0x1] ss:$2 sm:$0xff]  ;;  %v484_v28 = vmax.f32 %v472_v23, %v480_v25  ;;  %v470_v30 = vld [vmem:[#allocation2 + $0x20] ss:$2 sm:$0xff] }
 0x15f   : >> { %v481_v29 = vmax.f32 %v466_v26, %v474_v27  ;;  %v478_v31 = vld [vmem:[#allocation2 + $0x21] ss:$2 sm:$0xff]  ;;  %607 = vst [vmem:[%s532_s29 + $0x3a] sm:$0x3f] %v482_v24 }
 0x160   : >> { %v483_v32 = vmax.f32 %v470_v30, %v478_v31  ;;  %609 = vst [vmem:[%s532_s29 + $0x52] sm:$0x3f] %v484_v28 }
 0x161   : >> { %606 = vst [vmem:[%s532_s29 + $0x32] sm:$0xff] %v481_v29 }
 0x162   : >> { %608 = vst [vmem:[%s532_s29 + $0x4a] sm:$0xff] %v483_v32 }
 0x163 PF: > { %s15_s12 = sadd.s32 1, %s764_s12  }
 0x164   : > { %p12_p10 = scmp.ge.s32.totalorder %s15_s12, 4  }
 0x166   :  { %14 = sbr.rel (!%p12_p10) target bundleno = 2 (0x2), region = 98 }
 0x16d   :  { %514 = vsyncpa [#allocation4], 1 }
 0x16e   :  { %516 = vsyncpa [#allocation4 + $0x1], 1 }
 0x16f   :  { %517 = vsyncpa [#allocation6], 1 }

// kernel: convnet_forward.5
= control target key start
LH: loop header
LB: loop body
LE: loop exit
PB: predicated region body
PF: predicated region fallthrough
CT: control target
= control target key end

     0   :  { %s2593_s12 = smov 0   ;;  %s2595_s13 = smov 0   ;;  %s3216_s0 = inlined_call_operand.vmem [shape: bf16[8,3200], index: 0, kind: input, shape index: {}]   ;;  %s3217_s1 = inlined_call_operand.vmem [shape: bf16[3200,1024], index: 1, kind: input, shape index: {}]   ;;  %s3218_s2 = inlined_call_operand.vmem [shape: f32[1,1024], index: 2, kind: input, shape index: {}]   ;;  %s3219_s3 = inlined_call_operand.vmem [shape: bf16[8,1024], index: 3, kind: output, shape index: {}]  }
   0x1   :  { %s2597_s14 = smov 0   ;;  %s2599_s15 = smov 0  }
   0x2   :  { %s2601_s16 = smov 0   ;;  %s2603_s17 = smov 0  }
   0x3   :  { %s2605_s18 = smov 0  }
   0x4 LB: > { %s25_s19 = sadd.s32 1, %s2561_s16  ;;  %s28_s20 = sadd.s32 1, %s2565_s17  ;;  %s2569_s18 = sphi %s2605_s18, %s13_s18   ;;  %s2565_s17 = sphi %s2603_s17, %s3225_s17   ;;  %s2561_s16 = sphi %s2601_s16, %s3224_s16   ;;  %s2557_s15 = sphi %s2599_s15, %s3223_s15   ;;  %s2553_s14 = sphi %s2597_s14, %s3222_s14   ;;  %s2549_s13 = sphi %s2595_s13, %s3221_s13   ;;  %s2545_s12 = sphi %s2593_s12, %s3220_s12  }
   0x5   : > { %p26_p0 = scmp.ge.s32.totalorder %s25_s19, 5  ;;  %p76_p1 = scmp.ne.s32.totalorder %s2549_s13, %s2545_s12 }
   0x6   : > { %p77_p2 = scmp.eq.s32.totalorder %s2569_s18, 0  ;;  %s69_s24 = sadd.s32 1, %s2549_s13 }
   0x7   : > { %s3227_s19 = smov (%p26_p0, %s25_s19), 0  ;;  %s3229_s20 = smov (!%p26_p0, %s28_s20), %s2565_s17 }
   0x8   : > { %p78_p3 = por %p77_p2, %p76_p1  ;;  %p30_p4 = scmp.ge.s32.totalorder %s3229_s20, 2 }
   0x9   : > { %s64_s21 = ssub.s32 %s2561_s16, %s3227_s19  ;;  %p2027_p6 = scmp.ge.s32.totalorder %s2569_s18, 10 }
   0xa   : > { %s3231_s20 = smov (%p30_p4, %s3229_s20), 0 }
   0xb   : > { %s65_s22 = ssub.s32 %s2565_s17, %s3231_s20  ;;  %156 = sbr.rel (%p2027_p6) target bundleno = 106 (0x6a), region = 16 }
   0xc   : > { %s66_s23 = sor.u32 %s65_s22, %s64_s21 }
   0xd   : > { %p67_p5 = scmp.eq.s32.totalorder %s66_s23, 0 }
   0xf   : > { %s2644_s25 = scalar_select %p67_p5, %s2549_s13, %s69_s24  }
  0x12   : > { %172 = sbr.rel (!%p78_p3) target bundleno = 106 (0x6a), region = 24  ;;  %s174_s26 = sand.u32 (%p78_p3), 1, %s2549_s13  }
  0x13   : > { %s2210_s27 = smul.u32 (%p78_p3), 1280, %s174_s26  ;;  %s2028_s28 = sshll.u32 (%p78_p3), %s2565_s17, 2 }
  0x14   : > { %s2207_s29 = smul.u32 (%p78_p3), 640, %s2561_s16 }
  0x15   : > { %s2658_s8 = scalar_lea.vmem (%p78_p3), [#allocation3], %s2210_s27 }
  0x16   : > { %s180_s30 = sadd.s32 (%p78_p3), %s2207_s29, %s2028_s28 }
  0x17   : > { %s2030_s4 = sshll.u32 (%p78_p3), %s180_s30, 2 }
  0x18   : > { %s2653_s7 = scalar_lea.vmem (%p78_p3), %s3217_s1, %s2030_s4 }
  0x19   : > { %v195_v0 = vld [vmem:[%s2653_s7] sm:$0xff]  ;;  %v197_v1 = vld [vmem:[%s2653_s7 + $0x8] sm:$0xff] }
  0x1a   : > { %v199_v2 = vld [vmem:[%s2653_s7 + $0x20] sm:$0xff]  ;;  %196 = vst [vmem:[%s2658_s8] sm:$0xff] %v195_v0  ;;  %198 = vst [vmem:[%s2658_s8 + $0x8] sm:$0xff] %v197_v1  ;;  %v201_v3 = vld [vmem:[%s2653_s7 + $0x28] sm:$0xff] }
  0x1b   : > { %200 = vst [vmem:[%s2658_s8 + $0x10] sm:$0xff] %v199_v2  ;;  %v203_v4 = vld [vmem:[%s2653_s7 + $0x40] sm:$0xff]  ;;  %v205_v5 = vld [vmem:[%s2653_s7 + $0x48] sm:$0xff]  ;;  %202 = vst [vmem:[%s2658_s8 + $0x18] sm:$0xff] %v201_v3 }
  0x1c   : > { %204 = vst [vmem:[%s2658_s8 + $0x20] sm:$0xff] %v203_v4  ;;  %206 = vst [vmem:[%s2658_s8 + $0x28] sm:$0xff] %v205_v5  ;;  %v207_v6 = vld [vmem:[%s2653_s7 + $0x60] sm:$0xff]  ;;  %v209_v7 = vld [vmem:[%s2653_s7 + $0x68] sm:$0xff] }
  0x1d   : > { %v211_v8 = vld [vmem:[%s2653_s7 + $0x80] sm:$0xff]  ;;  %208 = vst [vmem:[%s2658_s8 + $0x30] sm:$0xff] %v207_v6  ;;  %210 = vst [vmem:[%s2658_s8 + $0x38] sm:$0xff] %v209_v7  ;;  %v213_v9 = vld [vmem:[%s2653_s7 + $0x88] sm:$0xff] }
  0x1e   : > { %212 = vst [vmem:[%s2658_s8 + $0x40] sm:$0xff] %v211_v8  ;;  %v215_v10 = vld [vmem:[%s2653_s7 + $0xa0] sm:$0xff]  ;;  %v217_v11 = vld [vmem:[%s2653_s7 + $0xa8] sm:$0xff]  ;;  %214 = vst [vmem:[%s2658_s8 + $0x48] sm:$0xff] %v213_v9 }
  0x1f   : > { %216 = vst [vmem:[%s2658_s8 + $0x50] sm:$0xff] %v215_v10  ;;  %218 = vst [vmem:[%s2658_s8 + $0x58] sm:$0xff] %v217_v11  ;;  %v219_v12 = vld [vmem:[%s2653_s7 + $0xc0] sm:$0xff]  ;;  %v221_v13 = vld [vmem:[%s2653_s7 + $0xc8] sm:$0xff] }
  0x20   : > { %v223_v14 = vld [vmem:[%s2653_s7 + $0xe0] sm:$0xff]  ;;  %220 = vst [vmem:[%s2658_s8 + $0x60] sm:$0xff] %v219_v12  ;;  %222 = vst [vmem:[%s2658_s8 + $0x68] sm:$0xff] %v221_v13  ;;  %v225_v15 = vld [vmem:[%s2653_s7 + $0xe8] sm:$0xff] }
  0x21   : > { %224 = vst [vmem:[%s2658_s8 + $0x70] sm:$0xff] %v223_v14  ;;  %v227_v16 = vld [vmem:[%s2653_s7 + $0x100] sm:$0xff]  ;;  %v229_v17 = vld [vmem:[%s2653_s7 + $0x108] sm:$0xff]  ;;  %226 = vst [vmem:[%s2658_s8 + $0x78] sm:$0xff] %v225_v15 }
  0x22   : > { %228 = vst [vmem:[%s2658_s8 + $0x80] sm:$0xff] %v227_v16  ;;  %230 = vst [vmem:[%s2658_s8 + $0x88] sm:$0xff] %v229_v17  ;;  %v231_v18 = vld [vmem:[%s2653_s7 + $0x120] sm:$0xff]  ;;  %v233_v19 = vld [vmem:[%s2653_s7 + $0x128] sm:$0xff] }
  0x23   : > { %v235_v20 = vld [vmem:[%s2653_s7 + $0x140] sm:$0xff]  ;;  %232 = vst [vmem:[%s2658_s8 + $0x90] sm:$0xff] %v231_v18  ;;  %234 = vst [vmem:[%s2658_s8 + $0x98] sm:$0xff] %v233_v19  ;;  %v237_v21 = vld [vmem:[%s2653_s7 + $0x148] sm:$0xff] }
  0x24   : > { %236 = vst [vmem:[%s2658_s8 + $0xa0] sm:$0xff] %v235_v20  ;;  %v239_v22 = vld [vmem:[%s2653_s7 + $0x160] sm:$0xff]  ;;  %v241_v23 = vld [vmem:[%s2653_s7 + $0x168] sm:$0xff]  ;;  %238 = vst [vmem:[%s2658_s8 + $0xa8] sm:$0xff] %v237_v21 }
  0x25   : > { %240 = vst [vmem:[%s2658_s8 + $0xb0] sm:$0xff] %v239_v22  ;;  %242 = vst [vmem:[%s2658_s8 + $0xb8] sm:$0xff] %v241_v23  ;;  %v243_v24 = vld [vmem:[%s2653_s7 + $0x180] sm:$0xff]  ;;  %v245_v25 = vld [vmem:[%s2653_s7 + $0x188] sm:$0xff] }
  0x26   : > { %v247_v26 = vld [vmem:[%s2653_s7 + $0x1a0] sm:$0xff]  ;;  %244 = vst [vmem:[%s2658_s8 + $0xc0] sm:$0xff] %v243_v24  ;;  %246 = vst [vmem:[%s2658_s8 + $0xc8] sm:$0xff] %v245_v25  ;;  %v249_v27 = vld [vmem:[%s2653_s7 + $0x1a8] sm:$0xff] }
  0x27   : > { %248 = vst [vmem:[%s2658_s8 + $0xd0] sm:$0xff] %v247_v26  ;;  %v251_v28 = vld [vmem:[%s2653_s7 + $0x1c0] sm:$0xff]  ;;  %v253_v29 = vld [vmem:[%s2653_s7 + $0x1c8] sm:$0xff]  ;;  %250 = vst [vmem:[%s2658_s8 + $0xd8] sm:$0xff] %v249_v27 }
  0x28   : > { %252 = vst [vmem:[%s2658_s8 + $0xe0] sm:$0xff] %v251_v28  ;;  %254 = vst [vmem:[%s2658_s8 + $0xe8] sm:$0xff] %v253_v29  ;;  %v255_v30 = vld [vmem:[%s2653_s7 + $0x1e0] sm:$0xff]  ;;  %v257_v31 = vld [vmem:[%s2653_s7 + $0x1e8] sm:$0xff] }
  0x29   : > { %v259_v32 = vld [vmem:[%s2653_s7 + $0x200] sm:$0xff]  ;;  %256 = vst [vmem:[%s2658_s8 + $0xf0] sm:$0xff] %v255_v30  ;;  %258 = vst [vmem:[%s2658_s8 + $0xf8] sm:$0xff] %v257_v31  ;;  %v261_v33 = vld [vmem:[%s2653_s7 + $0x208] sm:$0xff] }
  0x2a   : > { %260 = vst [vmem:[%s2658_s8 + $0x100] sm:$0xff] %v259_v32  ;;  %v263_v34 = vld [vmem:[%s2653_s7 + $0x220] sm:$0xff]  ;;  %v265_v35 = vld [vmem:[%s2653_s7 + $0x228] sm:$0xff]  ;;  %262 = vst [vmem:[%s2658_s8 + $0x108] sm:$0xff] %v261_v33 }
  0x2b   : > { %264 = vst [vmem:[%s2658_s8 + $0x110] sm:$0xff] %v263_v34  ;;  %266 = vst [vmem:[%s2658_s8 + $0x118] sm:$0xff] %v265_v35  ;;  %v267_v36 = vld [vmem:[%s2653_s7 + $0x240] sm:$0xff]  ;;  %v269_v37 = vld [vmem:[%s2653_s7 + $0x248] sm:$0xff] }
  0x2c   : > { %v271_v38 = vld [vmem:[%s2653_s7 + $0x260] sm:$0xff]  ;;  %268 = vst [vmem:[%s2658_s8 + $0x120] sm:$0xff] %v267_v36  ;;  %270 = vst [vmem:[%s2658_s8 + $0x128] sm:$0xff] %v269_v37  ;;  %v273_v39 = vld [vmem:[%s2653_s7 + $0x268] sm:$0xff] }
  0x2d   : > { %272 = vst [vmem:[%s2658_s8 + $0x130] sm:$0xff] %v271_v38  ;;  %v275_v40 = vld [vmem:[%s2653_s7 + $0x280] sm:$0xff]  ;;  %v277_v41 = vld [vmem:[%s2653_s7 + $0x288] sm:$0xff]  ;;  %274 = vst [vmem:[%s2658_s8 + $0x138] sm:$0xff] %v273_v39 }
  0x2e   : > { %276 = vst [vmem:[%s2658_s8 + $0x140] sm:$0xff] %v275_v40  ;;  %278 = vst [vmem:[%s2658_s8 + $0x148] sm:$0xff] %v277_v41  ;;  %v279_v42 = vld [vmem:[%s2653_s7 + $0x2a0] sm:$0xff]  ;;  %v281_v43 = vld [vmem:[%s2653_s7 + $0x2a8] sm:$0xff] }
  0x2f   : > { %v283_v44 = vld [vmem:[%s2653_s7 + $0x2c0] sm:$0xff]  ;;  %280 = vst [vmem:[%s2658_s8 + $0x150] sm:$0xff] %v279_v42  ;;  %282 = vst [vmem:[%s2658_s8 + $0x158] sm:$0xff] %v281_v43  ;;  %v285_v45 = vld [vmem:[%s2653_s7 + $0x2c8] sm:$0xff] }
  0x30   : > { %284 = vst [vmem:[%s2658_s8 + $0x160] sm:$0xff] %v283_v44  ;;  %v287_v46 = vld [vmem:[%s2653_s7 + $0x2e0] sm:$0xff]  ;;  %v289_v47 = vld [vmem:[%s2653_s7 + $0x2e8] sm:$0xff]  ;;  %286 = vst [vmem:[%s2658_s8 + $0x168] sm:$0xff] %v285_v45 }
  0x31   : > { %288 = vst [vmem:[%s2658_s8 + $0x170] sm:$0xff] %v287_v46  ;;  %290 = vst [vmem:[%s2658_s8 + $0x178] sm:$0xff] %v289_v47  ;;  %v291_v48 = vld [vmem:[%s2653_s7 + $0x300] sm:$0xff]  ;;  %v293_v49 = vld [vmem:[%s2653_s7 + $0x308] sm:$0xff] }
  0x32   : > { %v295_v50 = vld [vmem:[%s2653_s7 + $0x320] sm:$0xff]  ;;  %292 = vst [vmem:[%s2658_s8 + $0x180] sm:$0xff] %v291_v48  ;;  %294 = vst [vmem:[%s2658_s8 + $0x188] sm:$0xff] %v293_v49  ;;  %v297_v51 = vld [vmem:[%s2653_s7 + $0x328] sm:$0xff] }
  0x33   : > { %296 = vst [vmem:[%s2658_s8 + $0x190] sm:$0xff] %v295_v50  ;;  %v299_v52 = vld [vmem:[%s2653_s7 + $0x340] sm:$0xff]  ;;  %v301_v53 = vld [vmem:[%s2653_s7 + $0x348] sm:$0xff]  ;;  %298 = vst [vmem:[%s2658_s8 + $0x198] sm:$0xff] %v297_v51 }
  0x34   : > { %300 = vst [vmem:[%s2658_s8 + $0x1a0] sm:$0xff] %v299_v52  ;;  %302 = vst [vmem:[%s2658_s8 + $0x1a8] sm:$0xff] %v301_v53  ;;  %v303_v54 = vld [vmem:[%s2653_s7 + $0x360] sm:$0xff]  ;;  %v305_v55 = vld [vmem:[%s2653_s7 + $0x368] sm:$0xff] }
  0x35   : > { %v307_v56 = vld [vmem:[%s2653_s7 + $0x380] sm:$0xff]  ;;  %304 = vst [vmem:[%s2658_s8 + $0x1b0] sm:$0xff] %v303_v54  ;;  %306 = vst [vmem:[%s2658_s8 + $0x1b8] sm:$0xff] %v305_v55  ;;  %v309_v57 = vld [vmem:[%s2653_s7 + $0x388] sm:$0xff] }
  0x36   : > { %308 = vst [vmem:[%s2658_s8 + $0x1c0] sm:$0xff] %v307_v56  ;;  %v311_v58 = vld [vmem:[%s2653_s7 + $0x3a0] sm:$0xff]  ;;  %v313_v59 = vld [vmem:[%s2653_s7 + $0x3a8] sm:$0xff]  ;;  %310 = vst [vmem:[%s2658_s8 + $0x1c8] sm:$0xff] %v309_v57 }
  0x37   : > { %312 = vst [vmem:[%s2658_s8 + $0x1d0] sm:$0xff] %v311_v58  ;;  %314 = vst [vmem:[%s2658_s8 + $0x1d8] sm:$0xff] %v313_v59  ;;  %v315_v60 = vld [vmem:[%s2653_s7 + $0x3c0] sm:$0xff]  ;;  %v317_v61 = vld [vmem:[%s2653_s7 + $0x3c8] sm:$0xff] }
  0x38   : > { %v319_v62 = vld [vmem:[%s2653_s7 + $0x3e0] sm:$0xff]  ;;  %316 = vst [vmem:[%s2658_s8 + $0x1e0] sm:$0xff] %v315_v60  ;;  %318 = vst [vmem:[%s2658_s8 + $0x1e8] sm:$0xff] %v317_v61  ;;  %v321_v63 = vld [vmem:[%s2653_s7 + $0x3e8] sm:$0xff] }
  0x39   : > { %320 = vst [vmem:[%s2658_s8 + $0x1f0] sm:$0xff] %v319_v62  ;;  %v323_v0 = vld [vmem:[%s2653_s7 + $0x400] sm:$0xff]  ;;  %v325_v1 = vld [vmem:[%s2653_s7 + $0x408] sm:$0xff]  ;;  %322 = vst [vmem:[%s2658_s8 + $0x1f8] sm:$0xff] %v321_v63 }
  0x3a   : > { %324 = vst [vmem:[%s2658_s8 + $0x200] sm:$0xff] %v323_v0  ;;  %326 = vst [vmem:[%s2658_s8 + $0x208] sm:$0xff] %v325_v1  ;;  %v327_v2 = vld [vmem:[%s2653_s7 + $0x420] sm:$0xff]  ;;  %v329_v3 = vld [vmem:[%s2653_s7 + $0x428] sm:$0xff] }
  0x3b   : > { %v331_v4 = vld [vmem:[%s2653_s7 + $0x440] sm:$0xff]  ;;  %328 = vst [vmem:[%s2658_s8 + $0x210] sm:$0xff] %v327_v2  ;;  %330 = vst [vmem:[%s2658_s8 + $0x218] sm:$0xff] %v329_v3  ;;  %v333_v5 = vld [vmem:[%s2653_s7 + $0x448] sm:$0xff] }
  0x3c   : > { %332 = vst [vmem:[%s2658_s8 + $0x220] sm:$0xff] %v331_v4  ;;  %v335_v6 = vld [vmem:[%s2653_s7 + $0x460] sm:$0xff]  ;;  %v337_v7 = vld [vmem:[%s2653_s7 + $0x468] sm:$0xff]  ;;  %334 = vst [vmem:[%s2658_s8 + $0x228] sm:$0xff] %v333_v5 }
  0x3d   : > { %336 = vst [vmem:[%s2658_s8 + $0x230] sm:$0xff] %v335_v6  ;;  %338 = vst [vmem:[%s2658_s8 + $0x238] sm:$0xff] %v337_v7  ;;  %v339_v8 = vld [vmem:[%s2653_s7 + $0x480] sm:$0xff]  ;;  %v341_v9 = vld [vmem:[%s2653_s7 + $0x488] sm:$0xff] }
  0x3e   : > { %v343_v10 = vld [vmem:[%s2653_s7 + $0x4a0] sm:$0xff]  ;;  %340 = vst [vmem:[%s2658_s8 + $0x240] sm:$0xff] %v339_v8  ;;  %342 = vst [vmem:[%s2658_s8 + $0x248] sm:$0xff] %v341_v9  ;;  %v345_v11 = vld [vmem:[%s2653_s7 + $0x4a8] sm:$0xff] }
  0x3f   : > { %344 = vst [vmem:[%s2658_s8 + $0x250] sm:$0xff] %v343_v10  ;;  %v347_v12 = vld [vmem:[%s2653_s7 + $0x4c0] sm:$0xff]  ;;  %v349_v13 = vld [vmem:[%s2653_s7 + $0x4c8] sm:$0xff]  ;;  %346 = vst [vmem:[%s2658_s8 + $0x258] sm:$0xff] %v345_v11 }
  0x40   : > { %348 = vst [vmem:[%s2658_s8 + $0x260] sm:$0xff] %v347_v12  ;;  %350 = vst [vmem:[%s2658_s8 + $0x268] sm:$0xff] %v349_v13  ;;  %v351_v14 = vld [vmem:[%s2653_s7 + $0x4e0] sm:$0xff]  ;;  %v353_v15 = vld [vmem:[%s2653_s7 + $0x4e8] sm:$0xff] }
  0x41   : > { %v355_v16 = vld [vmem:[%s2653_s7 + $0x500] sm:$0xff]  ;;  %352 = vst [vmem:[%s2658_s8 + $0x270] sm:$0xff] %v351_v14  ;;  %354 = vst [vmem:[%s2658_s8 + $0x278] sm:$0xff] %v353_v15  ;;  %v357_v17 = vld [vmem:[%s2653_s7 + $0x508] sm:$0xff] }
  0x42   : > { %356 = vst [vmem:[%s2658_s8 + $0x280] sm:$0xff] %v355_v16  ;;  %v359_v18 = vld [vmem:[%s2653_s7 + $0x520] sm:$0xff]  ;;  %v361_v19 = vld [vmem:[%s2653_s7 + $0x528] sm:$0xff]  ;;  %358 = vst [vmem:[%s2658_s8 + $0x288] sm:$0xff] %v357_v17 }
  0x43   : > { %360 = vst [vmem:[%s2658_s8 + $0x290] sm:$0xff] %v359_v18  ;;  %362 = vst [vmem:[%s2658_s8 + $0x298] sm:$0xff] %v361_v19  ;;  %v363_v20 = vld [vmem:[%s2653_s7 + $0x540] sm:$0xff]  ;;  %v365_v21 = vld [vmem:[%s2653_s7 + $0x548] sm:$0xff] }
  0x44   : > { %v367_v22 = vld [vmem:[%s2653_s7 + $0x560] sm:$0xff]  ;;  %364 = vst [vmem:[%s2658_s8 + $0x2a0] sm:$0xff] %v363_v20  ;;  %366 = vst [vmem:[%s2658_s8 + $0x2a8] sm:$0xff] %v365_v21  ;;  %v369_v23 = vld [vmem:[%s2653_s7 + $0x568] sm:$0xff] }
  0x45   : > { %368 = vst [vmem:[%s2658_s8 + $0x2b0] sm:$0xff] %v367_v22  ;;  %v371_v24 = vld [vmem:[%s2653_s7 + $0x580] sm:$0xff]  ;;  %v373_v25 = vld [vmem:[%s2653_s7 + $0x588] sm:$0xff]  ;;  %370 = vst [vmem:[%s2658_s8 + $0x2b8] sm:$0xff] %v369_v23 }
  0x46   : > { %372 = vst [vmem:[%s2658_s8 + $0x2c0] sm:$0xff] %v371_v24  ;;  %374 = vst [vmem:[%s2658_s8 + $0x2c8] sm:$0xff] %v373_v25  ;;  %v375_v26 = vld [vmem:[%s2653_s7 + $0x5a0] sm:$0xff]  ;;  %v377_v27 = vld [vmem:[%s2653_s7 + $0x5a8] sm:$0xff] }
  0x47   : > { %v379_v28 = vld [vmem:[%s2653_s7 + $0x5c0] sm:$0xff]  ;;  %376 = vst [vmem:[%s2658_s8 + $0x2d0] sm:$0xff] %v375_v26  ;;  %378 = vst [vmem:[%s2658_s8 + $0x2d8] sm:$0xff] %v377_v27  ;;  %v381_v29 = vld [vmem:[%s2653_s7 + $0x5c8] sm:$0xff] }
  0x48   : > { %380 = vst [vmem:[%s2658_s8 + $0x2e0] sm:$0xff] %v379_v28  ;;  %v383_v30 = vld [vmem:[%s2653_s7 + $0x5e0] sm:$0xff]  ;;  %v385_v31 = vld [vmem:[%s2653_s7 + $0x5e8] sm:$0xff]  ;;  %382 = vst [vmem:[%s2658_s8 + $0x2e8] sm:$0xff] %v381_v29 }
  0x49   : > { %384 = vst [vmem:[%s2658_s8 + $0x2f0] sm:$0xff] %v383_v30  ;;  %386 = vst [vmem:[%s2658_s8 + $0x2f8] sm:$0xff] %v385_v31  ;;  %v387_v32 = vld [vmem:[%s2653_s7 + $0x600] sm:$0xff]  ;;  %v389_v33 = vld [vmem:[%s2653_s7 + $0x608] sm:$0xff] }
  0x4a   : > { %v391_v34 = vld [vmem:[%s2653_s7 + $0x620] sm:$0xff]  ;;  %388 = vst [vmem:[%s2658_s8 + $0x300] sm:$0xff] %v387_v32  ;;  %390 = vst [vmem:[%s2658_s8 + $0x308] sm:$0xff] %v389_v33  ;;  %v393_v35 = vld [vmem:[%s2653_s7 + $0x628] sm:$0xff] }
  0x4b   : > { %392 = vst [vmem:[%s2658_s8 + $0x310] sm:$0xff] %v391_v34  ;;  %v395_v36 = vld [vmem:[%s2653_s7 + $0x640] sm:$0xff]  ;;  %v397_v37 = vld [vmem:[%s2653_s7 + $0x648] sm:$0xff]  ;;  %394 = vst [vmem:[%s2658_s8 + $0x318] sm:$0xff] %v393_v35 }
  0x4c   : > { %396 = vst [vmem:[%s2658_s8 + $0x320] sm:$0xff] %v395_v36  ;;  %398 = vst [vmem:[%s2658_s8 + $0x328] sm:$0xff] %v397_v37  ;;  %v399_v38 = vld [vmem:[%s2653_s7 + $0x660] sm:$0xff]  ;;  %v401_v39 = vld [vmem:[%s2653_s7 + $0x668] sm:$0xff] }
  0x4d   : > { %v403_v40 = vld [vmem:[%s2653_s7 + $0x680] sm:$0xff]  ;;  %400 = vst [vmem:[%s2658_s8 + $0x330] sm:$0xff] %v399_v38  ;;  %402 = vst [vmem:[%s2658_s8 + $0x338] sm:$0xff] %v401_v39  ;;  %v405_v41 = vld [vmem:[%s2653_s7 + $0x688] sm:$0xff] }
  0x4e   : > { %404 = vst [vmem:[%s2658_s8 + $0x340] sm:$0xff] %v403_v40  ;;  %v407_v42 = vld [vmem:[%s2653_s7 + $0x6a0] sm:$0xff]  ;;  %v409_v43 = vld [vmem:[%s2653_s7 + $0x6a8] sm:$0xff]  ;;  %406 = vst [vmem:[%s2658_s8 + $0x348] sm:$0xff] %v405_v41 }
  0x4f   : > { %408 = vst [vmem:[%s2658_s8 + $0x350] sm:$0xff] %v407_v42  ;;  %410 = vst [vmem:[%s2658_s8 + $0x358] sm:$0xff] %v409_v43  ;;  %v411_v44 = vld [vmem:[%s2653_s7 + $0x6c0] sm:$0xff]  ;;  %v413_v45 = vld [vmem:[%s2653_s7 + $0x6c8] sm:$0xff] }
  0x50   : > { %v415_v46 = vld [vmem:[%s2653_s7 + $0x6e0] sm:$0xff]  ;;  %412 = vst [vmem:[%s2658_s8 + $0x360] sm:$0xff] %v411_v44  ;;  %414 = vst [vmem:[%s2658_s8 + $0x368] sm:$0xff] %v413_v45  ;;  %v417_v47 = vld [vmem:[%s2653_s7 + $0x6e8] sm:$0xff] }
  0x51   : > { %416 = vst [vmem:[%s2658_s8 + $0x370] sm:$0xff] %v415_v46  ;;  %v419_v48 = vld [vmem:[%s2653_s7 + $0x700] sm:$0xff]  ;;  %v421_v49 = vld [vmem:[%s2653_s7 + $0x708] sm:$0xff]  ;;  %418 = vst [vmem:[%s2658_s8 + $0x378] sm:$0xff] %v417_v47 }
  0x52   : > { %420 = vst [vmem:[%s2658_s8 + $0x380] sm:$0xff] %v419_v48  ;;  %422 = vst [vmem:[%s2658_s8 + $0x388] sm:$0xff] %v421_v49  ;;  %v423_v50 = vld [vmem:[%s2653_s7 + $0x720] sm:$0xff]  ;;  %v425_v51 = vld [vmem:[%s2653_s7 + $0x728] sm:$0xff] }
  0x53   : > { %v427_v52 = vld [vmem:[%s2653_s7 + $0x740] sm:$0xff]  ;;  %424 = vst [vmem:[%s2658_s8 + $0x390] sm:$0xff] %v423_v50  ;;  %426 = vst [vmem:[%s2658_s8 + $0x398] sm:$0xff] %v425_v51  ;;  %v429_v53 = vld [vmem:[%s2653_s7 + $0x748] sm:$0xff] }
  0x54   : > { %428 = vst [vmem:[%s2658_s8 + $0x3a0] sm:$0xff] %v427_v52  ;;  %v431_v54 = vld [vmem:[%s2653_s7 + $0x760] sm:$0xff]  ;;  %v433_v55 = vld [vmem:[%s2653_s7 + $0x768] sm:$0xff]  ;;  %430 = vst [vmem:[%s2658_s8 + $0x3a8] sm:$0xff] %v429_v53 }
  0x55   : > { %432 = vst [vmem:[%s2658_s8 + $0x3b0] sm:$0xff] %v431_v54  ;;  %434 = vst [vmem:[%s2658_s8 + $0x3b8] sm:$0xff] %v433_v55  ;;  %v435_v56 = vld [vmem:[%s2653_s7 + $0x780] sm:$0xff]  ;;  %v437_v57 = vld [vmem:[%s2653_s7 + $0x788] sm:$0xff] }
  0x56   : > { %v439_v58 = vld [vmem:[%s2653_s7 + $0x7a0] sm:$0xff]  ;;  %436 = vst [vmem:[%s2658_s8 + $0x3c0] sm:$0xff] %v435_v56  ;;  %438 = vst [vmem:[%s2658_s8 + $0x3c8] sm:$0xff] %v437_v57  ;;  %v441_v59 = vld [vmem:[%s2653_s7 + $0x7a8] sm:$0xff] }
  0x57   : > { %440 = vst [vmem:[%s2658_s8 + $0x3d0] sm:$0xff] %v439_v58  ;;  %v443_v60 = vld [vmem:[%s2653_s7 + $0x7c0] sm:$0xff]  ;;  %v445_v61 = vld [vmem:[%s2653_s7 + $0x7c8] sm:$0xff]  ;;  %442 = vst [vmem:[%s2658_s8 + $0x3d8] sm:$0xff] %v441_v59 }
  0x58   : > { %444 = vst [vmem:[%s2658_s8 + $0x3e0] sm:$0xff] %v443_v60  ;;  %446 = vst [vmem:[%s2658_s8 + $0x3e8] sm:$0xff] %v445_v61  ;;  %v447_v62 = vld [vmem:[%s2653_s7 + $0x7e0] sm:$0xff]  ;;  %v449_v63 = vld [vmem:[%s2653_s7 + $0x7e8] sm:$0xff] }
  0x59   : > { %v451_v0 = vld [vmem:[%s2653_s7 + $0x800] sm:$0xff]  ;;  %448 = vst [vmem:[%s2658_s8 + $0x3f0] sm:$0xff] %v447_v62  ;;  %450 = vst [vmem:[%s2658_s8 + $0x3f8] sm:$0xff] %v449_v63  ;;  %v453_v1 = vld [vmem:[%s2653_s7 + $0x808] sm:$0xff] }
  0x5a   : > { %452 = vst [vmem:[%s2658_s8 + $0x400] sm:$0xff] %v451_v0  ;;  %v455_v2 = vld [vmem:[%s2653_s7 + $0x820] sm:$0xff]  ;;  %v457_v3 = vld [vmem:[%s2653_s7 + $0x828] sm:$0xff]  ;;  %454 = vst [vmem:[%s2658_s8 + $0x408] sm:$0xff] %v453_v1 }
  0x5b   : > { %456 = vst [vmem:[%s2658_s8 + $0x410] sm:$0xff] %v455_v2  ;;  %458 = vst [vmem:[%s2658_s8 + $0x418] sm:$0xff] %v457_v3  ;;  %v459_v4 = vld [vmem:[%s2653_s7 + $0x840] sm:$0xff]  ;;  %v461_v5 = vld [vmem:[%s2653_s7 + $0x848] sm:$0xff] }
  0x5c   : > { %v463_v6 = vld [vmem:[%s2653_s7 + $0x860] sm:$0xff]  ;;  %460 = vst [vmem:[%s2658_s8 + $0x420] sm:$0xff] %v459_v4  ;;  %462 = vst [vmem:[%s2658_s8 + $0x428] sm:$0xff] %v461_v5  ;;  %v465_v7 = vld [vmem:[%s2653_s7 + $0x868] sm:$0xff] }
  0x5d   : > { %464 = vst [vmem:[%s2658_s8 + $0x430] sm:$0xff] %v463_v6  ;;  %v467_v8 = vld [vmem:[%s2653_s7 + $0x880] sm:$0xff]  ;;  %v469_v9 = vld [vmem:[%s2653_s7 + $0x888] sm:$0xff]  ;;  %466 = vst [vmem:[%s2658_s8 + $0x438] sm:$0xff] %v465_v7 }
  0x5e   : > { %468 = vst [vmem:[%s2658_s8 + $0x440] sm:$0xff] %v467_v8  ;;  %470 = vst [vmem:[%s2658_s8 + $0x448] sm:$0xff] %v469_v9  ;;  %v471_v10 = vld [vmem:[%s2653_s7 + $0x8a0] sm:$0xff]  ;;  %v473_v11 = vld [vmem:[%s2653_s7 + $0x8a8] sm:$0xff] }
  0x5f   : > { %v475_v12 = vld [vmem:[%s2653_s7 + $0x8c0] sm:$0xff]  ;;  %472 = vst [vmem:[%s2658_s8 + $0x450] sm:$0xff] %v471_v10  ;;  %474 = vst [vmem:[%s2658_s8 + $0x458] sm:$0xff] %v473_v11  ;;  %v477_v13 = vld [vmem:[%s2653_s7 + $0x8c8] sm:$0xff] }
  0x60   : > { %476 = vst [vmem:[%s2658_s8 + $0x460] sm:$0xff] %v475_v12  ;;  %v479_v14 = vld [vmem:[%s2653_s7 + $0x8e0] sm:$0xff]  ;;  %v481_v15 = vld [vmem:[%s2653_s7 + $0x8e8] sm:$0xff]  ;;  %478 = vst [vmem:[%s2658_s8 + $0x468] sm:$0xff] %v477_v13 }
  0x61   : > { %480 = vst [vmem:[%s2658_s8 + $0x470] sm:$0xff] %v479_v14  ;;  %482 = vst [vmem:[%s2658_s8 + $0x478] sm:$0xff] %v481_v15  ;;  %v483_v16 = vld [vmem:[%s2653_s7 + $0x900] sm:$0xff]  ;;  %v485_v17 = vld [vmem:[%s2653_s7 + $0x908] sm:$0xff] }
  0x62   : > { %v487_v18 = vld [vmem:[%s2653_s7 + $0x920] sm:$0xff]  ;;  %484 = vst [vmem:[%s2658_s8 + $0x480] sm:$0xff] %v483_v16  ;;  %486 = vst [vmem:[%s2658_s8 + $0x488] sm:$0xff] %v485_v17  ;;  %v489_v19 = vld [vmem:[%s2653_s7 + $0x928] sm:$0xff] }
  0x63   : > { %488 = vst [vmem:[%s2658_s8 + $0x490] sm:$0xff] %v487_v18  ;;  %v491_v20 = vld [vmem:[%s2653_s7 + $0x940] sm:$0xff]  ;;  %v493_v21 = vld [vmem:[%s2653_s7 + $0x948] sm:$0xff]  ;;  %490 = vst [vmem:[%s2658_s8 + $0x498] sm:$0xff] %v489_v19 }
  0x64   : > { %492 = vst [vmem:[%s2658_s8 + $0x4a0] sm:$0xff] %v491_v20  ;;  %494 = vst [vmem:[%s2658_s8 + $0x4a8] sm:$0xff] %v493_v21  ;;  %v495_v22 = vld [vmem:[%s2653_s7 + $0x960] sm:$0xff]  ;;  %v497_v23 = vld [vmem:[%s2653_s7 + $0x968] sm:$0xff] }
  0x65   : > { %v499_v24 = vld [vmem:[%s2653_s7 + $0x980] sm:$0xff]  ;;  %496 = vst [vmem:[%s2658_s8 + $0x4b0] sm:$0xff] %v495_v22  ;;  %498 = vst [vmem:[%s2658_s8 + $0x4b8] sm:$0xff] %v497_v23  ;;  %v501_v25 = vld [vmem:[%s2653_s7 + $0x988] sm:$0xff] }
  0x66   : > { %500 = vst [vmem:[%s2658_s8 + $0x4c0] sm:$0xff] %v499_v24  ;;  %v503_v26 = vld [vmem:[%s2653_s7 + $0x9a0] sm:$0xff]  ;;  %v505_v27 = vld [vmem:[%s2653_s7 + $0x9a8] sm:$0xff]  ;;  %502 = vst [vmem:[%s2658_s8 + $0x4c8] sm:$0xff] %v501_v25 }
  0x67   : > { %504 = vst [vmem:[%s2658_s8 + $0x4d0] sm:$0xff] %v503_v26  ;;  %506 = vst [vmem:[%s2658_s8 + $0x4d8] sm:$0xff] %v505_v27  ;;  %v507_v28 = vld [vmem:[%s2653_s7 + $0x9c0] sm:$0xff]  ;;  %v509_v29 = vld [vmem:[%s2653_s7 + $0x9c8] sm:$0xff] }
  0x68   : > { %v511_v30 = vld [vmem:[%s2653_s7 + $0x9e0] sm:$0xff]  ;;  %508 = vst [vmem:[%s2658_s8 + $0x4e0] sm:$0xff] %v507_v28  ;;  %510 = vst [vmem:[%s2658_s8 + $0x4e8] sm:$0xff] %v509_v29  ;;  %v513_v31 = vld [vmem:[%s2653_s7 + $0x9e8] sm:$0xff] }
  0x69   : > { %512 = vst [vmem:[%s2658_s8 + $0x4f0] sm:$0xff] %v511_v30  ;;  %514 = vst [vmem:[%s2658_s8 + $0x4f8] sm:$0xff] %v513_v31 }
  0x6a PF: > { %p2031_p7 = scmp.ge.s32.totalorder %s2569_s18, 1  ;;  %p527_p8 = scmp.lt.s32.totalorder %s2569_s18, 11 }
  0x6c   : > { %p528_p9 = pnand %p2031_p7, %p527_p8 }
  0x6d   : > { %s534_s9 = sand.u32 (!%p528_p9), 1, %s2545_s12   ;;  %s574_s10 = smul.u32 (!%p528_p9), 5, %s2553_s14 }
  0x6e   : > { %531 = sbr.rel (%p528_p9) target bundleno = 520 (0x208), region = 51  ;;  %s2033_s21 = sshll.u32 (!%p528_p9), %s2557_s15, 2 }
  0x6f   : > { %s2211_s11 = smul.u32 (!%p528_p9), 1280, %s534_s9  ;;  %p577_p10 = scmp.lt.s32.totalorder (!%p528_p9), %s574_s10, 24 }
  0x70   : > { %p587_p11 = scmp.lt.s32.totalorder (!%p528_p9), %s2033_s21, 7  ;;  %p2036_p12 = scmp.ne.s32.totalorder (!%p528_p9), %s2553_s14, 0 }
  0x71   : > { %s2999_s5 = scalar_lea.vmem (!%p528_p9), [#allocation3], %s2211_s11 }
  0x75   : > { %s3233_s10 = smov (!%p577_p10, %s574_s10), 24  ;;  %s3235_s21 = smov (!%p587_p11, %s2033_s21), 7 }
  0x76   : > { %s2032_s22 = sshll.u32 %s3233_s10, 2  ;;  %s589_s12 = scalar_lea.vmem %s3218_s2, %s3235_s21  ;;  %v2571_v32 = vmov (!%p2036_p12), 0.0  }
  0x77   : > { %s2987_s26 = scalar_lea.vmem %s3216_s0, %s2032_s22  ;;  %s2035_s29 = sshll.u32 %s3235_s21, 2  ;;  %606 = vst [vmem:[#allocation2] sm:$0xff] (!%p2036_p12), %v2571_v32  ;;  %607 = vst [vmem:[#allocation2 + $0x8] sm:$0xff] (!%p2036_p12), %v2571_v32 }
  0x78   : > { %s2997_s4 = scalar_lea.vmem %s3219_s3, %s2035_s29  ;;  %605 = sbr.rel (%p2036_p12) target bundleno = 127 (0x7f), region = 59  ;;  %608 = vst [vmem:[#allocation2 + $0x10] sm:$0xff] (!%p2036_p12), %v2571_v32  ;;  %609 = vst [vmem:[#allocation2 + $0x18] sm:$0xff] (!%p2036_p12), %v2571_v32 }
  0x7f PF: > { %v2270_v33 = vld [vmem:[%s2999_s5 + $0x4] ss:$16 sps:$4 sm:$0xff]   ;;  %v2274_v35 = vld [vmem:[%s2999_s5] ss:$16 sps:$4 sm:$0xff]   ;;  %v615_v17 = vld [vmem:[%s2987_s26 + $0x8] sm:$0xff]  ;;  %p2202_p13 = scmp.ne.s32.totalorder %s2553_s14, 4 }
  0x80   : > { %v2272_v34 = vld [vmem:[%s2999_s5 + $0x204] ss:$16 sps:$4 sm:$0xff]   ;;  %1595 = vmatprep.subr.bf16.mxu0 %v2270_v33  ;;  %v2275_v36 = vld [vmem:[%s2999_s5 + $0x200] ss:$16 sps:$4 sm:$0xff]   ;;  %v3054_v20 = vcombine.high %v615_v17, %v615_v17 }
  0x81   : > { %1636 = vmatprep.subr.bf16.mxu1 %v2272_v34  ;;  %v2276_v37 = vld [vmem:[%s2999_s5 + $0x24] ss:$16 sps:$4 sm:$0xff]   ;;  %1596 = vmatpush1.bf16.msra.mxu0 %v2274_v35  ;;  %v2280_v39 = vld [vmem:[%s2999_s5 + $0x20] ss:$16 sps:$4 sm:$0xff]  }
  0x82   : > { %1637 = vmatpush1.bf16.msra.mxu1 %v2275_v36  ;;  %v2278_v38 = vld [vmem:[%s2999_s5 + $0x224] ss:$16 sps:$4 sm:$0xff]   ;;  %1597 = vmatprep.subr.bf16.mxu0 %v2276_v37  ;;  %v2281_v40 = vld [vmem:[%s2999_s5 + $0x220] ss:$16 sps:$4 sm:$0xff]  }
  0x83   : > { %1638 = vmatprep.subr.bf16.mxu1 %v2278_v38  ;;  %v2282_v41 = vld [vmem:[%s2999_s5 + $0x44] ss:$16 sps:$4 sm:$0xff]   ;;  %v2286_v43 = vld [vmem:[%s2999_s5 + $0x40] ss:$16 sps:$4 sm:$0xff]   ;;  %1668 = vmatprep.mubr.bf16.mxu1 %v3054_v20  ;;  %v2375_v38 = vld [vmem:[%s2999_s5 + $0xc] ss:$16 sps:$4 sm:$0xff]  }
  0x84   : > { %v2284_v42 = vld [vmem:[%s2999_s5 + $0x244] ss:$16 sps:$4 sm:$0xff]   ;;  %v2287_v44 = vld [vmem:[%s2999_s5 + $0x240] ss:$16 sps:$4 sm:$0xff]  }
  0x85   : > { %1598 = vmatpush1.bf16.msra.mxu0 %v2280_v39  ;;  %v2288_v45 = vld [vmem:[%s2999_s5 + $0x64] ss:$16 sps:$4 sm:$0xff]   ;;  %v2292_v47 = vld [vmem:[%s2999_s5 + $0x60] ss:$16 sps:$4 sm:$0xff]  }
  0x86   : > { %1639 = vmatpush1.bf16.msra.mxu1 %v2281_v40  ;;  %1599 = vmatprep.subr.bf16.mxu0 %v2282_v41  ;;  %v2290_v46 = vld [vmem:[%s2999_s5 + $0x264] ss:$16 sps:$4 sm:$0xff]   ;;  %v2293_v48 = vld [vmem:[%s2999_s5 + $0x260] ss:$16 sps:$4 sm:$0xff]   ;;  %v3078_v40 = vcombine.low %v615_v17, %v615_v17  ;;  %v2433_v17 = vld [vmem:[%s2999_s5 + $0x14c] ss:$16 sps:$4 sm:$0xff]  }
  0x87   : > { %1640 = vmatprep.subr.bf16.mxu1 %v2284_v42  ;;  %v2294_v49 = vld [vmem:[%s2999_s5 + $0x84] ss:$16 sps:$4 sm:$0xff]   ;;  %v2298_v51 = vld [vmem:[%s2999_s5 + $0x80] ss:$16 sps:$4 sm:$0xff]   ;;  %v2373_v42 = vld [vmem:[%s2999_s5 + $0x8] ss:$16 sps:$4 sm:$0xff]  }
  0x88   : > { %v2296_v50 = vld [vmem:[%s2999_s5 + $0x284] ss:$16 sps:$4 sm:$0xff]   ;;  %v2299_v52 = vld [vmem:[%s2999_s5 + $0x280] ss:$16 sps:$4 sm:$0xff]  }
  0x89   : > { %1600 = vmatpush1.bf16.msra.mxu0 %v2286_v43  ;;  %v2300_v53 = vld [vmem:[%s2999_s5 + $0xa4] ss:$16 sps:$4 sm:$0xff]   ;;  %v2304_v55 = vld [vmem:[%s2999_s5 + $0xa0] ss:$16 sps:$4 sm:$0xff]  }
  0x8a   : > { %1641 = vmatpush1.bf16.msra.mxu1 %v2287_v44  ;;  %1601 = vmatprep.subr.bf16.mxu0 %v2288_v45  ;;  %v2302_v54 = vld [vmem:[%s2999_s5 + $0x2a4] ss:$16 sps:$4 sm:$0xff]   ;;  %v2305_v56 = vld [vmem:[%s2999_s5 + $0x2a0] ss:$16 sps:$4 sm:$0xff]   ;;  %v2381_v44 = vld [vmem:[%s2999_s5 + $0x2c] ss:$16 sps:$4 sm:$0xff]  }
  0x8b   : > { %1642 = vmatprep.subr.bf16.mxu1 %v2290_v46  ;;  %v2306_v57 = vld [vmem:[%s2999_s5 + $0xc4] ss:$16 sps:$4 sm:$0xff]   ;;  %v2310_v59 = vld [vmem:[%s2999_s5 + $0xc0] ss:$16 sps:$4 sm:$0xff]   ;;  %v2379_v46 = vld [vmem:[%s2999_s5 + $0x28] ss:$16 sps:$4 sm:$0xff]  }
  0x8c   : > { %v2308_v58 = vld [vmem:[%s2999_s5 + $0x2c4] ss:$16 sps:$4 sm:$0xff]   ;;  %v2311_v60 = vld [vmem:[%s2999_s5 + $0x2c0] ss:$16 sps:$4 sm:$0xff]  }
  0x8d   : > { %1602 = vmatpush1.bf16.msra.mxu0 %v2292_v47  ;;  %v2312_v61 = vld [vmem:[%s2999_s5 + $0xe4] ss:$16 sps:$4 sm:$0xff]   ;;  %v2316_v63 = vld [vmem:[%s2999_s5 + $0xe0] ss:$16 sps:$4 sm:$0xff]  }
  0x8e   : > { %1643 = vmatpush1.bf16.msra.mxu1 %v2293_v48  ;;  %1603 = vmatprep.subr.bf16.mxu0 %v2294_v49  ;;  %v2314_v62 = vld [vmem:[%s2999_s5 + $0x2e4] ss:$16 sps:$4 sm:$0xff]   ;;  %v2317_v0 = vld [vmem:[%s2999_s5 + $0x2e0] ss:$16 sps:$4 sm:$0xff]   ;;  %v2387_v48 = vld [vmem:[%s2999_s5 + $0x4c] ss:$16 sps:$4 sm:$0xff]  }
  0x8f   : > { %1644 = vmatprep.subr.bf16.mxu1 %v2296_v50  ;;  %v2318_v1 = vld [vmem:[%s2999_s5 + $0x104] ss:$16 sps:$4 sm:$0xff]   ;;  %v2322_v3 = vld [vmem:[%s2999_s5 + $0x100] ss:$16 sps:$4 sm:$0xff]   ;;  %v2572_v49 = vmov 0  }
  0x90   : > { %v2320_v2 = vld [vmem:[%s2999_s5 + $0x304] ss:$16 sps:$4 sm:$0xff]   ;;  %v2323_v4 = vld [vmem:[%s2999_s5 + $0x300] ss:$16 sps:$4 sm:$0xff]  }
  0x91   : > { %1604 = vmatpush1.bf16.msra.mxu0 %v2298_v51  ;;  %v2324_v5 = vld [vmem:[%s2999_s5 + $0x124] ss:$16 sps:$4 sm:$0xff]   ;;  %v2328_v7 = vld [vmem:[%s2999_s5 + $0x120] ss:$16 sps:$4 sm:$0xff]   ;;  %v2385_v51 = vld [vmem:[%s2999_s5 + $0x48] ss:$16 sps:$4 sm:$0xff]  }
  0x92   : > { %1645 = vmatpush1.bf16.msra.mxu1 %v2299_v52  ;;  %1605 = vmatprep.subr.bf16.mxu0 %v2300_v53  ;;  %v2326_v6 = vld [vmem:[%s2999_s5 + $0x324] ss:$16 sps:$4 sm:$0xff]   ;;  %v2329_v8 = vld [vmem:[%s2999_s5 + $0x320] ss:$16 sps:$4 sm:$0xff]   ;;  %v2393_v53 = vld [vmem:[%s2999_s5 + $0x6c] ss:$16 sps:$4 sm:$0xff]  }
  0x93   : > { %1646 = vmatprep.subr.bf16.mxu1 %v2302_v54  ;;  %v2330_v9 = vld [vmem:[%s2999_s5 + $0x144] ss:$16 sps:$4 sm:$0xff]   ;;  %v2334_v11 = vld [vmem:[%s2999_s5 + $0x140] ss:$16 sps:$4 sm:$0xff]  }
  0x94   : > { %v2332_v10 = vld [vmem:[%s2999_s5 + $0x344] ss:$16 sps:$4 sm:$0xff]   ;;  %v2335_v12 = vld [vmem:[%s2999_s5 + $0x340] ss:$16 sps:$4 sm:$0xff]  }
  0x95   : > { %1606 = vmatpush1.bf16.msra.mxu0 %v2304_v55  ;;  %v2336_v13 = vld [vmem:[%s2999_s5 + $0x164] ss:$16 sps:$4 sm:$0xff]   ;;  %v2340_v18 = vld [vmem:[%s2999_s5 + $0x160] ss:$16 sps:$4 sm:$0xff]   ;;  %v2391_v55 = vld [vmem:[%s2999_s5 + $0x68] ss:$16 sps:$4 sm:$0xff]  }
  0x96   : > { %1647 = vmatpush1.bf16.msra.mxu1 %v2305_v56  ;;  %1607 = vmatprep.subr.bf16.mxu0 %v2306_v57  ;;  %v2338_v14 = vld [vmem:[%s2999_s5 + $0x364] ss:$16 sps:$4 sm:$0xff]   ;;  %v2341_v19 = vld [vmem:[%s2999_s5 + $0x360] ss:$16 sps:$4 sm:$0xff]   ;;  %v2399_v57 = vld [vmem:[%s2999_s5 + $0x8c] ss:$16 sps:$4 sm:$0xff]  }
  0x97   : > { %1648 = vmatprep.subr.bf16.mxu1 %v2308_v58  ;;  %v614_v15 = vld [vmem:[%s2987_s26] sm:$0xff] }
  0x98   : > { %v3049_v16 = vcombine.high %v614_v15, %v614_v15  ;;  %v2342_v21 = vld [vmem:[%s2999_s5 + $0x184] ss:$16 sps:$4 sm:$0xff]   ;;  %v2346_v23 = vld [vmem:[%s2999_s5 + $0x180] ss:$16 sps:$4 sm:$0xff]   ;;  %v3076_v39 = vcombine.low %v614_v15, %v614_v15  ;;  %v2425_v15 = vld [vmem:[%s2999_s5 + $0x128] ss:$16 sps:$4 sm:$0xff]  }
  0x99   : > { %1608 = vmatpush1.bf16.msra.mxu0 %v2310_v59  ;;  %v2344_v22 = vld [vmem:[%s2999_s5 + $0x384] ss:$16 sps:$4 sm:$0xff]   ;;  %v2347_v24 = vld [vmem:[%s2999_s5 + $0x380] ss:$16 sps:$4 sm:$0xff]   ;;  %v2397_v59 = vld [vmem:[%s2999_s5 + $0x88] ss:$16 sps:$4 sm:$0xff]  }
  0x9a   : > { %1649 = vmatpush1.bf16.msra.mxu1 %v2311_v60  ;;  %1609 = vmatprep.subr.bf16.mxu0 %v2312_v61  ;;  %v2348_v25 = vld [vmem:[%s2999_s5 + $0x1a4] ss:$16 sps:$4 sm:$0xff]   ;;  %v2352_v27 = vld [vmem:[%s2999_s5 + $0x1a0] ss:$16 sps:$4 sm:$0xff]   ;;  %v2405_v61 = vld [vmem:[%s2999_s5 + $0xac] ss:$16 sps:$4 sm:$0xff]  }
  0x9b   : > { %1650 = vmatprep.subr.bf16.mxu1 %v2314_v62  ;;  %1627 = vmatprep.mubr.bf16.mxu0 %v3049_v16  ;;  %v2350_v26 = vld [vmem:[%s2999_s5 + $0x3a4] ss:$16 sps:$4 sm:$0xff]   ;;  %v2353_v28 = vld [vmem:[%s2999_s5 + $0x3a0] ss:$16 sps:$4 sm:$0xff]  }
  0x9c   : > { %v2354_v29 = vld [vmem:[%s2999_s5 + $0x1c4] ss:$16 sps:$4 sm:$0xff]   ;;  %v2358_v31 = vld [vmem:[%s2999_s5 + $0x1c0] ss:$16 sps:$4 sm:$0xff]  }
  0x9d   : > { %1610 = vmatpush1.bf16.msra.mxu0 %v2316_v63  ;;  %v2356_v30 = vld [vmem:[%s2999_s5 + $0x3c4] ss:$16 sps:$4 sm:$0xff]   ;;  %v2359_v32 = vld [vmem:[%s2999_s5 + $0x3c0] ss:$16 sps:$4 sm:$0xff]   ;;  %v2403_v63 = vld [vmem:[%s2999_s5 + $0xa8] ss:$16 sps:$4 sm:$0xff]  }
  0x9e   : > { %1651 = vmatpush1.bf16.msra.mxu1 %v2317_v0  ;;  %1611 = vmatprep.subr.bf16.mxu0 %v2318_v1  ;;  %v2360_v33 = vld [vmem:[%s2999_s5 + $0x1e4] ss:$16 sps:$4 sm:$0xff]   ;;  %v2364_v35 = vld [vmem:[%s2999_s5 + $0x1e0] ss:$16 sps:$4 sm:$0xff]   ;;  %v2411_v1 = vld [vmem:[%s2999_s5 + $0xcc] ss:$16 sps:$4 sm:$0xff]  }
  0x9f   : > { %1652 = vmatprep.subr.bf16.mxu1 %v2320_v2  ;;  %v2362_v34 = vld [vmem:[%s2999_s5 + $0x3e4] ss:$16 sps:$4 sm:$0xff]   ;;  %v2365_v36 = vld [vmem:[%s2999_s5 + $0x3e0] ss:$16 sps:$4 sm:$0xff]  }
  0xa0   : > { %v2372_v37 = vld [vmem:[%s2999_s5 + $0x404] ss:$16 sps:$4 sm:$0xff]   ;;  %v2370_v41 = vld [vmem:[%s2999_s5 + $0x400] ss:$16 sps:$4 sm:$0xff]  }
  0xa1   : > { %1612 = vmatpush1.bf16.msra.mxu0 %v2322_v3  ;;  %v2378_v43 = vld [vmem:[%s2999_s5 + $0x424] ss:$16 sps:$4 sm:$0xff]   ;;  %v2376_v45 = vld [vmem:[%s2999_s5 + $0x420] ss:$16 sps:$4 sm:$0xff]   ;;  %v2409_v3 = vld [vmem:[%s2999_s5 + $0xc8] ss:$16 sps:$4 sm:$0xff]  }
  0xa2   : > { %1653 = vmatpush1.bf16.msra.mxu1 %v2323_v4  ;;  %1613 = vmatprep.subr.bf16.mxu0 %v2324_v5  ;;  %v2384_v47 = vld [vmem:[%s2999_s5 + $0x444] ss:$16 sps:$4 sm:$0xff]   ;;  %v2382_v50 = vld [vmem:[%s2999_s5 + $0x440] ss:$16 sps:$4 sm:$0xff]   ;;  %v2417_v5 = vld [vmem:[%s2999_s5 + $0xec] ss:$16 sps:$4 sm:$0xff]  }
  0xa3   : > { %1654 = vmatprep.subr.bf16.mxu1 %v2326_v6  ;;  %v2390_v52 = vld [vmem:[%s2999_s5 + $0x464] ss:$16 sps:$4 sm:$0xff]   ;;  %v2388_v54 = vld [vmem:[%s2999_s5 + $0x460] ss:$16 sps:$4 sm:$0xff]  }
  0xa4   : > { %v2396_v56 = vld [vmem:[%s2999_s5 + $0x484] ss:$16 sps:$4 sm:$0xff]   ;;  %v2394_v58 = vld [vmem:[%s2999_s5 + $0x480] ss:$16 sps:$4 sm:$0xff]  }
  0xa5   : > { %1614 = vmatpush1.bf16.msra.mxu0 %v2328_v7  ;;  %v2402_v60 = vld [vmem:[%s2999_s5 + $0x4a4] ss:$16 sps:$4 sm:$0xff]   ;;  %v2400_v62 = vld [vmem:[%s2999_s5 + $0x4a0] ss:$16 sps:$4 sm:$0xff]   ;;  %v2415_v7 = vld [vmem:[%s2999_s5 + $0xe8] ss:$16 sps:$4 sm:$0xff]  }
  0xa6   : > { %1655 = vmatpush1.bf16.msra.mxu1 %v2329_v8  ;;  %1615 = vmatprep.subr.bf16.mxu0 %v2330_v9  ;;  %v2408_v0 = vld [vmem:[%s2999_s5 + $0x4c4] ss:$16 sps:$4 sm:$0xff]   ;;  %v2406_v2 = vld [vmem:[%s2999_s5 + $0x4c0] ss:$16 sps:$4 sm:$0xff]   ;;  %v2421_v8 = vld [vmem:[%s2999_s5 + $0x10c] ss:$16 sps:$4 sm:$0xff]  }
  0xa7   : > { %1656 = vmatprep.subr.bf16.mxu1 %v2332_v10  ;;  %v2414_v4 = vld [vmem:[%s2999_s5 + $0x4e4] ss:$16 sps:$4 sm:$0xff]   ;;  %v2412_v6 = vld [vmem:[%s2999_s5 + $0x4e0] ss:$16 sps:$4 sm:$0xff]   ;;  %v2424_v9 = vld [vmem:[%s2999_s5 + $0x20c] ss:$16 sps:$4 sm:$0xff]  }
  0xa8   : > { %v3117_v10 = vld [vmem:[%s2987_s26 + $0x10] ss:$0 sps:$4 sm:$0xff]  }
  0xa9   : > { %1616 = vmatpush1.bf16.msra.mxu0 %v2334_v11  ;;  %v2419_v11 = vld [vmem:[%s2999_s5 + $0x108] ss:$16 sps:$4 sm:$0xff]  }
  0xaa   : > { %1657 = vmatpush1.bf16.msra.mxu1 %v2335_v12  ;;  %1617 = vmatprep.subr.bf16.mxu0 %v2336_v13  ;;  %v2422_v12 = vld [vmem:[%s2999_s5 + $0x208] ss:$16 sps:$4 sm:$0xff]   ;;  %v2427_v13 = vld [vmem:[%s2999_s5 + $0x12c] ss:$16 sps:$4 sm:$0xff]  }
  0xab   : > { %1658 = vmatprep.subr.bf16.mxu1 %v2338_v14  ;;  %v2430_v14 = vld [vmem:[%s2999_s5 + $0x22c] ss:$16 sps:$4 sm:$0xff]  }
  0xad   : > { %1618 = vmatpush1.bf16.msra.mxu0 %v2340_v18  ;;  %v2436_v18 = vld [vmem:[%s2999_s5 + $0x24c] ss:$16 sps:$4 sm:$0xff]  }
  0xae   : > { %1659 = vmatpush1.bf16.msra.mxu1 %v2341_v19  ;;  %1619 = vmatprep.subr.bf16.mxu0 %v2342_v21  ;;  %v2431_v19 = vld [vmem:[%s2999_s5 + $0x148] ss:$16 sps:$4 sm:$0xff]  }
  0xaf   : > { %1660 = vmatprep.subr.bf16.mxu1 %v2344_v22  ;;  %v2434_v21 = vld [vmem:[%s2999_s5 + $0x248] ss:$16 sps:$4 sm:$0xff]   ;;  %v2439_v22 = vld [vmem:[%s2999_s5 + $0x16c] ss:$16 sps:$4 sm:$0xff]  }
  0xb1   : > { %1620 = vmatpush1.bf16.msra.mxu0 %v2346_v23  ;;  %v2442_v23 = vld [vmem:[%s2999_s5 + $0x26c] ss:$16 sps:$4 sm:$0xff]  }
  0xb2   : > { %1661 = vmatpush1.bf16.msra.mxu1 %v2347_v24  ;;  %1621 = vmatprep.subr.bf16.mxu0 %v2348_v25  ;;  %v2437_v24 = vld [vmem:[%s2999_s5 + $0x168] ss:$16 sps:$4 sm:$0xff]  }
  0xb3   : > { %1662 = vmatprep.subr.bf16.mxu1 %v2350_v26  ;;  %v2440_v25 = vld [vmem:[%s2999_s5 + $0x268] ss:$16 sps:$4 sm:$0xff]   ;;  %v2448_v26 = vld [vmem:[%s2999_s5 + $0x28c] ss:$16 sps:$4 sm:$0xff]  }
  0xb5   : > { %1622 = vmatpush1.bf16.msra.mxu0 %v2352_v27  ;;  %v2443_v27 = vld [vmem:[%s2999_s5 + $0x188] ss:$16 sps:$4 sm:$0xff]  }
  0xb6   : > { %1663 = vmatpush1.bf16.msra.mxu1 %v2353_v28  ;;  %1623 = vmatprep.subr.bf16.mxu0 %v2354_v29  ;;  %v2446_v28 = vld [vmem:[%s2999_s5 + $0x288] ss:$16 sps:$4 sm:$0xff]   ;;  %v2451_v29 = vld [vmem:[%s2999_s5 + $0x1ac] ss:$16 sps:$4 sm:$0xff]  }
  0xb7   : > { %1664 = vmatprep.subr.bf16.mxu1 %v2356_v30  ;;  %v2454_v30 = vld [vmem:[%s2999_s5 + $0x2ac] ss:$16 sps:$4 sm:$0xff]  }
  0xb9   : > { %1624 = vmatpush1.bf16.msra.mxu0 %v2358_v31  ;;  %v2449_v31 = vld [vmem:[%s2999_s5 + $0x1a8] ss:$16 sps:$4 sm:$0xff]  }
  0xba   : > { %1665 = vmatpush1.bf16.msra.mxu1 %v2359_v32  ;;  %1625 = vmatprep.subr.bf16.mxu0 %v2360_v33  ;;  %v2452_v32 = vld [vmem:[%s2999_s5 + $0x2a8] ss:$16 sps:$4 sm:$0xff]   ;;  %v2457_v33 = vld [vmem:[%s2999_s5 + $0x1cc] ss:$16 sps:$4 sm:$0xff]  }
  0xbb   : > { %1666 = vmatprep.subr.bf16.mxu1 %v2362_v34  ;;  %v2460_v34 = vld [vmem:[%s2999_s5 + $0x2cc] ss:$16 sps:$4 sm:$0xff]  }
  0xbd   : > { %1626 = vmatpush1.bf16.msra.mxu0 %v2364_v35  ;;  %v2455_v35 = vld [vmem:[%s2999_s5 + $0x1c8] ss:$16 sps:$4 sm:$0xff]  }
  0xbe   : > { %1667 = vmatpush1.bf16.msra.mxu1 %v2365_v36  ;;  %1677 = vmatprep.subr.bf16.mxu0 %v2372_v37  ;;  %v2458_v36 = vld [vmem:[%s2999_s5 + $0x2c8] ss:$16 sps:$4 sm:$0xff]   ;;  %v2463_v37 = vld [vmem:[%s2999_s5 + $0x1ec] ss:$16 sps:$4 sm:$0xff]  }
  0xbf   : > { %1718 = vmatprep.subr.bf16.mxu1 %v2375_v38  ;;  %v2466_v38 = vld [vmem:[%s2999_s5 + $0x2ec] ss:$16 sps:$4 sm:$0xff]  }
  0xc0   : > { %1628 = vmatmul.mubr.bf16.vlgmr.msra.gmra.mrb[0].mxu0 %v3076_v39 }
  0xc1   : > { %1669 = vmatmul.mubr.bf16.vlgmr.msra.gmra.mrb[0].mxu1 %v3078_v40  ;;  %1678 = vmatpush1.bf16.msra.mxu0 %v2370_v41  ;;  %v2461_v41 = vld [vmem:[%s2999_s5 + $0x1e8] ss:$16 sps:$4 sm:$0xff]  }
  0xc2   : > { %1719 = vmatpush1.bf16.msra.mxu1 %v2373_v42  ;;  %1679 = vmatprep.subr.bf16.mxu0 %v2378_v43  ;;  %v2464_v42 = vld [vmem:[%s2999_s5 + $0x2e8] ss:$16 sps:$4 sm:$0xff]   ;;  %v2469_v43 = vld [vmem:[%s2999_s5 + $0x30c] ss:$16 sps:$4 sm:$0xff]  }
  0xc3   : > { %1720 = vmatprep.subr.bf16.mxu1 %v2381_v44  ;;  %1709 = vmatprep.mubr.bf16.mxu0 %v2572_v49  ;;  %v2472_v44 = vld [vmem:[%s2999_s5 + $0x40c] ss:$16 sps:$4 sm:$0xff]  }
  0xc4   : > { %1750 = vmatprep.mubr.bf16.mxu1 %v3049_v16  ;;  %v2428_v16 = vld [vmem:[%s2999_s5 + $0x228] ss:$16 sps:$4 sm:$0xff]  }
  0xc5   : > { %1680 = vmatpush1.bf16.msra.mxu0 %v2376_v45  ;;  %v2467_v45 = vld [vmem:[%s2999_s5 + $0x308] ss:$16 sps:$4 sm:$0xff]  }
  0xc6   : > { %1721 = vmatpush1.bf16.msra.mxu1 %v2379_v46  ;;  %1681 = vmatprep.subr.bf16.mxu0 %v2384_v47  ;;  %v2470_v46 = vld [vmem:[%s2999_s5 + $0x408] ss:$16 sps:$4 sm:$0xff]   ;;  %v2475_v47 = vld [vmem:[%s2999_s5 + $0x32c] ss:$16 sps:$4 sm:$0xff]  }
  0xc7   : > { %1722 = vmatprep.subr.bf16.mxu1 %v2387_v48  ;;  %v2478_v48 = vld [vmem:[%s2999_s5 + $0x42c] ss:$16 sps:$4 sm:$0xff]  }
  0xc9   : > { %1682 = vmatpush1.bf16.msra.mxu0 %v2382_v50  ;;  %v2473_v50 = vld [vmem:[%s2999_s5 + $0x328] ss:$16 sps:$4 sm:$0xff]  }
  0xca   : > { %1723 = vmatpush1.bf16.msra.mxu1 %v2385_v51  ;;  %1683 = vmatprep.subr.bf16.mxu0 %v2390_v52  ;;  %v2476_v51 = vld [vmem:[%s2999_s5 + $0x428] ss:$16 sps:$4 sm:$0xff]   ;;  %v2481_v52 = vld [vmem:[%s2999_s5 + $0x34c] ss:$16 sps:$4 sm:$0xff]  }
  0xcb   : > { %1724 = vmatprep.subr.bf16.mxu1 %v2393_v53  ;;  %v2484_v53 = vld [vmem:[%s2999_s5 + $0x44c] ss:$16 sps:$4 sm:$0xff]  }
  0xcd   : > { %1684 = vmatpush1.bf16.msra.mxu0 %v2388_v54  ;;  %v2479_v54 = vld [vmem:[%s2999_s5 + $0x348] ss:$16 sps:$4 sm:$0xff]  }
  0xce   : > { %1725 = vmatpush1.bf16.msra.mxu1 %v2391_v55  ;;  %1685 = vmatprep.subr.bf16.mxu0 %v2396_v56  ;;  %v2487_v55 = vld [vmem:[%s2999_s5 + $0x36c] ss:$16 sps:$4 sm:$0xff]  }
  0xcf   : > { %1726 = vmatprep.subr.bf16.mxu1 %v2399_v57  ;;  %v2490_v56 = vld [vmem:[%s2999_s5 + $0x46c] ss:$16 sps:$4 sm:$0xff]   ;;  %v2485_v57 = vld [vmem:[%s2999_s5 + $0x368] ss:$16 sps:$4 sm:$0xff]  }
  0xd1   : > { %1686 = vmatpush1.bf16.msra.mxu0 %v2394_v58  ;;  %v2488_v58 = vld [vmem:[%s2999_s5 + $0x468] ss:$16 sps:$4 sm:$0xff]  }
  0xd2   : > { %1727 = vmatpush1.bf16.msra.mxu1 %v2397_v59  ;;  %1687 = vmatprep.subr.bf16.mxu0 %v2402_v60  ;;  %v2496_v59 = vld [vmem:[%s2999_s5 + $0x48c] ss:$16 sps:$4 sm:$0xff]   ;;  %v2491_v60 = vld [vmem:[%s2999_s5 + $0x388] ss:$16 sps:$4 sm:$0xff]  }
  0xd3   : > { %1728 = vmatprep.subr.bf16.mxu1 %v2405_v61  ;;  %v2494_v61 = vld [vmem:[%s2999_s5 + $0x488] ss:$16 sps:$4 sm:$0xff]  }
  0xd5   : > { %1688 = vmatpush1.bf16.msra.mxu0 %v2400_v62  ;;  %v2499_v62 = vld [vmem:[%s2999_s5 + $0x3ac] ss:$16 sps:$4 sm:$0xff]  }
  0xd6   : > { %1729 = vmatpush1.bf16.msra.mxu1 %v2403_v63  ;;  %1689 = vmatprep.subr.bf16.mxu0 %v2408_v0  ;;  %v2502_v63 = vld [vmem:[%s2999_s5 + $0x4ac] ss:$16 sps:$4 sm:$0xff]   ;;  %v2497_v0 = vld [vmem:[%s2999_s5 + $0x3a8] ss:$16 sps:$4 sm:$0xff]  }
  0xd7   : > { %1730 = vmatprep.subr.bf16.mxu1 %v2411_v1  ;;  %v2500_v1 = vld [vmem:[%s2999_s5 + $0x4a8] ss:$16 sps:$4 sm:$0xff]  }
  0xd9   : > { %1690 = vmatpush1.bf16.msra.mxu0 %v2406_v2  ;;  %v2505_v2 = vld [vmem:[%s2999_s5 + $0x3cc] ss:$16 sps:$4 sm:$0xff]  }
  0xda   : > { %1731 = vmatpush1.bf16.msra.mxu1 %v2409_v3  ;;  %1691 = vmatprep.subr.bf16.mxu0 %v2414_v4  ;;  %v2508_v3 = vld [vmem:[%s2999_s5 + $0x4cc] ss:$16 sps:$4 sm:$0xff]   ;;  %v2503_v4 = vld [vmem:[%s2999_s5 + $0x3c8] ss:$16 sps:$4 sm:$0xff]  }
  0xdb   : > { %1732 = vmatprep.subr.bf16.mxu1 %v2417_v5  ;;  %v2506_v5 = vld [vmem:[%s2999_s5 + $0x4c8] ss:$16 sps:$4 sm:$0xff]  }
  0xdd   : > { %1692 = vmatpush1.bf16.msra.mxu0 %v2412_v6  ;;  %v2511_v6 = vld [vmem:[%s2999_s5 + $0x3ec] ss:$16 sps:$4 sm:$0xff]  }
  0xde   : > { %1733 = vmatpush1.bf16.msra.mxu1 %v2415_v7  ;;  %1759 = vmatprep.subr.bf16.mxu0 %v2424_v9  ;;  %v2514_v7 = vld [vmem:[%s2999_s5 + $0x4ec] ss:$16 sps:$4 sm:$0xff]   ;;  %v2512_v9 = vld [vmem:[%s2999_s5 + $0x4e8] ss:$16 sps:$4 sm:$0xff]  }
  0xdf   : > { %1734 = vmatprep.subr.bf16.mxu1 %v2421_v8  ;;  %v2509_v8 = vld [vmem:[%s2999_s5 + $0x3e8] ss:$16 sps:$4 sm:$0xff]  }
  0xe0   : > { %1710 = vmatmul.mubr.bf16.vlgmr.msra.gmra.mrb[4].mxu0 %v3117_v10 }
  0xe1   : > { %1760 = vmatpush1.bf16.msra.mxu0 %v2422_v12  ;;  %1791 = vmatprep.mubr.bf16.mxu0 %v3054_v20  ;;  %v2445_v20 = vld [vmem:[%s2999_s5 + $0x18c] ss:$16 sps:$4 sm:$0xff]  }
  0xe2   : > { %1735 = vmatpush1.bf16.msra.mxu1 %v2419_v11  ;;  %1761 = vmatprep.subr.bf16.mxu0 %v2430_v14 }
  0xe3   : > { %1736 = vmatprep.subr.bf16.mxu1 %v2427_v13 }
  0xe5   : > { %1762 = vmatpush1.bf16.msra.mxu0 %v2428_v16 }
  0xe6   : > { %1737 = vmatpush1.bf16.msra.mxu1 %v2425_v15  ;;  %1763 = vmatprep.subr.bf16.mxu0 %v2436_v18 }
  0xe7   : > { %1738 = vmatprep.subr.bf16.mxu1 %v2433_v17 }
  0xe9   : > { %1764 = vmatpush1.bf16.msra.mxu0 %v2434_v21 }
  0xea   : > { %1739 = vmatpush1.bf16.msra.mxu1 %v2431_v19  ;;  %1765 = vmatprep.subr.bf16.mxu0 %v2442_v23 }
  0xeb   : > { %1740 = vmatprep.subr.bf16.mxu1 %v2439_v22  ;;  %v610_v22 = vld [vmem:[#allocation2] sm:$0xff] }
  0xed   : > { %1766 = vmatpush1.bf16.msra.mxu0 %v2440_v25  ;;  %v611_v25 = vld [vmem:[#allocation2 + $0x8] sm:$0xff] }
  0xee   : > { %1741 = vmatpush1.bf16.msra.mxu1 %v2437_v24  ;;  %1767 = vmatprep.subr.bf16.mxu0 %v2448_v26 }
  0xef   : > { %1742 = vmatprep.subr.bf16.mxu1 %v2445_v20 }
  0xf1   : > { %1768 = vmatpush1.bf16.msra.mxu0 %v2446_v28 }
  0xf2   : > { %1743 = vmatpush1.bf16.msra.mxu1 %v2443_v27  ;;  %1769 = vmatprep.subr.bf16.mxu0 %v2454_v30 }
  0xf3   : > { %1744 = vmatprep.subr.bf16.mxu1 %v2451_v29 }
  0xf5   : > { %1770 = vmatpush1.bf16.msra.mxu0 %v2452_v32 }
  0xf6   : > { %1745 = vmatpush1.bf16.msra.mxu1 %v2449_v31  ;;  %1771 = vmatprep.subr.bf16.mxu0 %v2460_v34 }
  0xf7   : > { %1746 = vmatprep.subr.bf16.mxu1 %v2457_v33 }
  0xf9   : > { %1772 = vmatpush1.bf16.msra.mxu0 %v2458_v36 }
  0xfa   : > { %1747 = vmatpush1.bf16.msra.mxu1 %v2455_v35  ;;  %1773 = vmatprep.subr.bf16.mxu0 %v2466_v38  ;;  %v612_v38 = vld [vmem:[#allocation2 + $0x10] sm:$0xff] }
  0xfb   : > { %1748 = vmatprep.subr.bf16.mxu1 %v2463_v37 }
  0xfd   : > { %1774 = vmatpush1.bf16.msra.mxu0 %v2464_v42 }
  0xfe   : > { %1749 = vmatpush1.bf16.msra.mxu1 %v2461_v41  ;;  %1775 = vmatprep.subr.bf16.mxu0 %v2469_v43 }
  0xff   : > { %1800 = vmatprep.subr.bf16.mxu1 %v2472_v44 }
 0x101   : > { %1751 = vmatmul.mubr.bf16.vlgmr.msra.gmra.mrb[4].mxu1 %v3076_v39  ;;  %1776 = vmatpush1.bf16.msra.mxu0 %v2467_v45  ;;  %v2482_v39 = vld [vmem:[%s2999_s5 + $0x448] ss:$16 sps:$4 sm:$0xff]  }
 0x102   : > { %1801 = vmatpush1.bf16.msra.mxu1 %v2470_v46  ;;  %1777 = vmatprep.subr.bf16.mxu0 %v2475_v47  ;;  %v613_v45 = vld [vmem:[#allocation2 + $0x18] sm:$0xff] }
 0x103   : > { %1802 = vmatprep.subr.bf16.mxu1 %v2478_v48  ;;  %1832 = vmatprep.mubr.bf16.mxu1 %v2572_v49  ;;  %v2493_v49 = vld [vmem:[%s2999_s5 + $0x38c] ss:$16 sps:$4 sm:$0xff]  }
 0x105   : > { %1778 = vmatpush1.bf16.msra.mxu0 %v2473_v50 }
 0x106   : > { %1803 = vmatpush1.bf16.msra.mxu1 %v2476_v51  ;;  %1779 = vmatprep.subr.bf16.mxu0 %v2481_v52  ;;  %v1859_v52 = vlaneseq (!%p2202_p13) }
 0x107   : > { %1804 = vmatprep.subr.bf16.mxu1 %v2484_v53 }
 0x108   : > { %v1860_v53 = vshrl.u32 (!%p2202_p13), %v1859_v52, 7 }
 0x109   : > { %1780 = vmatpush1.bf16.msra.mxu0 %v2479_v54  ;;  %v1857_v54 = vld [vmem:[%s589_s12] sm:$0xf] (!%p2202_p13) }
 0x10a   : > { %1805 = vmatpush1.bf16.msra.mxu1 %v2482_v39  ;;  %1781 = vmatprep.subr.bf16.mxu0 %v2487_v55  ;;  %v1861_v55 = vsub.s32 (!%p2202_p13), 0, %v1860_v53 }
 0x10b   : > { %1806 = vmatprep.subr.bf16.mxu1 %v2490_v56  ;;  %v1865_v56 = vsub.s32 (!%p2202_p13), 1, %v1860_v53 }
 0x10d   : > { %1782 = vmatpush1.bf16.msra.mxu0 %v2485_v57  ;;  %v1869_v57 = vsub.s32 (!%p2202_p13), 2, %v1860_v53 }
 0x10e   : > { %1807 = vmatpush1.bf16.msra.mxu1 %v2488_v58  ;;  %1783 = vmatprep.subr.bf16.mxu0 %v2493_v49  ;;  %v1873_v58 = vsub.s32 (!%p2202_p13), 3, %v1860_v53 }
 0x10f   : > { %1808 = vmatprep.subr.bf16.mxu1 %v2496_v59 }
 0x111   : > { %1784 = vmatpush1.bf16.msra.mxu0 %v2491_v60 }
 0x112   : > { %1809 = vmatpush1.bf16.msra.mxu1 %v2494_v61  ;;  %1785 = vmatprep.subr.bf16.mxu0 %v2499_v62  ;;  %v1862_v61 = vrot.slane (!%p2202_p13), %v1857_v54, %v1861_v55  ;;  %v1866_v62 = vrot.slane (!%p2202_p13), %v1857_v54, %v1865_v56 }
 0x113   : > { %1810 = vmatprep.subr.bf16.mxu1 %v2502_v63  ;;  %v1870_v63 = vrot.slane (!%p2202_p13), %v1857_v54, %v1869_v57 }
 0x115   : > { %1786 = vmatpush1.bf16.msra.mxu0 %v2497_v0  ;;  %v1874_v0 = vrot.slane (!%p2202_p13), %v1857_v54, %v1873_v58 }
 0x116   : > { %1811 = vmatpush1.bf16.msra.mxu1 %v2500_v1  ;;  %1787 = vmatprep.subr.bf16.mxu0 %v2505_v2 }
 0x117   : > { %1812 = vmatprep.subr.bf16.mxu1 %v2508_v3 }
 0x119   : > { %1788 = vmatpush1.bf16.msra.mxu0 %v2503_v4 }
 0x11a   : > { %1813 = vmatpush1.bf16.msra.mxu1 %v2506_v5  ;;  %1789 = vmatprep.subr.bf16.mxu0 %v2511_v6 }
 0x11b   : > { %1814 = vmatprep.subr.bf16.mxu1 %v2514_v7 }
 0x11d   : > { %1790 = vmatpush1.bf16.msra.mxu0 %v2509_v8 }
 0x11e   : > { %1815 = vmatpush1.bf16.msra.mxu1 %v2512_v9 }
 0x120   : > { %1792 = vmatmul.mubr.bf16.vlgmr.msra.gmra.mrb[8].mxu0 %v3078_v40 }
 0x121   : > { %1833 = vmatmul.mubr.bf16.vlgmr.msra.gmra.mrb[8].mxu1 %v3117_v10 }
 0x193   : > { %v1629_v11 = vpop.f32.mrb[0].mxu0 }
 0x194   : > { %v1670_v12 = vpop.f32.mrb[0].mxu1  ;;  %v1631_v14 = vpop.f32.mrb[1].mxu0 }
 0x195   : > { %v1671_v13 = vadd.f32 %v1670_v12, %v1629_v11  ;;  %v1672_v15 = vpop.f32.mrb[1].mxu1  ;;  %v1633_v17 = vpop.f32.mrb[2].mxu0 }
 0x196   : > { %v1673_v16 = vadd.f32 %v1672_v15, %v1631_v14  ;;  %v1674_v18 = vpop.f32.mrb[2].mxu1  ;;  %v1634_v19 = vpop.f32.mrb[3].mxu0 }
 0x197   : > { %v1675_v21 = vpop.f32.mrb[3].mxu1 }
 0x1b3   : > { %v1711_v23 = vpop.f32.mrb[4].mxu0 }
 0x1b4   : > { %v1712_v24 = vadd.f32 %v1711_v23, %v1671_v13  ;;  %v1713_v20 = vpop.f32.mrb[5].mxu0 }
 0x1b5   : > { %v1714_v26 = vadd.f32 %v1713_v20, %v1673_v16  ;;  %v1715_v27 = vpop.f32.mrb[6].mxu0 }
 0x1b6   : > { %v1841_v40 = vadd.f32 %v1712_v24, %v610_v22  ;;  %v1716_v28 = vpop.f32.mrb[7].mxu0 }
 0x1b7   : > { %v1842_v10 = vadd.f32 %v1714_v26, %v611_v25 }
 0x1b8   : > { %1845 = vst [vmem:[#allocation2] sm:$0xff] %v1841_v40 }
 0x1b9   : > { %1846 = vst [vmem:[#allocation2 + $0x8] sm:$0xff] %v1842_v10 }
 0x1bf   : > { %v1853_v39 = vld [vmem:[#allocation2] sm:$0xff] (!%p2202_p13) }
 0x1c0   : > { %v1854_v49 = vld [vmem:[#allocation2 + $0x8] sm:$0xff] (!%p2202_p13)  ;;  %v1879_v1 = vadd.f32 (!%p2202_p13), %v1862_v61, %v1853_v39 }
 0x1c1   : > { %v1880_v2 = vadd.f32 (!%p2202_p13), %v1866_v62, %v1854_v49 }
 0x1c3   : > { %v2208_v5 = vpack.c.bf16 (!%p2202_p13), %v1880_v2, %v1879_v1 }
 0x1c5   : > { %1899 = vst [vmem:[%s2997_s4] sm:$0xff] (!%p2202_p13), %v2208_v5 }
 0x1d4   : > { %v1752_v29 = vpop.f32.mrb[4].mxu1 }
 0x1d5   : > { %v1754_v30 = vpop.f32.mrb[5].mxu1 }
 0x1d6   : > { %v1756_v31 = vpop.f32.mrb[6].mxu1 }
 0x1d7   : > { %v1757_v32 = vpop.f32.mrb[7].mxu1 }
 0x1f3   : > { %v1793_v33 = vpop.f32.mrb[8].mxu0 }
 0x1f4   : > { %v1834_v34 = vpop.f32.mrb[8].mxu1  ;;  %v1794_v35 = vadd.f32 %v1793_v33, %v1752_v29  ;;  %v1795_v36 = vpop.f32.mrb[9].mxu0 }
 0x1f5   : > { %v1836_v37 = vpop.f32.mrb[9].mxu1  ;;  %v1796_v41 = vadd.f32 %v1795_v36, %v1754_v30  ;;  %v1797_v42 = vpop.f32.mrb[10].mxu0  ;;  %1852 = sbr.rel (%p2202_p13) target bundleno = 520 (0x208), region = 63 }
 0x1f6   : > { %v1838_v43 = vpop.f32.mrb[10].mxu1  ;;  %v1835_v44 = vadd.f32 %v1834_v34, %v1794_v35  ;;  %v1798_v46 = vpop.f32.mrb[11].mxu0 }
 0x1f7   : > { %v1839_v47 = vpop.f32.mrb[11].mxu1  ;;  %v1837_v48 = vadd.f32 %v1836_v37, %v1796_v41 }
 0x1f8   : > { %v1843_v50 = vadd.f32 %v1835_v44, %v612_v38 }
 0x1f9   : > { %v1844_v51 = vadd.f32 %v1837_v48, %v613_v45 }
 0x1fa   : > { %1847 = vst [vmem:[#allocation2 + $0x10] sm:$0xff] %v1843_v50 }
 0x1fb   : > { %1848 = vst [vmem:[#allocation2 + $0x18] sm:$0xff] %v1844_v51 }
 0x201   : > { %v1855_v59 = vld [vmem:[#allocation2 + $0x10] sm:$0xff] }
 0x202   : > { %v1856_v60 = vld [vmem:[#allocation2 + $0x18] sm:$0xff]  ;;  %v1881_v3 = vadd.f32 %v1870_v63, %v1855_v59 }
 0x203   : > { %v1882_v4 = vadd.f32 %v1874_v0, %v1856_v60 }
 0x205   : > { %v2209_v6 = vpack.c.bf16 %v1882_v4, %v1881_v3 }
 0x207   : > { %1900 = vst [vmem:[%s2997_s4 + $0x8] sm:$0xff] %v2209_v6 }
 0x208 PF: > { %s13_s18 = sadd.s32 1, %s2569_s18   ;;  %s3220_s12 = smov %s2549_s13 }
 0x209   : > { %p10_p0 = scmp.ge.s32.totalorder %s13_s18, 12   ;;  %s3221_s13 = smov %s2644_s25 }
 0x20a   : > { %s3222_s14 = smov %s2561_s16  ;;  %s3223_s15 = smov %s2565_s17 }
 0x20b   : > { %s3224_s16 = smov %s3227_s19  ;;  %s3225_s17 = smov %s3231_s20 }
 0x20c   :  { %12 = sbr.rel (!%p10_p0) target bundleno = 4 (0x4), region = 104 }

// kernel: convnet_forward.4
= control target key start
LH: loop header
LB: loop body
LE: loop exit
PB: predicated region body
PF: predicated region fallthrough
CT: control target
= control target key end

     0   :  { %8 = vsyncpa [#allocation4], 0  ;;  %s6450_s0 = inlined_call_operand.vmem [shape: f32[2,456,128], index: 0, kind: input, shape index: {}]   ;;  %s6451_s1 = inlined_call_operand.hbm [shape: bf16[25,128,128], index: 1, kind: input, shape index: {}]   ;;  %s6452_s2 = inlined_call_operand.hbm [shape: f32[1,128], index: 2, kind: input, shape index: {}]   ;;  %s6453_s3 = inlined_call_operand.vmem [shape: bf16[2,7,7,128], index: 3, kind: output, shape index: {}]  }
   0x1   :  { %9 = vsyncpa [#allocation6], 0  ;;  %s5563_s12 = smov 0  }
   0x2 LB: > { %s5569_s13 = sadd.s32 4294967295, %s5531_s12   ;;  %p3866_p0 = scmp.ge.s32.totalorder %s5531_s12, 1  ;;  %s5531_s12 = sphi %s5563_s12, %s15_s12  }
   0x3   : > { %p114_p1 = scmp.lt.s32.totalorder %s5531_s12, 3  ;;  %s5537_s14 = smov [#allocation3]  }
   0x4   : > { %s126_s15 = sshll.u32 %s5537_s14, 4  ;;  %p6454_p3 = scmp.eq.s32.totalorder %s5569_s13, 0  ;;  %s127_s15 = int_to_ptr.vmem [resolvable:$true] %s126_s15 }
   0x5   : > { %p5573_p2 = pnand %p3866_p0, %p114_p1  ;;  %s5538_s17 = smov [#allocation5]  }
   0x6   : > { %s140_s18 = sshll.u32 %s5538_s17, 4  ;;  %s5457_s22 = scalar_lea.hbm %s6451_s1, 25600  ;;  %s5586_s18 = int_to_ptr.vmem [resolvable:$true] %s140_s18 }
   0x7   : > { %s6456_s16 = scalar_select %p5573_p2, 1, 0 }
   0x8   : > { %p5224_p4 = pneg %p5573_p2  ;;  %p5458_p6 = scmp.ne.s32.totalorder %s6451_s1, %s5457_s22 }
   0x9   : > { %p5464_p10 = scmp.lt.u32.totalorder %s5457_s22, %s6451_s1 }
   0xa   : > { %p5582_p5 = pnand %p6454_p3, %p5224_p4 }
   0xc   : > { %p5459_p7 = pneg %p5582_p5 }
   0xe   : > { %p5460_p8 = pnand %p5459_p7, %p5458_p6 }
  0x10   : > { %p5461_p9 = pneg %p5460_p8 }
  0x12   : > { %p5466_p11 = pnand %p5464_p10, %p5461_p9 }
  0x14   : > { %5469 = shalt.err (!%p5466_p11)
}
  0x15   : > { %s5470_s27 = scalar_lea.vmem %s127_s15, 25600  ;;  %p5478_p1 = scmp.lt.s32.totalorder %s127_s15, %s127_s15 }
  0x16   : > { %p5471_p12 = scmp.ne.s32.totalorder %s127_s15, %s5470_s27  ;;  %p5479_p4 = scmp.lt.s32.totalorder %s5470_s27, %s5470_s27 }
  0x18   : > { %p5473_p13 = pnand %p5471_p12, %p5459_p7  ;;  %p5480_p3 = por %p5479_p4, %p5478_p1 }
  0x1a   : > { %p5474_p0 = pneg %p5473_p13 }
  0x1c   : > { %p5481_p2 = pnand %p5480_p3, %p5474_p0 }
  0x1e   : > { %5484 = shalt.err (!%p5481_p2)
}
  0x1f   : > { %s5539_s28 = smov 64   ;;  %s5540_s29 = smov 4  }
  0x20   : > { %5227 = dma.hbm_to_vmem [thread:$0]  (!%p5582_p5), %s6451_s1, 25600, %s127_s15, [#allocation4], %s5539_s28, %s5539_s28, %s5540_s29  }
  0x21   : > { %s5485_s7 = scalar_lea.hbm %s6452_s2, 16 }
  0x22   : > { %p5486_p6 = scmp.ne.s32.totalorder %s6452_s2, %s5485_s7  ;;  %p5492_p8 = scmp.lt.u32.totalorder %s5485_s7, %s6452_s2 }
  0x24   : > { %p5488_p2 = pnand %p5486_p6, %p5459_p7 }
  0x26   : > { %p5489_p3 = pneg %p5488_p2 }
  0x28   : > { %p5494_p9 = pnand %p5492_p8, %p5489_p3 }
  0x2a   : > { %5497 = shalt.err (!%p5494_p9)
}
  0x2b   : > { %s5498_s14 = scalar_lea.vmem %s5586_s18, 16  ;;  %s5505_s15 = scalar_lea.vmem %s5586_s18, 32 }
  0x2c   : > { %p5499_p10 = scmp.ne.s32.totalorder %s5586_s18, %s5498_s14  ;;  %p5506_p13 = scmp.lt.s32.totalorder %s5586_s18, %s5586_s18 }
  0x2d   : > { %p5507_p0 = scmp.lt.s32.totalorder %s5505_s15, %s5498_s14 }
  0x2e   : > { %p5501_p11 = pnand %p5499_p10, %p5459_p7 }
  0x2f   : > { %p5508_p1 = por %p5507_p0, %p5506_p13 }
  0x30   : > { %p5502_p12 = pneg %p5501_p11 }
  0x32   : > { %p5509_p4 = pnand %p5508_p1, %p5502_p12 }
  0x34   : > { %5512 = shalt.err (!%p5509_p4)
}
  0x35   : > { %5230 = dma.hbm_to_vmem [thread:$0]  (!%p5582_p5), %s6452_s2, 16, %s5586_s18, [#allocation6]  }
  0x36   : > { %p6458_p6 = scmp.ne.s32.totalorder %s6456_s16, 0 }
  0x37   : > { %p6459_p7 = scmp.eq.s32.totalorder (!%p6458_p6), %s5569_s13, 0 }
  0x38   : > { %161 = sbr.rel (%p6458_p6) target bundleno = 735 (0x2df), region = 32 }
  0x3f   : > { %5522 = dma.done.wait (%p6459_p7), [#allocation4], 25600   ;;  %p6460_p2 = pmov %p6459_p7 }
  0x41   : > { %5524 = vsyncadd (%p6460_p2), [#allocation4], 4294941696  ;;  %p6461_p3 = pmov %p6460_p2 }
  0x42   : > { %p6462_p8 = pmov %p6460_p2 }
  0x43   : > { %5526 = dma.done.wait (%p6461_p3), [#allocation6], 16  }
  0x44   : > { %5528 = vsyncadd (%p6462_p8), [#allocation6], 4294967280  ;;  %p189_p9 = scmp.lt.s32.totalorder %s5569_s13, 1  ;;  %v5653_v0 = vld [vmem:[#allocation5] ss:$0 sm:$0xff]  ;;  %s5660_s26 = smov 0  }
  0x46   : > { %s6464_s13 = smov (!%p189_p9, %s5569_s13), 1 }
  0x47   : > { %s5214_s18 = smul.u32 456, %s6464_s13 }
  0x48   : > { %s5215_s19 = smul.u32 28, %s6464_s13 }
  0x49   : > { %s5651_s22 = scalar_lea.vmem %s6450_s0, %s5214_s18 }
  0x4a   : > { %s5658_s25 = scalar_lea.vmem %s6453_s3, %s5215_s19 }
  0x4b LB: >> { %v5257_v1 = vld [vmem:[#allocation3 + $0x40] sm:$0xff]   ;;  %v5541_v2 = vmov 0.0   ;;  %v5259_v4 = vld [vmem:[#allocation3 + $0x48] sm:$0xff]   ;;  %vm5542_vm0 = vmmov 0   ;;  %v5261_v6 = vld [vmem:[#allocation3 + $0x50] sm:$0xff]   ;;  %s207_s13 = smul.u32 48, %s5535_s26  ;;  %s5535_s26 = sphi %s5660_s26, %s206_s26  }
  0x4c   : >> { %4498 = vmatprep.subr.bf16.mxu0 %v5541_v2  ;;  %4526 = vmatprep.subr.bf16.mxu1 %v5541_v2  ;;  %v5258_v3 = vld [vmem:[#allocation3] sm:$0xff]   ;;  %v5260_v5 = vld [vmem:[#allocation3 + $0x8] sm:$0xff]   ;;  %v5262_v7 = vld [vmem:[#allocation3 + $0x10] sm:$0xff]   ;;  %s4220_s28 = sshll.u32 %s5535_s26, 2  ;;  %vm3700_vm1 = vcmask 1043456   ;;  %s206_s26 = sadd.s32 1, %s5535_s26  }
  0x4d   : >> { %4499 = vmatpush3.bf16.msra.mxu0 %v5257_v1  ;;  %4514 = vmatprep.mubr.msk.bf16.mxu0 %vm5542_vm0, %v5541_v2  ;;  %v5263_v8 = vld [vmem:[#allocation3 + $0x58] sm:$0xff]   ;;  %v5265_v10 = vld [vmem:[#allocation3 + $0x60] sm:$0xff]   ;;  %v5267_v12 = vld [vmem:[#allocation3 + $0x68] sm:$0xff]   ;;  %s5683_s27 = scalar_lea.vmem %s5651_s22, %s207_s13  ;;  %s3699_s29 = scalar_lea.vmem %s5658_s25, %s4220_s28  ;;  %vm3701_vm2 = vsmask.f32 3328 }
  0x4e   : >> { %4527 = vmatpush3.bf16.msra.mxu1 %v5258_v3  ;;  %4500 = vmatprep.subr.bf16.mxu0 %v5541_v2  ;;  %v5264_v9 = vld [vmem:[#allocation3 + $0x18] sm:$0xff]   ;;  %v5266_v11 = vld [vmem:[#allocation3 + $0x20] sm:$0xff]   ;;  %v5268_v13 = vld [vmem:[#allocation3 + $0x28] sm:$0xff]   ;;  %p203_p5 = scmp.ge.s32.totalorder %s206_s26, 7  }
  0x4f   : >> { %4528 = vmatprep.subr.bf16.mxu1 %v5541_v2  ;;  %4542 = vmatprep.mubr.msk.bf16.mxu1 %vm5542_vm0, %v5541_v2  ;;  %v5269_v14 = vld [vmem:[#allocation3 + $0x70] sm:$0xff]   ;;  %v5271_v16 = vld [vmem:[#allocation3 + $0x78] sm:$0xff]   ;;  %v209_v20 = vld [vmem:[%s5683_s27] sm:$0xff] }
  0x50   : >> { %v5270_v15 = vld [vmem:[#allocation3 + $0x30] sm:$0xff]   ;;  %v5272_v17 = vld [vmem:[#allocation3 + $0x38] sm:$0xff]   ;;  %v5273_v24 = vld [vmem:[#allocation3 + $0x80] sm:$0xff]  }
  0x51   : >> { %4501 = vmatpush3.bf16.msra.mxu0 %v5259_v4  ;;  %v3875_v18 = vld [vmem:[%s5683_s27 + $0x1] sm:$0xff]  ;;  %v3876_v19 = vld [vmem:[%s5683_s27 + $0x9] sm:$0xff]  ;;  %v5274_v25 = vld [vmem:[#allocation3 + $0xc0] sm:$0xff]  }
  0x52   : >> { %4529 = vmatpush3.bf16.msra.mxu1 %v5260_v5  ;;  %4502 = vmatprep.subr.bf16.mxu0 %v5541_v2  ;;  %v210_v21 = vld [vmem:[%s5683_s27 + $0x8] sm:$0xff]  ;;  %v242_v22 = vpack.c.bf16 %v3876_v19, %v3875_v18  ;;  %v5695_v26 = vld [vmem:[%s5683_s27 + $0x19] sm:$0xff]  ;;  %v211_v31 = vld [vmem:[%s5683_s27 + $0x10] sm:$0xff] }
  0x53   : >> { %4530 = vmatprep.subr.bf16.mxu1 %v5541_v2  ;;  %v215_v23 = vpack.c.bf16 %v210_v21, %v209_v20  ;;  %v5698_v27 = vld [vmem:[%s5683_s27 + $0x21] sm:$0xff]  ;;  %v3877_v32 = vld [vmem:[%s5683_s27 + $0x11] sm:$0xff]  ;;  %v5722_v41 = vld [vmem:[%s5683_s27 + $0x29] sm:$0xff] }
  0x54   : >> { %v5275_v28 = vld [vmem:[#allocation3 + $0x88] sm:$0xff]   ;;  %v1036_v29 = vpack.c.bf16 %v5698_v27, %v5695_v26  ;;  %v5707_v33 = vld [vmem:[%s5683_s27 + $0x18] sm:$0xff]  ;;  %v243_v34 = vpack.c.bf16 %v5695_v26, %v3877_v32  ;;  %v5277_v35 = vld [vmem:[#allocation3 + $0x90] sm:$0xff]   ;;  %v244_v43 = vpack.c.bf16 %v5722_v41, %v5698_v27 }
  0x55   : >> { %4503 = vmatpush3.bf16.msra.mxu0 %v5261_v6  ;;  %v5276_v30 = vld [vmem:[#allocation3 + $0xc8] sm:$0xff]   ;;  %v216_v36 = vpack.c.bf16 %v5707_v33, %v211_v31  ;;  %v5278_v37 = vld [vmem:[#allocation3 + $0xd0] sm:$0xff]   ;;  %v5279_v38 = vld [vmem:[#allocation3 + $0x98] sm:$0xff]  }
  0x56   : >> { %4531 = vmatpush3.bf16.msra.mxu1 %v5262_v7  ;;  %4504 = vmatprep.subr.bf16.mxu0 %v5541_v2  ;;  %v5280_v39 = vld [vmem:[#allocation3 + $0xd8] sm:$0xff]   ;;  %v5719_v40 = vld [vmem:[%s5683_s27 + $0x20] sm:$0xff]  ;;  %v5726_v42 = vld [vmem:[%s5683_s27 + $0x28] sm:$0xff] }
  0x57   : >> { %4532 = vmatprep.subr.bf16.mxu1 %v5541_v2  ;;  %v5281_v44 = vld [vmem:[#allocation3 + $0xa0] sm:$0xff]   ;;  %v217_v45 = vpack.c.bf16 %v5726_v42, %v5719_v40  ;;  %v5743_v48 = vld [vmem:[%s5683_s27 + $0x23] sm:$0xff]  ;;  %v5287_v54 = vld [vmem:[#allocation3 + $0xb8] sm:$0xff]  }
  0x58   : >> { %v5282_v46 = vld [vmem:[#allocation3 + $0xe0] sm:$0xff]   ;;  %v5283_v49 = vld [vmem:[#allocation3 + $0xa8] sm:$0xff]   ;;  %v5285_v52 = vld [vmem:[#allocation3 + $0xb0] sm:$0xff]  }
  0x59   : >> { %4505 = vmatpush3.bf16.msra.mxu0 %v5263_v8  ;;  %v5740_v47 = vld [vmem:[%s5683_s27 + $0x1b] sm:$0xff]  ;;  %v5286_v53 = vld [vmem:[#allocation3 + $0xf0] sm:$0xff]   ;;  %v5288_v56 = vld [vmem:[#allocation3 + $0xf8] sm:$0xff]  }
  0x5a   : >> { %4533 = vmatpush3.bf16.msra.mxu1 %v5264_v9  ;;  %4506 = vmatprep.subr.bf16.mxu0 %v5541_v2  ;;  %v1314_v50 = vpack.c.bf16 %v5743_v48, %v5740_v47  ;;  %v5284_v51 = vld [vmem:[#allocation3 + $0xe8] sm:$0xff]   ;;  %v3898_v57 = vld [vmem:[%s5683_s27 + $0xa] sm:$0xff]  ;;  %v5289_v62 = vld [vmem:[#allocation3 + $0x100] sm:$0xff]  }
  0x5b   : >> { %4534 = vmatprep.subr.bf16.mxu1 %v5541_v2  ;;  %v3897_v55 = vld [vmem:[%s5683_s27 + $0x2] sm:$0xff]  ;;  %v3912_v59 = vld [vmem:[%s5683_s27 + $0xb] sm:$0xff]  ;;  %v5290_v63 = vld [vmem:[#allocation3 + $0x140] sm:$0xff]  }
  0x5c   : >> { %v3911_v58 = vld [vmem:[%s5683_s27 + $0x3] sm:$0xff]  ;;  %v480_v60 = vpack.c.bf16 %v3898_v57, %v3897_v55  ;;  %v3899_v4 = vld [vmem:[%s5683_s27 + $0x12] sm:$0xff]  ;;  %v5765_v5 = vld [vmem:[%s5683_s27 + $0x1a] sm:$0xff] }
  0x5d   : >> { %4507 = vmatpush3.bf16.msra.mxu0 %v5265_v10  ;;  %v619_v61 = vpack.c.bf16 %v3912_v59, %v3911_v58  ;;  %v5291_v1 = vld [vmem:[#allocation3 + $0x108] sm:$0xff]   ;;  %v3913_v6 = vld [vmem:[%s5683_s27 + $0x13] sm:$0xff]  ;;  %v481_v9 = vpack.c.bf16 %v5765_v5, %v3899_v4  ;;  %v5794_v18 = vld [vmem:[%s5683_s27 + $0x2b] sm:$0xff] }
  0x5e   : >> { %4535 = vmatpush3.bf16.msra.mxu1 %v5266_v11  ;;  %4508 = vmatprep.subr.bf16.mxu0 %v5541_v2  ;;  %v5292_v3 = vld [vmem:[#allocation3 + $0x148] sm:$0xff]   ;;  %v5773_v7 = vld [vmem:[%s5683_s27 + $0x30] sm:$0xff]  ;;  %v5776_v8 = vld [vmem:[%s5683_s27 + $0x38] sm:$0xff]  ;;  %v621_v21 = vpack.c.bf16 %v5794_v18, %v5743_v48 }
  0x5f   : >> { %4536 = vmatprep.subr.bf16.mxu1 %v5541_v2  ;;  %v1592_v10 = vpack.c.bf16 %v5776_v8, %v5773_v7  ;;  %v5293_v11 = vld [vmem:[#allocation3 + $0x110] sm:$0xff]   ;;  %v5297_v20 = vld [vmem:[#allocation3 + $0x120] sm:$0xff]   ;;  %v5312_v55 = vld [vmem:[#allocation3 + $0x1d8] sm:$0xff]  }
  0x60   : >> { %v3925_v31 = vld [vmem:[%s5683_s27 + $0x4] sm:$0xff]  ;;  %v3926_v32 = vld [vmem:[%s5683_s27 + $0xc] sm:$0xff]  ;;  %v5313_v59 = vld [vmem:[#allocation3 + $0x1a0] sm:$0xff]  }
  0x61   : >> { %4509 = vmatpush3.bf16.msra.mxu0 %v5267_v12  ;;  %v620_v12 = vpack.c.bf16 %v5740_v47, %v3913_v6  ;;  %v5850_v57 = vld [vmem:[%s5683_s27 + $0x2c] sm:$0xff]  ;;  %v5854_v58 = vld [vmem:[%s5683_s27 + $0x40] sm:$0xff]  ;;  %vm3702_vm3 = vmand %vm3700_vm1, %vm3701_vm2 }
  0x62   : >> { %4537 = vmatpush3.bf16.msra.mxu1 %v5268_v13  ;;  %4510 = vmatprep.subr.bf16.mxu0 %v5541_v2  ;;  %v5294_v13 = vld [vmem:[#allocation3 + $0x150] sm:$0xff]   ;;  %v5319_v4 = vld [vmem:[#allocation3 + $0x1b8] sm:$0xff]  }
  0x63   : >> { %4538 = vmatprep.subr.bf16.mxu1 %v5541_v2  ;;  %v5320_v6 = vld [vmem:[#allocation3 + $0x1f8] sm:$0xff]   ;;  %v5325_v27 = vld [vmem:[#allocation3 + $0x210] sm:$0xff]  }
  0x64   : >> { %v5341_v48 = vld [vmem:[#allocation3 + $0x290] sm:$0xff]  }
  0x65   : >> { %4511 = vmatpush3.bf16.msra.mxu0 %v5269_v14  ;;  %v5295_v14 = vld [vmem:[#allocation3 + $0x118] sm:$0xff]  }
  0x66   : >> { %4539 = vmatpush3.bf16.msra.mxu1 %v5270_v15  ;;  %4512 = vmatprep.subr.bf16.mxu0 %v5541_v2  ;;  %v5296_v15 = vld [vmem:[#allocation3 + $0x158] sm:$0xff]  }
  0x67   : >> { %4540 = vmatprep.subr.bf16.mxu1 %v5541_v2 }
  0x69   : >> { %4513 = vmatpush3.bf16.msra.mxu0 %v5271_v16  ;;  %v5787_v16 = vld [vmem:[%s5683_s27 + $0x22] sm:$0xff] }
  0x6a   : >> { %4541 = vmatpush3.bf16.msra.mxu1 %v5272_v17  ;;  %4554 = vmatprep.subr.bf16.mxu0 %v5541_v2  ;;  %v5790_v17 = vld [vmem:[%s5683_s27 + $0x2a] sm:$0xff] }
  0x6b   : >> { %4582 = vmatprep.subr.bf16.mxu1 %v5541_v2  ;;  %v482_v19 = vpack.c.bf16 %v5790_v17, %v5787_v16 }
  0x6c   : >> { %4515 = vmatmul.mubr.bf16.vlgmr.msra.gmra.mrb[0].mxu0 %v242_v22  ;;  %v5298_v22 = vld [vmem:[#allocation3 + $0x160] sm:$0xff]  }
  0x6d   : >> { %4543 = vmatmul.mubr.bf16.vlgmr.msra.gmra.mrb[0].mxu1 %v215_v23  ;;  %4555 = vmatpush3.bf16.msra.mxu0 %v5273_v24  ;;  %v5299_v23 = vld [vmem:[#allocation3 + $0x128] sm:$0xff]  }
  0x6e   : >> { %4583 = vmatpush3.bf16.msra.mxu1 %v5274_v25  ;;  %4556 = vmatprep.subr.bf16.mxu0 %v5541_v2  ;;  %v5300_v24 = vld [vmem:[#allocation3 + $0x168] sm:$0xff]   ;;  %v5301_v25 = vld [vmem:[#allocation3 + $0x130] sm:$0xff]  }
  0x6f   : >> { %4584 = vmatprep.subr.bf16.mxu1 %v5541_v2  ;;  %4546 = vmatprep.mubr.msk.bf16.mxu1 %vm5542_vm0, %v5541_v2 }
  0x70   : >> { %4518 = vmatprep.mubr.msk.bf16.mxu0 %vm5542_vm0, %v5541_v2 }
  0x71   : >> { %4557 = vmatpush3.bf16.msra.mxu0 %v5275_v28  ;;  %v5302_v28 = vld [vmem:[#allocation3 + $0x170] sm:$0xff]  }
  0x72   : >> { %4585 = vmatpush3.bf16.msra.mxu1 %v5276_v30  ;;  %4558 = vmatprep.subr.bf16.mxu0 %v5541_v2  ;;  %v5303_v30 = vld [vmem:[#allocation3 + $0x138] sm:$0xff]  }
  0x73   : >> { %4586 = vmatprep.subr.bf16.mxu1 %v5541_v2 }
  0x74   : >> { %4519 = vmatmul.mubr.bf16.gmra.mrb[4].mxu0 %v243_v34  ;;  %v5304_v34 = vld [vmem:[#allocation3 + $0x178] sm:$0xff]  }
  0x75   : >> { %4559 = vmatpush3.bf16.msra.mxu0 %v5277_v35  ;;  %4547 = vmatmul.mubr.bf16.gmra.mrb[4].mxu1 %v216_v36  ;;  %v5305_v35 = vld [vmem:[#allocation3 + $0x180] sm:$0xff]   ;;  %v758_v36 = vpack.c.bf16 %v3926_v32, %v3925_v31  ;;  %v5331_v31 = vld [vmem:[#allocation3 + $0x228] sm:$0xff]  }
  0x76   : >> { %4587 = vmatpush3.bf16.msra.mxu1 %v5278_v37  ;;  %4560 = vmatprep.subr.bf16.mxu0 %v5541_v2  ;;  %v5820_v37 = vld [vmem:[%s5683_s27 + $0x32] sm:$0xff]  ;;  %v5332_v32 = vld [vmem:[#allocation3 + $0x268] sm:$0xff]  }
  0x77   : >> { %4588 = vmatprep.subr.bf16.mxu1 %v5541_v2  ;;  %4550 = vmatprep.mubr.msk.bf16.mxu1 %vm5542_vm0, %v5541_v2 }
  0x78   : >> { %4522 = vmatprep.mubr.msk.bf16.mxu0 %vm5542_vm0, %v5541_v2 }
  0x79   : >> { %4561 = vmatpush3.bf16.msra.mxu0 %v5279_v38  ;;  %v897_v38 = vpack.c.bf16 %v5719_v40, %v5707_v33  ;;  %v5308_v33 = vld [vmem:[#allocation3 + $0x1c8] sm:$0xff]  }
  0x7a   : >> { %4589 = vmatpush3.bf16.msra.mxu1 %v5280_v39  ;;  %4562 = vmatprep.subr.bf16.mxu0 %v5541_v2  ;;  %v5825_v39 = vld [vmem:[%s5683_s27 + $0x3a] sm:$0xff] }
  0x7b   : >> { %4590 = vmatprep.subr.bf16.mxu1 %v5541_v2 }
  0x7c   : >> { %4523 = vmatmul.mubr.bf16.gmra.mrb[8].mxu0 %v244_v43  ;;  %v5306_v43 = vld [vmem:[#allocation3 + $0x1c0] sm:$0xff]  }
  0x7d   : >> { %4563 = vmatpush3.bf16.msra.mxu0 %v5281_v44  ;;  %4551 = vmatmul.mubr.bf16.gmra.mrb[8].mxu1 %v217_v45  ;;  %v1870_v44 = vpack.c.bf16 %v5825_v39, %v5820_v37  ;;  %v5307_v45 = vld [vmem:[#allocation3 + $0x188] sm:$0xff]  }
  0x7e   : >> { %4591 = vmatpush3.bf16.msra.mxu1 %v5282_v46  ;;  %4564 = vmatprep.subr.bf16.mxu0 %v5541_v2  ;;  %v3927_v46 = vld [vmem:[%s5683_s27 + $0x14] sm:$0xff] }
  0x7f   : >> { %4592 = vmatprep.subr.bf16.mxu1 %v5541_v2  ;;  %4570 = vmatprep.mubr.msk.bf16.mxu0 %vm5542_vm0, %v5541_v2 }
  0x80   : >> { %4598 = vmatprep.mubr.msk.bf16.mxu1 %vm5542_vm0, %v5541_v2 }
  0x81   : >> { %4565 = vmatpush3.bf16.msra.mxu0 %v5283_v49  ;;  %v5833_v49 = vld [vmem:[%s5683_s27 + $0x1c] sm:$0xff] }
  0x82   : >> { %4593 = vmatpush3.bf16.msra.mxu1 %v5284_v51  ;;  %4566 = vmatprep.subr.bf16.mxu0 %v5541_v2  ;;  %v759_v40 = vpack.c.bf16 %v5833_v49, %v3927_v46  ;;  %v5309_v51 = vld [vmem:[#allocation3 + $0x190] sm:$0xff]   ;;  %v5338_v46 = vld [vmem:[#allocation3 + $0x2c0] sm:$0xff]  }
  0x83   : >> { %4594 = vmatprep.subr.bf16.mxu1 %v5541_v2 }
  0x85   : >> { %4567 = vmatpush3.bf16.msra.mxu0 %v5285_v52  ;;  %v898_v52 = vpack.c.bf16 %v5773_v7, %v5726_v42 }
  0x86   : >> { %4595 = vmatpush3.bf16.msra.mxu1 %v5286_v53  ;;  %4568 = vmatprep.subr.bf16.mxu0 %v5541_v2  ;;  %v5310_v53 = vld [vmem:[#allocation3 + $0x1d0] sm:$0xff]  }
  0x87   : >> { %4596 = vmatprep.subr.bf16.mxu1 %v5541_v2 }
  0x89   : >> { %4569 = vmatpush3.bf16.msra.mxu0 %v5287_v54  ;;  %v5311_v54 = vld [vmem:[#allocation3 + $0x198] sm:$0xff]  }
  0x8a   : >> { %4597 = vmatpush3.bf16.msra.mxu1 %v5288_v56  ;;  %4610 = vmatprep.subr.bf16.mxu0 %v5541_v2  ;;  %v5847_v56 = vld [vmem:[%s5683_s27 + $0x24] sm:$0xff] }
  0x8b   : >> { %4638 = vmatprep.subr.bf16.mxu1 %v5541_v2  ;;  %v760_v42 = vpack.c.bf16 %v5850_v57, %v5847_v56 }
  0x8c   : >> { %4571 = vmatmul.mubr.bf16.vlgmr.msra.gmra.mrb[12].mxu0 %v480_v60  ;;  %v899_v60 = vpack.c.bf16 %v5854_v58, %v5776_v8  ;;  %v5357_v8 = vld [vmem:[#allocation3 + $0x310] sm:$0xff]  }
  0x8d   : >> { %4599 = vmatmul.mubr.bf16.vlgmr.msra.gmra.mrb[12].mxu1 %v619_v61  ;;  %4611 = vmatpush3.bf16.msra.mxu0 %v5289_v62  ;;  %v5314_v61 = vld [vmem:[#allocation3 + $0x1e0] sm:$0xff]   ;;  %v5315_v62 = vld [vmem:[#allocation3 + $0x1a8] sm:$0xff]  }
  0x8e   : >> { %4639 = vmatpush3.bf16.msra.mxu1 %v5290_v63  ;;  %4612 = vmatprep.subr.bf16.mxu0 %v5541_v2  ;;  %v5316_v63 = vld [vmem:[#allocation3 + $0x1e8] sm:$0xff]  }
  0x8f   : >> { %4640 = vmatprep.subr.bf16.mxu1 %v5541_v2  ;;  %4574 = vmatprep.mubr.msk.bf16.mxu0 %vm5542_vm0, %v5541_v2 }
  0x90   : >> { %4602 = vmatprep.mubr.msk.bf16.mxu1 %vm5542_vm0, %v5541_v2 }
  0x91   : >> { %4613 = vmatpush3.bf16.msra.mxu0 %v5291_v1  ;;  %v5317_v1 = vld [vmem:[#allocation3 + $0x1b0] sm:$0xff]  }
  0x92   : >> { %4641 = vmatpush3.bf16.msra.mxu1 %v5292_v3  ;;  %4614 = vmatprep.subr.bf16.mxu0 %v5541_v2  ;;  %v5318_v3 = vld [vmem:[#allocation3 + $0x1f0] sm:$0xff]  }
  0x93   : >> { %4642 = vmatprep.subr.bf16.mxu1 %v5541_v2 }
  0x94   : >> { %4575 = vmatmul.mubr.bf16.gmra.mrb[16].mxu0 %v481_v9  ;;  %v5321_v9 = vld [vmem:[#allocation3 + $0x200] sm:$0xff]  }
  0x95   : >> { %4615 = vmatpush3.bf16.msra.mxu0 %v5293_v11  ;;  %4603 = vmatmul.mubr.bf16.gmra.mrb[16].mxu1 %v620_v12  ;;  %v5878_v11 = vld [vmem:[%s5683_s27 + $0x34] sm:$0xff]  ;;  %v1175_v12 = vpack.c.bf16 %v5787_v16, %v5765_v5  ;;  %v5324_v5 = vld [vmem:[#allocation3 + $0x248] sm:$0xff]   ;;  %v5326_v16 = vld [vmem:[#allocation3 + $0x250] sm:$0xff]  }
  0x96   : >> { %4643 = vmatpush3.bf16.msra.mxu1 %v5294_v13  ;;  %4616 = vmatprep.subr.bf16.mxu0 %v5541_v2  ;;  %v5883_v13 = vld [vmem:[%s5683_s27 + $0x3c] sm:$0xff] }
  0x97   : >> { %4644 = vmatprep.subr.bf16.mxu1 %v5541_v2  ;;  %4578 = vmatprep.mubr.msk.bf16.mxu0 %vm5542_vm0, %v5541_v2 }
  0x98   : >> { %4606 = vmatprep.mubr.msk.bf16.mxu1 %vm5542_vm0, %v5541_v2 }
  0x99   : >> { %4617 = vmatpush3.bf16.msra.mxu0 %v5295_v14  ;;  %v5322_v14 = vld [vmem:[#allocation3 + $0x240] sm:$0xff]  }
  0x9a   : >> { %4645 = vmatpush3.bf16.msra.mxu1 %v5296_v15  ;;  %4618 = vmatprep.subr.bf16.mxu0 %v5541_v2  ;;  %v2148_v15 = vpack.c.bf16 %v5883_v13, %v5878_v11 }
  0x9b   : >> { %4646 = vmatprep.subr.bf16.mxu1 %v5541_v2 }
  0x9c   : >> { %4579 = vmatmul.mubr.bf16.gmra.mrb[20].mxu0 %v482_v19  ;;  %v5323_v19 = vld [vmem:[#allocation3 + $0x208] sm:$0xff]  }
  0x9d   : >> { %4619 = vmatpush3.bf16.msra.mxu0 %v5297_v20  ;;  %4607 = vmatmul.mubr.bf16.gmra.mrb[20].mxu1 %v621_v21  ;;  %v5893_v20 = vld [vmem:[%s5683_s27 + $0x31] sm:$0xff] }
  0x9e   : >> { %4647 = vmatpush3.bf16.msra.mxu1 %v5298_v22  ;;  %4620 = vmatprep.subr.bf16.mxu0 %v5541_v2  ;;  %v1037_v26 = vpack.c.bf16 %v5893_v20, %v5722_v41  ;;  %v5327_v21 = vld [vmem:[#allocation3 + $0x218] sm:$0xff]   ;;  %v5911_v41 = vld [vmem:[%s5683_s27 + $0x41] sm:$0xff] }
  0x9f   : >> { %4648 = vmatprep.subr.bf16.mxu1 %v5541_v2  ;;  %4626 = vmatprep.mubr.msk.bf16.mxu0 %vm5542_vm0, %v5541_v2  ;;  %v5328_v22 = vld [vmem:[#allocation3 + $0x258] sm:$0xff]  }
  0xa0   : >> { %4654 = vmatprep.mubr.msk.bf16.mxu1 %vm5542_vm0, %v5541_v2 }
  0xa1   : >> { %4621 = vmatpush3.bf16.msra.mxu0 %v5299_v23  ;;  %v5908_v23 = vld [vmem:[%s5683_s27 + $0x39] sm:$0xff] }
  0xa2   : >> { %4649 = vmatpush3.bf16.msra.mxu1 %v5300_v24  ;;  %4622 = vmatprep.subr.bf16.mxu0 %v5541_v2  ;;  %v5915_v24 = vld [vmem:[%s5683_s27 + $0x42] sm:$0xff] }
  0xa3   : >> { %4650 = vmatprep.subr.bf16.mxu1 %v5541_v2 }
  0xa5   : >> { %4623 = vmatpush3.bf16.msra.mxu0 %v5301_v25  ;;  %v5329_v25 = vld [vmem:[#allocation3 + $0x220] sm:$0xff]  }
  0xa6   : >> { %4651 = vmatpush3.bf16.msra.mxu1 %v5302_v28  ;;  %4624 = vmatprep.subr.bf16.mxu0 %v5541_v2  ;;  %v1177_v28 = vpack.c.bf16 %v5915_v24, %v5825_v39  ;;  %v5373_v39 = vld [vmem:[#allocation3 + $0x390] sm:$0xff]  }
  0xa7   : >> { %4652 = vmatprep.subr.bf16.mxu1 %v5541_v2 }
  0xa9   : >> { %4625 = vmatpush3.bf16.msra.mxu0 %v5303_v30  ;;  %v5330_v30 = vld [vmem:[#allocation3 + $0x260] sm:$0xff]  }
  0xaa   : >> { %4653 = vmatpush3.bf16.msra.mxu1 %v5304_v34  ;;  %4666 = vmatprep.subr.bf16.mxu0 %v5541_v2  ;;  %v5333_v34 = vld [vmem:[#allocation3 + $0x230] sm:$0xff]  }
  0xab   : >> { %4694 = vmatprep.subr.bf16.mxu1 %v5541_v2 }
  0xac   : >> { %4627 = vmatmul.mubr.bf16.vlgmr.msra.gmra.mrb[24].mxu0 %v758_v36  ;;  %v5335_v36 = vld [vmem:[#allocation3 + $0x238] sm:$0xff]  }
  0xad   : >> { %4655 = vmatmul.mubr.bf16.vlgmr.msra.gmra.mrb[24].mxu1 %v897_v38  ;;  %4667 = vmatpush3.bf16.msra.mxu0 %v5305_v35  ;;  %v5334_v35 = vld [vmem:[#allocation3 + $0x270] sm:$0xff]   ;;  %v5336_v38 = vld [vmem:[#allocation3 + $0x278] sm:$0xff]  }
  0xae   : >> { %4695 = vmatpush3.bf16.msra.mxu1 %v5306_v43  ;;  %4668 = vmatprep.subr.bf16.mxu0 %v5541_v2  ;;  %v1453_v43 = vpack.c.bf16 %v5847_v56, %v5833_v49  ;;  %v5954_v49 = vld [vmem:[%s5683_s27 + $0x33] sm:$0xff]  ;;  %v5969_v56 = vld [vmem:[%s5683_s27 + $0x3b] sm:$0xff] }
  0xaf   : >> { %4696 = vmatprep.subr.bf16.mxu1 %v5541_v2  ;;  %4630 = vmatprep.mubr.msk.bf16.mxu0 %vm5542_vm0, %v5541_v2  ;;  %v1315_v47 = vpack.c.bf16 %v5954_v49, %v5794_v18  ;;  %v5972_v18 = vld [vmem:[%s5683_s27 + $0x43] sm:$0xff] }
  0xb0   : >> { %4658 = vmatprep.mubr.msk.bf16.mxu1 %vm5542_vm0, %v5541_v2 }
  0xb1   : >> { %4669 = vmatpush3.bf16.msra.mxu0 %v5307_v45  ;;  %v5337_v45 = vld [vmem:[#allocation3 + $0x280] sm:$0xff]  }
  0xb2   : >> { %4697 = vmatpush3.bf16.msra.mxu1 %v5308_v33  ;;  %4670 = vmatprep.subr.bf16.mxu0 %v5541_v2  ;;  %v5941_v33 = vld [vmem:[%s5683_s27 + $0x49] sm:$0xff] }
  0xb3   : >> { %4698 = vmatprep.subr.bf16.mxu1 %v5541_v2 }
  0xb4   : >> { %4631 = vmatmul.mubr.bf16.gmra.mrb[28].mxu0 %v759_v40  ;;  %v5945_v40 = vld [vmem:[%s5683_s27 + $0x51] sm:$0xff] }
  0xb5   : >> { %4671 = vmatpush3.bf16.msra.mxu0 %v5309_v51  ;;  %4659 = vmatmul.mubr.bf16.gmra.mrb[28].mxu1 %v898_v52  ;;  %v2426_v51 = vpack.c.bf16 %v5945_v40, %v5941_v33  ;;  %v5339_v52 = vld [vmem:[#allocation3 + $0x288] sm:$0xff]  }
  0xb6   : >> { %4699 = vmatpush3.bf16.msra.mxu1 %v5310_v53  ;;  %4672 = vmatprep.subr.bf16.mxu0 %v5541_v2  ;;  %v5340_v53 = vld [vmem:[#allocation3 + $0x2c8] sm:$0xff]  }
  0xb7   : >> { %4700 = vmatprep.subr.bf16.mxu1 %v5541_v2  ;;  %4634 = vmatprep.mubr.msk.bf16.mxu0 %vm5542_vm0, %v5541_v2 }
  0xb8   : >> { %4662 = vmatprep.mubr.msk.bf16.mxu1 %vm5542_vm0, %v5541_v2 }
  0xb9   : >> { %4673 = vmatpush3.bf16.msra.mxu0 %v5311_v54  ;;  %v5342_v54 = vld [vmem:[#allocation3 + $0x2d0] sm:$0xff]  }
  0xba   : >> { %4701 = vmatpush3.bf16.msra.mxu1 %v5312_v55  ;;  %4674 = vmatprep.subr.bf16.mxu0 %v5541_v2  ;;  %v5343_v55 = vld [vmem:[#allocation3 + $0x298] sm:$0xff]  }
  0xbb   : >> { %4702 = vmatprep.subr.bf16.mxu1 %v5541_v2 }
  0xbc   : >> { %4635 = vmatmul.mubr.bf16.gmra.mrb[32].mxu0 %v760_v42  ;;  %v5344_v42 = vld [vmem:[#allocation3 + $0x2d8] sm:$0xff]  }
  0xbd   : >> { %4675 = vmatpush3.bf16.msra.mxu0 %v5313_v59  ;;  %4663 = vmatmul.mubr.bf16.gmra.mrb[32].mxu1 %v899_v60  ;;  %v5976_v59 = vld [vmem:[%s5683_s27 + $0x44] sm:$0xff]  ;;  %v5345_v60 = vld [vmem:[#allocation3 + $0x2a0] sm:$0xff]  }
  0xbe   : >> { %4703 = vmatpush3.bf16.msra.mxu1 %v5314_v61  ;;  %4676 = vmatprep.subr.bf16.mxu0 %v5541_v2  ;;  %v1455_v61 = vpack.c.bf16 %v5976_v59, %v5883_v13 }
  0xbf   : >> { %4704 = vmatprep.subr.bf16.mxu1 %v5541_v2  ;;  %4682 = vmatprep.mubr.msk.bf16.mxu0 %vm5542_vm0, %v5541_v2 }
  0xc0   : >> { %4710 = vmatprep.mubr.msk.bf16.mxu1 %vm5542_vm0, %v5541_v2 }
  0xc1   : >> { %4677 = vmatpush3.bf16.msra.mxu0 %v5315_v62  ;;  %v5346_v62 = vld [vmem:[#allocation3 + $0x2e0] sm:$0xff]  }
  0xc2   : >> { %4705 = vmatpush3.bf16.msra.mxu1 %v5316_v63  ;;  %4678 = vmatprep.subr.bf16.mxu0 %v5541_v2  ;;  %v5347_v63 = vld [vmem:[#allocation3 + $0x2a8] sm:$0xff]  }
  0xc3   : >> { %4706 = vmatprep.subr.bf16.mxu1 %v5541_v2 }
  0xc5   : >> { %4679 = vmatpush3.bf16.msra.mxu0 %v5317_v1  ;;  %v5348_v1 = vld [vmem:[#allocation3 + $0x2e8] sm:$0xff]  }
  0xc6   : >> { %4707 = vmatpush3.bf16.msra.mxu1 %v5318_v3  ;;  %4680 = vmatprep.subr.bf16.mxu0 %v5541_v2  ;;  %v5349_v3 = vld [vmem:[#allocation3 + $0x2b0] sm:$0xff]  }
  0xc7   : >> { %4708 = vmatprep.subr.bf16.mxu1 %v5541_v2 }
  0xc9   : >> { %4681 = vmatpush3.bf16.msra.mxu0 %v5319_v4  ;;  %v5350_v4 = vld [vmem:[#allocation3 + $0x2f0] sm:$0xff]  }
  0xca   : >> { %4709 = vmatpush3.bf16.msra.mxu1 %v5320_v6  ;;  %4722 = vmatprep.subr.bf16.mxu0 %v5541_v2  ;;  %v5351_v6 = vld [vmem:[#allocation3 + $0x2b8] sm:$0xff]  }
  0xcb   : >> { %4750 = vmatprep.subr.bf16.mxu1 %v5541_v2 }
  0xcc   : >> { %4683 = vmatmul.mubr.bf16.vlgmr.msra.gmra.mrb[36].mxu0 %v1036_v29  ;;  %v1176_v29 = vpack.c.bf16 %v5820_v37, %v5790_v17  ;;  %v1038_v17 = vpack.c.bf16 %v5911_v41, %v5908_v23 }
  0xcd   : >> { %4711 = vmatmul.mubr.bf16.vlgmr.msra.gmra.mrb[36].mxu1 %v1175_v12  ;;  %4723 = vmatpush3.bf16.msra.mxu0 %v5321_v9  ;;  %v5352_v9 = vld [vmem:[#allocation3 + $0x2f8] sm:$0xff]   ;;  %v5353_v12 = vld [vmem:[#allocation3 + $0x300] sm:$0xff]  }
  0xce   : >> { %4751 = vmatpush3.bf16.msra.mxu1 %v5322_v14  ;;  %4724 = vmatprep.subr.bf16.mxu0 %v5541_v2  ;;  %v5354_v14 = vld [vmem:[#allocation3 + $0x340] sm:$0xff]  }
  0xcf   : >> { %4752 = vmatprep.subr.bf16.mxu1 %v5541_v2  ;;  %4686 = vmatprep.mubr.msk.bf16.mxu0 %vm5542_vm0, %v5541_v2 }
  0xd0   : >> { %4714 = vmatprep.mubr.msk.bf16.mxu1 %vm5542_vm0, %v5541_v2 }
  0xd1   : >> { %4725 = vmatpush3.bf16.msra.mxu0 %v5323_v19  ;;  %v6000_v19 = vld [vmem:[%s5683_s27 + $0x4b] sm:$0xff] }
  0xd2   : >> { %4753 = vmatpush3.bf16.msra.mxu1 %v5324_v5  ;;  %4726 = vmatprep.subr.bf16.mxu0 %v5541_v2  ;;  %v6003_v5 = vld [vmem:[%s5683_s27 + $0x53] sm:$0xff] }
  0xd3   : >> { %4754 = vmatprep.subr.bf16.mxu1 %v5541_v2 }
  0xd4   : >> { %4687 = vmatmul.mubr.bf16.gmra.mrb[40].mxu0 %v1037_v26  ;;  %v1731_v26 = vpack.c.bf16 %v5908_v23, %v5893_v20  ;;  %v5358_v20 = vld [vmem:[#allocation3 + $0x350] sm:$0xff]   ;;  %v5360_v23 = vld [vmem:[#allocation3 + $0x358] sm:$0xff]  }
  0xd5   : >> { %4727 = vmatpush3.bf16.msra.mxu0 %v5325_v27  ;;  %4715 = vmatmul.mubr.bf16.gmra.mrb[40].mxu1 %v1176_v29  ;;  %v5355_v27 = vld [vmem:[#allocation3 + $0x308] sm:$0xff]   ;;  %v2704_v29 = vpack.c.bf16 %v6003_v5, %v6000_v19 }
  0xd6   : >> { %4755 = vmatpush3.bf16.msra.mxu1 %v5326_v16  ;;  %4728 = vmatprep.subr.bf16.mxu0 %v5541_v2  ;;  %v5356_v16 = vld [vmem:[#allocation3 + $0x348] sm:$0xff]  }
  0xd7   : >> { %4756 = vmatprep.subr.bf16.mxu1 %v5541_v2  ;;  %4690 = vmatprep.mubr.msk.bf16.mxu0 %vm5542_vm0, %v5541_v2 }
  0xd8   : >> { %4718 = vmatprep.mubr.msk.bf16.mxu1 %vm5542_vm0, %v5541_v2 }
  0xd9   : >> { %4729 = vmatpush3.bf16.msra.mxu0 %v5327_v21  ;;  %v6015_v21 = vld [vmem:[%s5683_s27 + $0x48] sm:$0xff] }
  0xda   : >> { %4757 = vmatpush3.bf16.msra.mxu1 %v5328_v22  ;;  %4730 = vmatprep.subr.bf16.mxu0 %v5541_v2  ;;  %v1593_v7 = vpack.c.bf16 %v6015_v21, %v5854_v58  ;;  %v5359_v22 = vld [vmem:[#allocation3 + $0x318] sm:$0xff]   ;;  %v6033_v58 = vld [vmem:[%s5683_s27 + $0x58] sm:$0xff] }
  0xdb   : >> { %4758 = vmatprep.subr.bf16.mxu1 %v5541_v2 }
  0xdc   : >> { %4691 = vmatmul.mubr.bf16.gmra.mrb[44].mxu0 %v1038_v17  ;;  %v6030_v17 = vld [vmem:[%s5683_s27 + $0x50] sm:$0xff] }
  0xdd   : >> { %4731 = vmatpush3.bf16.msra.mxu0 %v5329_v25  ;;  %4719 = vmatmul.mubr.bf16.gmra.mrb[44].mxu1 %v1177_v28  ;;  %v6036_v25 = vld [vmem:[%s5683_s27 + $0x59] sm:$0xff] }
  0xde   : >> { %4759 = vmatpush3.bf16.msra.mxu1 %v5330_v30  ;;  %4732 = vmatprep.subr.bf16.mxu0 %v5541_v2  ;;  %v5361_v28 = vld [vmem:[#allocation3 + $0x320] sm:$0xff]   ;;  %v1733_v30 = vpack.c.bf16 %v6036_v25, %v5945_v40 }
  0xdf   : >> { %4760 = vmatprep.subr.bf16.mxu1 %v5541_v2  ;;  %4738 = vmatprep.mubr.msk.bf16.mxu0 %vm5542_vm0, %v5541_v2 }
  0xe0   : >> { %4766 = vmatprep.mubr.msk.bf16.mxu1 %vm5542_vm0, %v5541_v2 }
  0xe1   : >> { %4733 = vmatpush3.bf16.msra.mxu0 %v5331_v31  ;;  %v5362_v31 = vld [vmem:[#allocation3 + $0x360] sm:$0xff]  }
  0xe2   : >> { %4761 = vmatpush3.bf16.msra.mxu1 %v5332_v32  ;;  %4734 = vmatprep.subr.bf16.mxu0 %v5541_v2  ;;  %v5363_v32 = vld [vmem:[#allocation3 + $0x328] sm:$0xff]  }
  0xe3   : >> { %4762 = vmatprep.subr.bf16.mxu1 %v5541_v2 }
  0xe5   : >> { %4735 = vmatpush3.bf16.msra.mxu0 %v5333_v34  ;;  %v5364_v34 = vld [vmem:[#allocation3 + $0x368] sm:$0xff]  }
  0xe6   : >> { %4763 = vmatpush3.bf16.msra.mxu1 %v5334_v35  ;;  %4736 = vmatprep.subr.bf16.mxu0 %v5541_v2  ;;  %v5365_v35 = vld [vmem:[#allocation3 + $0x330] sm:$0xff]  }
  0xe7   : >> { %4764 = vmatprep.subr.bf16.mxu1 %v5541_v2 }
  0xe9   : >> { %4737 = vmatpush3.bf16.msra.mxu0 %v5335_v36  ;;  %v5366_v36 = vld [vmem:[#allocation3 + $0x370] sm:$0xff]  }
  0xea   : >> { %4765 = vmatpush3.bf16.msra.mxu1 %v5336_v38  ;;  %4778 = vmatprep.subr.bf16.mxu0 %v5541_v2  ;;  %v5367_v38 = vld [vmem:[#allocation3 + $0x338] sm:$0xff]  }
  0xeb   : >> { %4806 = vmatprep.subr.bf16.mxu1 %v5541_v2 }
  0xec   : >> { %4739 = vmatmul.mubr.bf16.vlgmr.msra.gmra.mrb[48].mxu0 %v1314_v50  ;;  %v1454_v50 = vpack.c.bf16 %v5878_v11, %v5850_v57  ;;  %v1316_v57 = vpack.c.bf16 %v5972_v18, %v5969_v56 }
  0xed   : >> { %4767 = vmatmul.mubr.bf16.vlgmr.msra.gmra.mrb[48].mxu1 %v1453_v43  ;;  %4779 = vmatpush3.bf16.msra.mxu0 %v5337_v45  ;;  %v5368_v43 = vld [vmem:[#allocation3 + $0x378] sm:$0xff]   ;;  %v2009_v45 = vpack.c.bf16 %v5969_v56, %v5954_v49  ;;  %v5372_v49 = vld [vmem:[#allocation3 + $0x3c8] sm:$0xff]  }
  0xee   : >> { %4807 = vmatpush3.bf16.msra.mxu1 %v5338_v46  ;;  %4780 = vmatprep.subr.bf16.mxu0 %v5541_v2  ;;  %v5369_v46 = vld [vmem:[#allocation3 + $0x380] sm:$0xff]  }
  0xef   : >> { %4808 = vmatprep.subr.bf16.mxu1 %v5541_v2  ;;  %4742 = vmatprep.mubr.msk.bf16.mxu0 %vm5542_vm0, %v5541_v2  ;;  %v6090_v56 = vld [vmem:[%s5683_s27 + $0x5b] sm:$0xff] }
  0xf0   : >> { %4770 = vmatprep.mubr.msk.bf16.mxu1 %vm5542_vm0, %v5541_v2 }
  0xf1   : >> { %4781 = vmatpush3.bf16.msra.mxu0 %v5339_v52  ;;  %v5370_v52 = vld [vmem:[#allocation3 + $0x3c0] sm:$0xff]  }
  0xf2   : >> { %4809 = vmatpush3.bf16.msra.mxu1 %v5340_v53  ;;  %4782 = vmatprep.subr.bf16.mxu0 %v5541_v2  ;;  %v5371_v53 = vld [vmem:[#allocation3 + $0x388] sm:$0xff]  }
  0xf3   : >> { %4810 = vmatprep.subr.bf16.mxu1 %v5541_v2 }
  0xf4   : >> { %4743 = vmatmul.mubr.bf16.gmra.mrb[52].mxu0 %v1315_v47  ;;  %v6068_v47 = vld [vmem:[%s5683_s27 + $0x4a] sm:$0xff] }
  0xf5   : >> { %4783 = vmatpush3.bf16.msra.mxu0 %v5341_v48  ;;  %4771 = vmatmul.mubr.bf16.gmra.mrb[52].mxu1 %v1454_v50  ;;  %v1871_v37 = vpack.c.bf16 %v6068_v47, %v5915_v24  ;;  %v5374_v48 = vld [vmem:[#allocation3 + $0x3d0] sm:$0xff]   ;;  %v5375_v50 = vld [vmem:[#allocation3 + $0x398] sm:$0xff]  }
  0xf6   : >> { %4811 = vmatpush3.bf16.msra.mxu1 %v5342_v54  ;;  %4784 = vmatprep.subr.bf16.mxu0 %v5541_v2  ;;  %v6083_v24 = vld [vmem:[%s5683_s27 + $0x52] sm:$0xff]  ;;  %v6086_v54 = vld [vmem:[%s5683_s27 + $0x5a] sm:$0xff] }
  0xf7   : >> { %4812 = vmatprep.subr.bf16.mxu1 %v5541_v2  ;;  %4746 = vmatprep.mubr.msk.bf16.mxu0 %vm5542_vm0, %v5541_v2 }
  0xf8   : >> { %4774 = vmatprep.mubr.msk.bf16.mxu1 %vm5542_vm0, %v5541_v2 }
  0xf9   : >> { %4785 = vmatpush3.bf16.msra.mxu0 %v5343_v55  ;;  %v5376_v55 = vld [vmem:[#allocation3 + $0x3d8] sm:$0xff]  }
  0xfa   : >> { %4813 = vmatpush3.bf16.msra.mxu1 %v5344_v42  ;;  %4786 = vmatprep.subr.bf16.mxu0 %v5541_v2  ;;  %v5377_v42 = vld [vmem:[#allocation3 + $0x3a0] sm:$0xff]  }
  0xfb   : >> { %4814 = vmatprep.subr.bf16.mxu1 %v5541_v2 }
  0xfc   : >> { %4747 = vmatmul.mubr.bf16.gmra.mrb[56].mxu0 %v1316_v57  ;;  %v2011_v57 = vpack.c.bf16 %v6090_v56, %v6003_v5 }
  0xfd   : >> { %4787 = vmatpush3.bf16.msra.mxu0 %v5345_v60  ;;  %4775 = vmatmul.mubr.bf16.gmra.mrb[56].mxu1 %v1455_v61  ;;  %v5378_v60 = vld [vmem:[#allocation3 + $0x3e0] sm:$0xff]   ;;  %v5379_v61 = vld [vmem:[#allocation3 + $0x3a8] sm:$0xff]  }
  0xfe   : >> { %4815 = vmatpush3.bf16.msra.mxu1 %v5346_v62  ;;  %4788 = vmatprep.subr.bf16.mxu0 %v5541_v2  ;;  %v5380_v62 = vld [vmem:[#allocation3 + $0x3e8] sm:$0xff]  }
  0xff   : >> { %4816 = vmatprep.subr.bf16.mxu1 %v5541_v2  ;;  %4794 = vmatprep.mubr.msk.bf16.mxu0 %vm5542_vm0, %v5541_v2 }
 0x100   : >> { %4822 = vmatprep.mubr.msk.bf16.mxu1 %vm5542_vm0, %v5541_v2 }
 0x101   : >> { %4789 = vmatpush3.bf16.msra.mxu0 %v5347_v63 }
 0x102   : >> { %4817 = vmatpush3.bf16.msra.mxu1 %v5348_v1  ;;  %4790 = vmatprep.subr.bf16.mxu0 %v5541_v2 }
 0x103   : >> { %4818 = vmatprep.subr.bf16.mxu1 %v5541_v2 }
 0x105   : >> { %4791 = vmatpush3.bf16.msra.mxu0 %v5349_v3 }
 0x106   : >> { %4819 = vmatpush3.bf16.msra.mxu1 %v5350_v4  ;;  %4792 = vmatprep.subr.bf16.mxu0 %v5541_v2 }
 0x107   : >> { %4820 = vmatprep.subr.bf16.mxu1 %v5541_v2 }
 0x109   : >> { %4793 = vmatpush3.bf16.msra.mxu0 %v5351_v6 }
 0x10a   : >> { %4821 = vmatpush3.bf16.msra.mxu1 %v5352_v9  ;;  %4834 = vmatprep.subr.bf16.mxu0 %v5541_v2 }
 0x10b   : >> { %4862 = vmatprep.subr.bf16.mxu1 %v5541_v2 }
 0x10c   : >> { %4795 = vmatmul.mubr.bf16.vlgmr.msra.gmra.mrb[60].mxu0 %v1592_v10  ;;  %v1732_v10 = vpack.c.bf16 %v5941_v33, %v5911_v41  ;;  %v1594_v41 = vpack.c.bf16 %v6033_v58, %v6030_v17 }
 0x10d   : >> { %4823 = vmatmul.mubr.bf16.vlgmr.msra.gmra.mrb[60].mxu1 %v1731_v26  ;;  %4835 = vmatpush3.bf16.msra.mxu0 %v5353_v12  ;;  %v5381_v12 = vld [vmem:[#allocation3 + $0x3b0] sm:$0xff]  }
 0x10e   : >> { %4863 = vmatpush3.bf16.msra.mxu1 %v5354_v14  ;;  %4836 = vmatprep.subr.bf16.mxu0 %v5541_v2  ;;  %v5382_v26 = vld [vmem:[#allocation3 + $0x3f0] sm:$0xff]  }
 0x10f   : >> { %4864 = vmatprep.subr.bf16.mxu1 %v5541_v2  ;;  %4798 = vmatprep.mubr.msk.bf16.mxu0 %vm5542_vm0, %v5541_v2 }
 0x110   : >> { %4826 = vmatprep.mubr.msk.bf16.mxu1 %vm5542_vm0, %v5541_v2 }
 0x111   : >> { %4837 = vmatpush3.bf16.msra.mxu0 %v5355_v27 }
 0x112   : >> { %4865 = vmatpush3.bf16.msra.mxu1 %v5356_v16  ;;  %4838 = vmatprep.subr.bf16.mxu0 %v5541_v2 }
 0x113   : >> { %4866 = vmatprep.subr.bf16.mxu1 %v5541_v2 }
 0x114   : >> { %4799 = vmatmul.mubr.bf16.gmra.mrb[64].mxu0 %v1593_v7 }
 0x115   : >> { %4839 = vmatpush3.bf16.msra.mxu0 %v5357_v8  ;;  %4827 = vmatmul.mubr.bf16.gmra.mrb[64].mxu1 %v1732_v10  ;;  %v5383_v8 = vld [vmem:[#allocation3 + $0x3b8] sm:$0xff]  }
 0x116   : >> { %4867 = vmatpush3.bf16.msra.mxu1 %v5358_v20  ;;  %4840 = vmatprep.subr.bf16.mxu0 %v5541_v2  ;;  %v5384_v10 = vld [vmem:[#allocation3 + $0x3f8] sm:$0xff]  }
 0x117   : >> { %4868 = vmatprep.subr.bf16.mxu1 %v5541_v2  ;;  %4802 = vmatprep.mubr.msk.bf16.mxu0 %vm5542_vm0, %v5541_v2 }
 0x118   : >> { %4830 = vmatprep.mubr.msk.bf16.mxu1 %vm5542_vm0, %v5541_v2 }
 0x119   : >> { %4841 = vmatpush3.bf16.msra.mxu0 %v5359_v22 }
 0x11a   : >> { %4869 = vmatpush3.bf16.msra.mxu1 %v5360_v23  ;;  %4842 = vmatprep.subr.bf16.mxu0 %v5541_v2 }
 0x11b   : >> { %4870 = vmatprep.subr.bf16.mxu1 %v5541_v2 }
 0x11c   : >> { %4803 = vmatmul.mubr.bf16.gmra.mrb[68].mxu0 %v1594_v41  ;;  %v2287_v41 = vpack.c.bf16 %v6030_v17, %v6015_v21  ;;  %v5387_v21 = vld [vmem:[#allocation3 + $0x408] sm:$0xff]   ;;  %v6127_v17 = vld [vmem:[%s5683_s27 + $0x4c] sm:$0xff] }
 0x11d   : >> { %4843 = vmatpush3.bf16.msra.mxu0 %v5361_v28  ;;  %4831 = vmatmul.mubr.bf16.gmra.mrb[68].mxu1 %v1733_v30  ;;  %v5385_v28 = vld [vmem:[#allocation3 + $0x400] sm:$0xff]   ;;  %v2149_v11 = vpack.c.bf16 %v6127_v17, %v5976_v59  ;;  %v5390_v59 = vld [vmem:[#allocation3 + $0x450] sm:$0xff]  }
 0x11e   : >> { %4871 = vmatpush3.bf16.msra.mxu1 %v5362_v31  ;;  %4844 = vmatprep.subr.bf16.mxu0 %v5541_v2 }
 0x11f   : >> { %4872 = vmatprep.subr.bf16.mxu1 %v5541_v2  ;;  %4850 = vmatprep.mubr.msk.bf16.mxu0 %vm5542_vm0, %v5541_v2 }
 0x120   : >> { %4878 = vmatprep.mubr.msk.bf16.mxu1 %vm5542_vm0, %v5541_v2 }
 0x121   : >> { %4845 = vmatpush3.bf16.msra.mxu0 %v5363_v32  ;;  %v5386_v32 = vld [vmem:[#allocation3 + $0x440] sm:$0xff]  }
 0x122   : >> { %4873 = vmatpush3.bf16.msra.mxu1 %v5364_v34  ;;  %4846 = vmatprep.subr.bf16.mxu0 %v5541_v2 }
 0x123   : >> { %4874 = vmatprep.subr.bf16.mxu1 %v5541_v2 }
 0x125   : >> { %4847 = vmatpush3.bf16.msra.mxu0 %v5365_v35 }
 0x126   : >> { %4875 = vmatpush3.bf16.msra.mxu1 %v5366_v36  ;;  %4848 = vmatprep.subr.bf16.mxu0 %v5541_v2 }
 0x127   : >> { %4876 = vmatprep.subr.bf16.mxu1 %v5541_v2 }
 0x129   : >> { %4849 = vmatpush3.bf16.msra.mxu0 %v5367_v38 }
 0x12a   : >> { %4877 = vmatpush3.bf16.msra.mxu1 %v5368_v43  ;;  %4890 = vmatprep.subr.bf16.mxu0 %v5541_v2  ;;  %v5388_v43 = vld [vmem:[#allocation3 + $0x448] sm:$0xff]  }
 0x12b   : >> { %4918 = vmatprep.subr.bf16.mxu1 %v5541_v2 }
 0x12c   : >> { %4851 = vmatmul.mubr.bf16.vlgmr.msra.gmra.mrb[72].mxu0 %v1870_v44  ;;  %v2010_v44 = vpack.c.bf16 %v6000_v19, %v5972_v18  ;;  %v1872_v18 = vpack.c.bf16 %v6086_v54, %v6083_v24 }
 0x12d   : >> { %4879 = vmatmul.mubr.bf16.vlgmr.msra.gmra.mrb[72].mxu1 %v2009_v45  ;;  %4891 = vmatpush3.bf16.msra.mxu0 %v5369_v46  ;;  %v6131_v45 = vld [vmem:[%s5683_s27 + $0x60] sm:$0xff] }
 0x12e   : >> { %4919 = vmatpush3.bf16.msra.mxu1 %v5370_v52  ;;  %4892 = vmatprep.subr.bf16.mxu0 %v5541_v2  ;;  %v5389_v52 = vld [vmem:[#allocation3 + $0x410] sm:$0xff]  }
 0x12f   : >> { %4920 = vmatprep.subr.bf16.mxu1 %v5541_v2  ;;  %4854 = vmatprep.mubr.msk.bf16.mxu0 %vm5542_vm0, %v5541_v2 }
 0x130   : >> { %4882 = vmatprep.mubr.msk.bf16.mxu1 %vm5542_vm0, %v5541_v2 }
 0x131   : >> { %4893 = vmatpush3.bf16.msra.mxu0 %v5371_v53 }
 0x132   : >> { %4921 = vmatpush3.bf16.msra.mxu1 %v5372_v49  ;;  %4894 = vmatprep.subr.bf16.mxu0 %v5541_v2 }
 0x133   : >> { %4922 = vmatprep.subr.bf16.mxu1 %v5541_v2 }
 0x134   : >> { %4855 = vmatmul.mubr.bf16.gmra.mrb[76].mxu0 %v1871_v37  ;;  %v2288_v37 = vpack.c.bf16 %v6131_v45, %v6033_v58  ;;  %v5392_v58 = vld [vmem:[#allocation3 + $0x458] sm:$0xff]  }
 0x135   : >> { %4895 = vmatpush3.bf16.msra.mxu0 %v5373_v39  ;;  %4883 = vmatmul.mubr.bf16.gmra.mrb[76].mxu1 %v2010_v44 }
 0x136   : >> { %4923 = vmatpush3.bf16.msra.mxu1 %v5374_v48  ;;  %4896 = vmatprep.subr.bf16.mxu0 %v5541_v2 }
 0x137   : >> { %4924 = vmatprep.subr.bf16.mxu1 %v5541_v2  ;;  %4858 = vmatprep.mubr.msk.bf16.mxu0 %vm5542_vm0, %v5541_v2 }
 0x138   : >> { %4886 = vmatprep.mubr.msk.bf16.mxu1 %vm5542_vm0, %v5541_v2 }
 0x139   : >> { %4897 = vmatpush3.bf16.msra.mxu0 %v5375_v50 }
 0x13a   : >> { %4925 = vmatpush3.bf16.msra.mxu1 %v5376_v55  ;;  %4898 = vmatprep.subr.bf16.mxu0 %v5541_v2  ;;  %v5391_v55 = vld [vmem:[#allocation3 + $0x418] sm:$0xff]  }
 0x13b   : >> { %4926 = vmatprep.subr.bf16.mxu1 %v5541_v2 }
 0x13c   : >> { %4859 = vmatmul.mubr.bf16.gmra.mrb[80].mxu0 %v1872_v18  ;;  %v6147_v18 = vld [vmem:[%s5683_s27 + $0x54] sm:$0xff] }
 0x13d   : >> { %4899 = vmatpush3.bf16.msra.mxu0 %v5377_v42  ;;  %4887 = vmatmul.mubr.bf16.gmra.mrb[80].mxu1 %v2011_v57  ;;  %v6150_v42 = vld [vmem:[%s5683_s27 + $0x5c] sm:$0xff]  ;;  %v6154_v57 = vld [vmem:[%s5683_s27 + $0x68] sm:$0xff] }
 0x13e   : >> { %4927 = vmatpush3.bf16.msra.mxu1 %v5378_v60  ;;  %4900 = vmatprep.subr.bf16.mxu0 %v5541_v2  ;;  %v6157_v60 = vld [vmem:[%s5683_s27 + $0x70] sm:$0xff] }
 0x13f   : >> { %v344_v63 = vpop.f32.mrb[0].mxu0  ;;  %4928 = vmatprep.subr.bf16.mxu1 %v5541_v2  ;;  %4906 = vmatprep.mubr.msk.bf16.mxu0 %vm5542_vm0, %v5541_v2 }
 0x140   : >> { %v449_v1 = vpop.f32.mrb[0].mxu1  ;;  %v4516_v3 = vpop.f32.mrb[1].mxu0  ;;  %4934 = vmatprep.mubr.msk.bf16.mxu1 %vm5542_vm0, %v5541_v2 }
 0x141   : >> { %v6109_v4 = vadd.f32 %v449_v1, %v344_v63  ;;  %v4544_v6 = vpop.f32.mrb[1].mxu1  ;;  %v347_v9 = vpop.f32.mrb[2].mxu0  ;;  %4901 = vmatpush3.bf16.msra.mxu0 %v5379_v61  ;;  %v2150_v61 = vpack.c.bf16 %v6150_v42, %v6147_v18  ;;  %v2289_v63 = vpack.c.bf16 %v6157_v60, %v6154_v57  ;;  %v5394_v1 = vld [vmem:[#allocation3 + $0x460] sm:$0xff]   ;;  %v5395_v3 = vld [vmem:[#allocation3 + $0x428] sm:$0xff]  }
 0x142   : >> { %v452_v14 = vpop.f32.mrb[2].mxu1  ;;  %4929 = vmatpush3.bf16.msra.mxu1 %v5380_v62  ;;  %4902 = vmatprep.subr.bf16.mxu0 %v5541_v2  ;;  %v4517_v27 = vpop.f32.mrb[3].mxu0  ;;  %v5393_v62 = vld [vmem:[#allocation3 + $0x420] sm:$0xff]   ;;  %v5396_v6 = vld [vmem:[#allocation3 + $0x468] sm:$0xff]  }
 0x143   : >> { %v6112_v16 = vadd.f32 %v452_v14, %v347_v9  ;;  %v4545_v7 = vpop.f32.mrb[3].mxu1  ;;  %4930 = vmatprep.subr.bf16.mxu1 %v5541_v2 }
 0x145   : >> { %4903 = vmatpush3.bf16.msra.mxu0 %v5381_v12 }
 0x146   : >> { %4931 = vmatpush3.bf16.msra.mxu1 %v5382_v26  ;;  %4904 = vmatprep.subr.bf16.mxu0 %v5541_v2 }
 0x147   : >> { %4932 = vmatprep.subr.bf16.mxu1 %v5541_v2  ;;  %v352_v20 = vpop.f32.mrb[4].mxu0 }
 0x148   : >> { %v457_v22 = vpop.f32.mrb[4].mxu1  ;;  %v4520_v23 = vpop.f32.mrb[5].mxu0 }
 0x149   : >> { %4905 = vmatpush3.bf16.msra.mxu0 %v5383_v8  ;;  %v4548_v30 = vpop.f32.mrb[5].mxu1  ;;  %v355_v31 = vpop.f32.mrb[6].mxu0  ;;  %v5397_v8 = vld [vmem:[#allocation3 + $0x430] sm:$0xff]  }
 0x14a   : >> { %4933 = vmatpush3.bf16.msra.mxu1 %v5384_v10  ;;  %4946 = vmatprep.subr.bf16.mxu0 %v5541_v2  ;;  %v460_v34 = vpop.f32.mrb[6].mxu1  ;;  %v4521_v35 = vpop.f32.mrb[7].mxu0  ;;  %v5398_v23 = vld [vmem:[#allocation3 + $0x470] sm:$0xff]   ;;  %v5399_v30 = vld [vmem:[#allocation3 + $0x438] sm:$0xff]  }
 0x14b   : >> { %4974 = vmatprep.subr.bf16.mxu1 %v5541_v2  ;;  %v6121_v36 = vadd.f32 %v460_v34, %v355_v31  ;;  %v4549_v38 = vpop.f32.mrb[7].mxu1  ;;  %v5400_v31 = vld [vmem:[#allocation3 + $0x478] sm:$0xff]  }
 0x14c   : >> { %4907 = vmatmul.mubr.bf16.vlgmr.msra.gmra.mrb[84].mxu0 %v2148_v15 }
 0x14d   : >> { %4935 = vmatmul.mubr.bf16.vlgmr.msra.gmra.mrb[84].mxu1 %v2287_v41  ;;  %4947 = vmatpush3.bf16.msra.mxu0 %v5385_v28 }
 0x14e   : >> { %4975 = vmatpush3.bf16.msra.mxu1 %v5386_v32  ;;  %4948 = vmatprep.subr.bf16.mxu0 %v5541_v2 }
 0x14f   : >> { %4976 = vmatprep.subr.bf16.mxu1 %v5541_v2  ;;  %4910 = vmatprep.mubr.msk.bf16.mxu0 %vm5542_vm0, %v5541_v2  ;;  %v360_v46 = vpop.f32.mrb[8].mxu0 }
 0x150   : >> { %v465_v13 = vpop.f32.mrb[8].mxu1  ;;  %4938 = vmatprep.mubr.msk.bf16.mxu1 %vm5542_vm0, %v5541_v2  ;;  %v4524_v15 = vpop.f32.mrb[9].mxu0 }
 0x151   : >> { %4949 = vmatpush3.bf16.msra.mxu0 %v5387_v21  ;;  %v6140_v53 = vadd.f32 %v465_v13, %v360_v46  ;;  %v4552_v49 = vpop.f32.mrb[9].mxu1  ;;  %v363_v39 = vpop.f32.mrb[10].mxu0  ;;  %v2565_v21 = vpack.c.bf16 %v6083_v24, %v6068_v47  ;;  %v5402_v13 = vld [vmem:[#allocation3 + $0x4c0] sm:$0xff]   ;;  %v5403_v47 = vld [vmem:[#allocation3 + $0x488] sm:$0xff]  }
 0x152   : >> { %4977 = vmatpush3.bf16.msra.mxu1 %v5388_v43  ;;  %4950 = vmatprep.subr.bf16.mxu0 %v5541_v2  ;;  %v468_v44 = vpop.f32.mrb[10].mxu1  ;;  %v4525_v48 = vpop.f32.mrb[11].mxu0  ;;  %v5401_v43 = vld [vmem:[#allocation3 + $0x480] sm:$0xff]   ;;  %v6197_v24 = vld [vmem:[%s5683_s27 + $0x61] sm:$0xff] }
 0x153   : >> { %4978 = vmatprep.subr.bf16.mxu1 %v5541_v2  ;;  %v4553_v50 = vpop.f32.mrb[11].mxu1 }
 0x154   : >> { %4911 = vmatmul.mubr.bf16.gmra.mrb[88].mxu0 %v2149_v11  ;;  %v5405_v50 = vld [vmem:[#allocation3 + $0x490] sm:$0xff]  }
 0x155   : >> { %4951 = vmatpush3.bf16.msra.mxu0 %v5389_v52  ;;  %4939 = vmatmul.mubr.bf16.gmra.mrb[88].mxu1 %v2288_v37  ;;  %v6201_v37 = vld [vmem:[%s5683_s27 + $0x62] sm:$0xff] }
 0x156   : >> { %4979 = vmatpush3.bf16.msra.mxu1 %v5390_v59  ;;  %4952 = vmatprep.subr.bf16.mxu0 %v5541_v2  ;;  %v2427_v59 = vpack.c.bf16 %v6197_v24, %v6036_v25  ;;  %v5406_v25 = vld [vmem:[#allocation3 + $0x4d0] sm:$0xff]  }
 0x157   : >> { %4980 = vmatprep.subr.bf16.mxu1 %v5541_v2  ;;  %4914 = vmatprep.mubr.msk.bf16.mxu0 %vm5542_vm0, %v5541_v2 }
 0x158   : >> { %4942 = vmatprep.mubr.msk.bf16.mxu1 %vm5542_vm0, %v5541_v2 }
 0x159   : >> { %4953 = vmatpush3.bf16.msra.mxu0 %v5391_v55  ;;  %v2566_v55 = vpack.c.bf16 %v6201_v37, %v6086_v54  ;;  %v6221_v54 = vld [vmem:[%s5683_s27 + $0x71] sm:$0xff] }
 0x15a   : >> { %4981 = vmatpush3.bf16.msra.mxu1 %v5392_v58  ;;  %4954 = vmatprep.subr.bf16.mxu0 %v5541_v2 }
 0x15b   : >> { %4982 = vmatprep.subr.bf16.mxu1 %v5541_v2 }
 0x15c   : >> { %4915 = vmatmul.mubr.bf16.gmra.mrb[92].mxu0 %v2150_v61 }
 0x15d   : >> { %4955 = vmatpush3.bf16.msra.mxu0 %v5393_v62  ;;  %4943 = vmatmul.mubr.bf16.gmra.mrb[92].mxu1 %v2289_v63  ;;  %v5407_v63 = vld [vmem:[#allocation3 + $0x498] sm:$0xff]  }
 0x15e   : >> { %4983 = vmatpush3.bf16.msra.mxu1 %v5394_v1  ;;  %4956 = vmatprep.subr.bf16.mxu0 %v5541_v2  ;;  %v6218_v1 = vld [vmem:[%s5683_s27 + $0x69] sm:$0xff] }
 0x15f   : >> { %v582_v9 = vpop.f32.mrb[12].mxu0  ;;  %4984 = vmatprep.subr.bf16.mxu1 %v5541_v2  ;;  %4962 = vmatprep.mubr.msk.bf16.mxu0 %vm5542_vm0, %v5541_v2 }
 0x160   : >> { %v605_v12 = vadd.f32 %v582_v9, %v6109_v4  ;;  %v721_v14 = vpop.f32.mrb[12].mxu1  ;;  %v4572_v26 = vpop.f32.mrb[13].mxu0  ;;  %4990 = vmatprep.mubr.msk.bf16.mxu1 %vm5542_vm0, %v5541_v2  ;;  %v6228_v9 = vld [vmem:[%s5683_s27 + $0x72] sm:$0xff] }
 0x161   : >> { %v4600_v27 = vpop.f32.mrb[13].mxu1  ;;  %v585_v7 = vpop.f32.mrb[14].mxu0  ;;  %4957 = vmatpush3.bf16.msra.mxu0 %v5395_v3  ;;  %v5408_v3 = vld [vmem:[#allocation3 + $0x4d8] sm:$0xff]  }
 0x162   : >> { %v6177_v10 = vadd.f32 %v721_v14, %v605_v12  ;;  %v606_v20 = vadd.f32 %v585_v7, %v6112_v16  ;;  %v724_v22 = vpop.f32.mrb[14].mxu1  ;;  %4985 = vmatpush3.bf16.msra.mxu1 %v5396_v6  ;;  %4958 = vmatprep.subr.bf16.mxu0 %v5541_v2  ;;  %v4573_v41 = vpop.f32.mrb[15].mxu0  ;;  %v6225_v6 = vld [vmem:[%s5683_s27 + $0x6a] sm:$0xff]  ;;  %v2428_v12 = vpack.c.bf16 %v6221_v54, %v6218_v1  ;;  %v5409_v14 = vld [vmem:[#allocation3 + $0x4a0] sm:$0xff]   ;;  %v5411_v7 = vld [vmem:[#allocation3 + $0x4a8] sm:$0xff]  }
 0x163   : >> { %v4601_v4 = vpop.f32.mrb[15].mxu1  ;;  %4986 = vmatprep.subr.bf16.mxu1 %v5541_v2  ;;  %v2567_v26 = vpack.c.bf16 %v6228_v9, %v6225_v6  ;;  %v5410_v27 = vld [vmem:[#allocation3 + $0x4e0] sm:$0xff]  }
 0x164   : >> { %v6182_v28 = vadd.f32 %v724_v22, %v606_v20 }
 0x165   : >> { %4959 = vmatpush3.bf16.msra.mxu0 %v5397_v8  ;;  %v5412_v8 = vld [vmem:[#allocation3 + $0x4e8] sm:$0xff]  }
 0x166   : >> { %4987 = vmatpush3.bf16.msra.mxu1 %v5398_v23  ;;  %4960 = vmatprep.subr.bf16.mxu0 %v5541_v2 }
 0x167   : >> { %v590_v32 = vpop.f32.mrb[16].mxu0  ;;  %4988 = vmatprep.subr.bf16.mxu1 %v5541_v2 }
 0x168   : >> { %v4576_v16 = vpop.f32.mrb[17].mxu0  ;;  %v729_v34 = vpop.f32.mrb[16].mxu1 }
 0x169   : >> { %v593_v35 = vpop.f32.mrb[18].mxu0  ;;  %4961 = vmatpush3.bf16.msra.mxu0 %v5399_v30  ;;  %v4604_v38 = vpop.f32.mrb[17].mxu1 }
 0x16a   : >> { %v608_v46 = vadd.f32 %v593_v35, %v6121_v36  ;;  %4989 = vmatpush3.bf16.msra.mxu1 %v5400_v31  ;;  %v732_v11 = vpop.f32.mrb[18].mxu1  ;;  %5002 = vmatprep.subr.bf16.mxu0 %v5541_v2  ;;  %v4577_v15 = vpop.f32.mrb[19].mxu0  ;;  %v5404_v36 = vld [vmem:[#allocation3 + $0x4c8] sm:$0xff]   ;;  %v5413_v31 = vld [vmem:[#allocation3 + $0x4b0] sm:$0xff]  }
 0x16b   : >> { %5030 = vmatprep.subr.bf16.mxu1 %v5541_v2  ;;  %v4605_v52 = vpop.f32.mrb[19].mxu1  ;;  %v5414_v35 = vld [vmem:[#allocation3 + $0x4f0] sm:$0xff]  }
 0x16c   : >> { %v6191_v49 = vadd.f32 %v732_v11, %v608_v46  ;;  %4963 = vmatmul.mubr.bf16.vlgmr.msra.gmra.mrb[96].mxu0 %v2426_v51  ;;  %v5416_v46 = vld [vmem:[#allocation3 + $0x4f8] sm:$0xff]  }
 0x16d   : >> { %4991 = vmatmul.mubr.bf16.vlgmr.msra.gmra.mrb[96].mxu1 %v2565_v21  ;;  %5003 = vmatpush3.bf16.msra.mxu0 %v5401_v43  ;;  %v5415_v43 = vld [vmem:[#allocation3 + $0x4b8] sm:$0xff]  }
 0x16e   : >> { %5031 = vmatpush3.bf16.msra.mxu1 %v5402_v13  ;;  %5004 = vmatprep.subr.bf16.mxu0 %v5541_v2 }
 0x16f   : >> { %v598_v39 = vpop.f32.mrb[20].mxu0  ;;  %5032 = vmatprep.subr.bf16.mxu1 %v5541_v2  ;;  %4966 = vmatprep.mubr.msk.bf16.mxu0 %vm5542_vm0, %v5541_v2 }
 0x170   : >> { %v609_v33 = vadd.f32 %v598_v39, %v6140_v53  ;;  %v4580_v40 = vpop.f32.mrb[21].mxu0  ;;  %v737_v51 = vpop.f32.mrb[20].mxu1  ;;  %4994 = vmatprep.mubr.msk.bf16.mxu1 %vm5542_vm0, %v5541_v2 }
 0x171   : >> { %v601_v44 = vpop.f32.mrb[22].mxu0  ;;  %5005 = vmatpush3.bf16.msra.mxu0 %v5403_v47  ;;  %v4608_v48 = vpop.f32.mrb[21].mxu1  ;;  %v2843_v47 = vpack.c.bf16 %v6147_v18, %v6127_v17  ;;  %v5418_v40 = vld [vmem:[#allocation3 + $0x540] sm:$0xff]   ;;  %v5419_v17 = vld [vmem:[#allocation3 + $0x508] sm:$0xff]  }
 0x172   : >> { %v6213_v58 = vadd.f32 %v737_v51, %v609_v33  ;;  %5033 = vmatpush3.bf16.msra.mxu1 %v5404_v36  ;;  %v740_v53 = vpop.f32.mrb[22].mxu1  ;;  %5006 = vmatprep.subr.bf16.mxu0 %v5541_v2  ;;  %v4581_v61 = vpop.f32.mrb[23].mxu0  ;;  %v5417_v36 = vld [vmem:[#allocation3 + $0x500] sm:$0xff]   ;;  %v6268_v18 = vld [vmem:[%s5683_s27 + $0x63] sm:$0xff] }
 0x173   : >> { %5034 = vmatprep.subr.bf16.mxu1 %v5541_v2  ;;  %v4609_v62 = vpop.f32.mrb[23].mxu1  ;;  %v6272_v48 = vld [vmem:[%s5683_s27 + $0x64] sm:$0xff] }
 0x174   : >> { %4967 = vmatmul.mubr.bf16.gmra.mrb[100].mxu0 %v2427_v59  ;;  %v5421_v61 = vld [vmem:[#allocation3 + $0x510] sm:$0xff]   ;;  %v2844_v62 = vpack.c.bf16 %v6272_v48, %v6150_v42  ;;  %v6292_v42 = vld [vmem:[%s5683_s27 + $0x73] sm:$0xff] }
 0x175   : >> { %5007 = vmatpush3.bf16.msra.mxu0 %v5405_v50  ;;  %4995 = vmatmul.mubr.bf16.gmra.mrb[100].mxu1 %v2566_v55  ;;  %v2705_v55 = vpack.c.bf16 %v6268_v18, %v6090_v56  ;;  %v5422_v56 = vld [vmem:[#allocation3 + $0x550] sm:$0xff]  }
 0x176   : >> { %5035 = vmatpush3.bf16.msra.mxu1 %v5406_v25  ;;  %5008 = vmatprep.subr.bf16.mxu0 %v5541_v2 }
 0x177   : >> { %5036 = vmatprep.subr.bf16.mxu1 %v5541_v2  ;;  %4970 = vmatprep.mubr.msk.bf16.mxu0 %vm5542_vm0, %v5541_v2 }
 0x178   : >> { %4998 = vmatprep.mubr.msk.bf16.mxu1 %vm5542_vm0, %v5541_v2 }
 0x179   : >> { %5009 = vmatpush3.bf16.msra.mxu0 %v5407_v63 }
 0x17a   : >> { %5037 = vmatpush3.bf16.msra.mxu1 %v5408_v3  ;;  %5010 = vmatprep.subr.bf16.mxu0 %v5541_v2 }
 0x17b   : >> { %5038 = vmatprep.subr.bf16.mxu1 %v5541_v2 }
 0x17c   : >> { %4971 = vmatmul.mubr.bf16.gmra.mrb[104].mxu0 %v2428_v12 }
 0x17d   : >> { %5011 = vmatpush3.bf16.msra.mxu0 %v5409_v14  ;;  %4999 = vmatmul.mubr.bf16.gmra.mrb[104].mxu1 %v2567_v26  ;;  %v5423_v14 = vld [vmem:[#allocation3 + $0x518] sm:$0xff]  }
 0x17e   : >> { %5039 = vmatpush3.bf16.msra.mxu1 %v5410_v27  ;;  %5012 = vmatprep.subr.bf16.mxu0 %v5541_v2  ;;  %v6289_v26 = vld [vmem:[%s5683_s27 + $0x6b] sm:$0xff] }
 0x17f   : >> { %v860_v20 = vpop.f32.mrb[24].mxu0  ;;  %5040 = vmatprep.subr.bf16.mxu1 %v5541_v2  ;;  %5018 = vmatprep.mubr.msk.bf16.mxu0 %vm5542_vm0, %v5541_v2  ;;  %v5424_v27 = vld [vmem:[#allocation3 + $0x558] sm:$0xff]  }
 0x180   : >> { %v883_v22 = vadd.f32 %v860_v20, %v6177_v10  ;;  %v999_v23 = vpop.f32.mrb[24].mxu1  ;;  %v4628_v41 = vpop.f32.mrb[25].mxu0  ;;  %5046 = vmatprep.mubr.msk.bf16.mxu1 %vm5542_vm0, %v5541_v2  ;;  %v2706_v20 = vpack.c.bf16 %v6292_v42, %v6289_v26 }
 0x181   : >> { %v4656_v4 = vpop.f32.mrb[25].mxu1  ;;  %v863_v30 = vpop.f32.mrb[26].mxu0  ;;  %5013 = vmatpush3.bf16.msra.mxu0 %v5411_v7  ;;  %v6296_v7 = vld [vmem:[%s5683_s27 + $0x6c] sm:$0xff]  ;;  %v5426_v41 = vld [vmem:[#allocation3 + $0x560] sm:$0xff]  }
 0x182   : >> { %v6248_v32 = vadd.f32 %v999_v23, %v883_v22  ;;  %v884_v16 = vadd.f32 %v863_v30, %v6182_v28  ;;  %v1002_v34 = vpop.f32.mrb[26].mxu1  ;;  %5041 = vmatpush3.bf16.msra.mxu1 %v5412_v8  ;;  %5014 = vmatprep.subr.bf16.mxu0 %v5541_v2  ;;  %v4629_v38 = vpop.f32.mrb[27].mxu0  ;;  %v6299_v8 = vld [vmem:[%s5683_s27 + $0x74] sm:$0xff]  ;;  %v5427_v4 = vld [vmem:[#allocation3 + $0x528] sm:$0xff]  }
 0x183   : >> { %v4657_v10 = vpop.f32.mrb[27].mxu1  ;;  %5042 = vmatprep.subr.bf16.mxu1 %v5541_v2  ;;  %v5425_v22 = vld [vmem:[#allocation3 + $0x520] sm:$0xff]   ;;  %v2845_v23 = vpack.c.bf16 %v6299_v8, %v6296_v7  ;;  %v5428_v30 = vld [vmem:[#allocation3 + $0x568] sm:$0xff]  }
 0x184   : >> { %v6253_v21 = vadd.f32 %v1002_v34, %v884_v16 }
 0x185   : >> { %5015 = vmatpush3.bf16.msra.mxu0 %v5413_v31 }
 0x186   : >> { %5043 = vmatpush3.bf16.msra.mxu1 %v5414_v35  ;;  %5016 = vmatprep.subr.bf16.mxu0 %v5541_v2 }
 0x187   : >> { %v868_v11 = vpop.f32.mrb[28].mxu0  ;;  %5044 = vmatprep.subr.bf16.mxu1 %v5541_v2 }
 0x188   : >> { %v4632_v28 = vpop.f32.mrb[29].mxu0  ;;  %v1007_v13 = vpop.f32.mrb[28].mxu1 }
 0x189   : >> { %v871_v15 = vpop.f32.mrb[30].mxu0  ;;  %5017 = vmatpush3.bf16.msra.mxu0 %v5415_v43  ;;  %v4660_v52 = vpop.f32.mrb[29].mxu1  ;;  %v5429_v43 = vld [vmem:[#allocation3 + $0x530] sm:$0xff]  }
 0x18a   : >> { %v886_v39 = vadd.f32 %v871_v15, %v6191_v49  ;;  %5045 = vmatpush3.bf16.msra.mxu1 %v5416_v46  ;;  %v1010_v33 = vpop.f32.mrb[30].mxu1  ;;  %5058 = vmatprep.subr.bf16.mxu0 %v5541_v2  ;;  %v4633_v51 = vpop.f32.mrb[31].mxu0  ;;  %v5420_v49 = vld [vmem:[#allocation3 + $0x548] sm:$0xff]   ;;  %v5430_v13 = vld [vmem:[#allocation3 + $0x570] sm:$0xff]  }
 0x18b   : >> { %5086 = vmatprep.subr.bf16.mxu1 %v5541_v2  ;;  %v4661_v59 = vpop.f32.mrb[31].mxu1 }
 0x18c   : >> { %v6262_v44 = vadd.f32 %v1010_v33, %v886_v39  ;;  %5019 = vmatmul.mubr.bf16.vlgmr.msra.gmra.mrb[108].mxu0 %v2704_v29 }
 0x18d   : >> { %5047 = vmatmul.mubr.bf16.vlgmr.msra.gmra.mrb[108].mxu1 %v2843_v47  ;;  %5059 = vmatpush3.bf16.msra.mxu0 %v5417_v36  ;;  %v5431_v47 = vld [vmem:[#allocation3 + $0x538] sm:$0xff]  }
 0x18e   : >> { %5087 = vmatpush3.bf16.msra.mxu1 %v5418_v40  ;;  %5060 = vmatprep.subr.bf16.mxu0 %v5541_v2  ;;  %v5432_v36 = vld [vmem:[#allocation3 + $0x578] sm:$0xff]   ;;  %v2982_v40 = vpack.c.bf16 %v6154_v57, %v6131_v45 }
 0x18f   : >> { %v876_v50 = vpop.f32.mrb[32].mxu0  ;;  %5088 = vmatprep.subr.bf16.mxu1 %v5541_v2  ;;  %5022 = vmatprep.mubr.msk.bf16.mxu0 %vm5542_vm0, %v5541_v2 }
 0x190   : >> { %v887_v19 = vadd.f32 %v876_v50, %v6213_v58  ;;  %v4636_v5 = vpop.f32.mrb[33].mxu0  ;;  %v1015_v29 = vpop.f32.mrb[32].mxu1  ;;  %5050 = vmatprep.mubr.msk.bf16.mxu1 %vm5542_vm0, %v5541_v2 }
 0x191   : >> { %v879_v53 = vpop.f32.mrb[34].mxu0  ;;  %5061 = vmatpush3.bf16.msra.mxu0 %v5419_v17  ;;  %v4664_v25 = vpop.f32.mrb[33].mxu1  ;;  %v3121_v17 = vpack.c.bf16 %v6218_v1, %v6197_v24  ;;  %v5434_v5 = vld [vmem:[#allocation3 + $0x5c0] sm:$0xff]   ;;  %v5436_v1 = vld [vmem:[#allocation3 + $0x5c8] sm:$0xff]  }
 0x192   : >> { %v6284_v63 = vadd.f32 %v1015_v29, %v887_v19  ;;  %5089 = vmatpush3.bf16.msra.mxu1 %v5420_v49  ;;  %v1018_v58 = vpop.f32.mrb[34].mxu1  ;;  %5062 = vmatprep.subr.bf16.mxu0 %v5541_v2  ;;  %v4637_v3 = vpop.f32.mrb[35].mxu0  ;;  %v5433_v49 = vld [vmem:[#allocation3 + $0x580] sm:$0xff]  }
 0x193   : >> { %5090 = vmatprep.subr.bf16.mxu1 %v5541_v2  ;;  %v4665_v12 = vpop.f32.mrb[35].mxu1  ;;  %v4152_v24 = vld [vmem:[%s5683_s27 + $0x78] sm:$0xff] }
 0x194   : >> { %5023 = vmatmul.mubr.bf16.gmra.mrb[112].mxu0 %v2705_v55  ;;  %v5435_v55 = vld [vmem:[#allocation3 + $0x588] sm:$0xff]   ;;  %v2983_v58 = vpack.c.bf16 %v4152_v24, %v6157_v60  ;;  %v5437_v12 = vld [vmem:[#allocation3 + $0x590] sm:$0xff]   ;;  %v5449_v24 = vld [vmem:[#allocation3 + $0x600] sm:$0xff]  }
 0x195   : >> { %5063 = vmatpush3.bf16.msra.mxu0 %v5421_v61  ;;  %5051 = vmatmul.mubr.bf16.gmra.mrb[112].mxu1 %v2844_v62  ;;  %v5438_v60 = vld [vmem:[#allocation3 + $0x5d0] sm:$0xff]  }
 0x196   : >> { %5091 = vmatpush3.bf16.msra.mxu1 %v5422_v56  ;;  %5064 = vmatprep.subr.bf16.mxu0 %v5541_v2 }
 0x197   : >> { %5092 = vmatprep.subr.bf16.mxu1 %v5541_v2  ;;  %5026 = vmatprep.mubr.msk.bf16.mxu0 %vm5542_vm0, %v5541_v2 }
 0x198   : >> { %5054 = vmatprep.mubr.msk.bf16.mxu1 %vm5542_vm0, %v5541_v2 }
 0x199   : >> { %5065 = vmatpush3.bf16.msra.mxu0 %v5423_v14 }
 0x19a   : >> { %5093 = vmatpush3.bf16.msra.mxu1 %v5424_v27  ;;  %5066 = vmatprep.subr.bf16.mxu0 %v5541_v2 }
 0x19b   : >> { %5094 = vmatprep.subr.bf16.mxu1 %v5541_v2 }
 0x19c   : >> { %5027 = vmatmul.mubr.bf16.gmra.mrb[116].mxu0 %v2706_v20 }
 0x19d   : >> { %5067 = vmatpush3.bf16.msra.mxu0 %v5425_v22  ;;  %5055 = vmatmul.mubr.bf16.gmra.mrb[116].mxu1 %v2845_v23  ;;  %v5439_v23 = vld [vmem:[#allocation3 + $0x598] sm:$0xff]  }
 0x19e   : >> { %5095 = vmatpush3.bf16.msra.mxu1 %v5426_v41  ;;  %5068 = vmatprep.subr.bf16.mxu0 %v5541_v2  ;;  %v4153_v41 = vld [vmem:[%s5683_s27 + $0x80] sm:$0xff] }
 0x19f   : >> { %v1138_v31 = vpop.f32.mrb[36].mxu0  ;;  %5096 = vmatprep.subr.bf16.mxu1 %v5541_v2  ;;  %5074 = vmatprep.mubr.msk.bf16.mxu0 %vm5542_vm0, %v5541_v2 }
 0x1a0   : >> { %v1161_v16 = vadd.f32 %v1138_v31, %v6248_v32  ;;  %v1277_v34 = vpop.f32.mrb[36].mxu1  ;;  %v4684_v35 = vpop.f32.mrb[37].mxu0  ;;  %5102 = vmatprep.mubr.msk.bf16.mxu1 %vm5542_vm0, %v5541_v2  ;;  %v4168_v31 = vld [vmem:[%s5683_s27 + $0x89] sm:$0xff] }
 0x1a1   : >> { %v4712_v38 = vpop.f32.mrb[37].mxu1  ;;  %v1141_v10 = vpop.f32.mrb[38].mxu0  ;;  %5069 = vmatpush3.bf16.msra.mxu0 %v5427_v4  ;;  %v4154_v4 = vld [vmem:[%s5683_s27 + $0x88] sm:$0xff] }
 0x1a2   : >> { %v6319_v46 = vadd.f32 %v1277_v34, %v1161_v16  ;;  %v1162_v11 = vadd.f32 %v1141_v10, %v6253_v21  ;;  %v1280_v28 = vpop.f32.mrb[38].mxu1  ;;  %5097 = vmatpush3.bf16.msra.mxu1 %v5428_v30  ;;  %5070 = vmatprep.subr.bf16.mxu0 %v5541_v2  ;;  %v4685_v15 = vpop.f32.mrb[39].mxu0  ;;  %v4167_v30 = vld [vmem:[%s5683_s27 + $0x81] sm:$0xff]  ;;  %v2984_v16 = vpack.c.bf16 %v4154_v4, %v4153_v41  ;;  %v5441_v34 = vld [vmem:[#allocation3 + $0x5a0] sm:$0xff]   ;;  %v4182_v41 = vld [vmem:[%s5683_s27 + $0x8a] sm:$0xff] }
 0x1a3   : >> { %v4713_v32 = vpop.f32.mrb[39].mxu1  ;;  %5098 = vmatprep.subr.bf16.mxu1 %v5541_v2  ;;  %v3123_v35 = vpack.c.bf16 %v4168_v31, %v4167_v30  ;;  %v5442_v38 = vld [vmem:[#allocation3 + $0x5e0] sm:$0xff]   ;;  %v5443_v10 = vld [vmem:[#allocation3 + $0x5a8] sm:$0xff]   ;;  %v4196_v4 = vld [vmem:[%s5683_s27 + $0x8b] sm:$0xff] }
 0x1a4   : >> { %v6324_v52 = vadd.f32 %v1280_v28, %v1162_v11  ;;  %v5453_v30 = vld [vmem:[#allocation3 + $0x620] sm:$0xff]  }
 0x1a5   : >> { %5071 = vmatpush3.bf16.msra.mxu0 %v5429_v43  ;;  %v5444_v43 = vld [vmem:[#allocation3 + $0x5e8] sm:$0xff]  }
 0x1a6   : >> { %5099 = vmatpush3.bf16.msra.mxu1 %v5430_v13  ;;  %5072 = vmatprep.subr.bf16.mxu0 %v5541_v2 }
 0x1a7   : >> { %v1146_v39 = vpop.f32.mrb[40].mxu0  ;;  %5100 = vmatprep.subr.bf16.mxu1 %v5541_v2 }
 0x1a8   : >> { %v4688_v21 = vpop.f32.mrb[41].mxu0  ;;  %v1285_v33 = vpop.f32.mrb[40].mxu1 }
 0x1a9   : >> { %v1149_v51 = vpop.f32.mrb[42].mxu0  ;;  %5073 = vmatpush3.bf16.msra.mxu0 %v5431_v47  ;;  %v4716_v59 = vpop.f32.mrb[41].mxu1 }
 0x1aa   : >> { %v1164_v50 = vadd.f32 %v1149_v51, %v6262_v44  ;;  %5101 = vmatpush3.bf16.msra.mxu1 %v5432_v36  ;;  %v1288_v19 = vpop.f32.mrb[42].mxu1  ;;  %5114 = vmatprep.subr.bf16.mxu0 %v5541_v2  ;;  %v4689_v29 = vpop.f32.mrb[43].mxu0  ;;  %v4166_v44 = vld [vmem:[%s5683_s27 + $0x79] sm:$0xff]  ;;  %v5445_v36 = vld [vmem:[#allocation3 + $0x5b0] sm:$0xff]  }
 0x1ab   : >> { %5142 = vmatprep.subr.bf16.mxu1 %v5541_v2  ;;  %v4717_v45 = vpop.f32.mrb[43].mxu1  ;;  %v3122_v14 = vpack.c.bf16 %v4166_v44, %v6221_v54  ;;  %v5440_v54 = vld [vmem:[#allocation3 + $0x5d8] sm:$0xff]  }
 0x1ac   : >> { %v6335_v57 = vadd.f32 %v1288_v19, %v1164_v50  ;;  %5075 = vmatmul.mubr.bf16.vlgmr.msra.gmra.mrb[120].mxu0 %v2982_v40  ;;  %v5446_v40 = vld [vmem:[#allocation3 + $0x5f0] sm:$0xff]  }
 0x1ad   : >> { %5103 = vmatmul.mubr.bf16.vlgmr.msra.gmra.mrb[120].mxu1 %v3121_v17  ;;  %5115 = vmatpush3.bf16.msra.mxu0 %v5433_v49  ;;  %v5447_v17 = vld [vmem:[#allocation3 + $0x5b8] sm:$0xff]  }
 0x1ae   : >> { %5143 = vmatpush3.bf16.msra.mxu1 %v5434_v5  ;;  %5116 = vmatprep.subr.bf16.mxu0 %v5541_v2  ;;  %v5448_v49 = vld [vmem:[#allocation3 + $0x5f8] sm:$0xff]   ;;  %v3260_v5 = vpack.c.bf16 %v6225_v6, %v6201_v37  ;;  %v5450_v6 = vld [vmem:[#allocation3 + $0x608] sm:$0xff]  }
 0x1af   : >> { %v1154_v53 = vpop.f32.mrb[44].mxu0  ;;  %5144 = vmatprep.subr.bf16.mxu1 %v5541_v2  ;;  %5078 = vmatprep.mubr.msk.bf16.mxu0 %vm5542_vm0, %v5541_v2 }
 0x1b0   : >> { %v1165_v25 = vadd.f32 %v1154_v53, %v6284_v63  ;;  %v4692_v61 = vpop.f32.mrb[45].mxu0  ;;  %v1293_v62 = vpop.f32.mrb[44].mxu1  ;;  %5106 = vmatprep.mubr.msk.bf16.mxu1 %vm5542_vm0, %v5541_v2 }
 0x1b1   : >> { %v1157_v56 = vpop.f32.mrb[46].mxu0  ;;  %5117 = vmatpush3.bf16.msra.mxu0 %v5435_v55  ;;  %v4720_v3 = vpop.f32.mrb[45].mxu1  ;;  %v3399_v55 = vpack.c.bf16 %v6289_v26, %v6268_v18  ;;  %v4180_v61 = vld [vmem:[%s5683_s27 + $0x7a] sm:$0xff] }
 0x1b2   : >> { %v6348_v27 = vadd.f32 %v1293_v62, %v1165_v25  ;;  %5145 = vmatpush3.bf16.msra.mxu1 %v5436_v1  ;;  %v1296_v63 = vpop.f32.mrb[46].mxu1  ;;  %5118 = vmatprep.subr.bf16.mxu0 %v5541_v2  ;;  %v4693_v20 = vpop.f32.mrb[47].mxu0  ;;  %v4194_v18 = vld [vmem:[%s5683_s27 + $0x7b] sm:$0xff]  ;;  %v3261_v56 = vpack.c.bf16 %v4180_v61, %v6228_v9 }
 0x1b3   : >> { %5146 = vmatprep.subr.bf16.mxu1 %v5541_v2  ;;  %v4721_v22 = vpop.f32.mrb[47].mxu1  ;;  %v3400_v63 = vpack.c.bf16 %v4194_v18, %v6292_v42  ;;  %v4195_v42 = vld [vmem:[%s5683_s27 + $0x83] sm:$0xff] }
 0x1b4   : >> { %5079 = vmatmul.mubr.bf16.gmra.mrb[124].mxu0 %v2983_v58  ;;  %v5452_v22 = vld [vmem:[#allocation3 + $0x618] sm:$0xff]   ;;  %v3401_v31 = vpack.c.bf16 %v4196_v4, %v4195_v42 }
 0x1b5   : >> { %5119 = vmatpush3.bf16.msra.mxu0 %v5437_v12  ;;  %5107 = vmatmul.mubr.bf16.gmra.mrb[124].mxu1 %v3122_v14  ;;  %v5451_v14 = vld [vmem:[#allocation3 + $0x610] sm:$0xff]  }
 0x1b6   : >> { %5147 = vmatpush3.bf16.msra.mxu1 %v5438_v60  ;;  %5120 = vmatprep.subr.bf16.mxu0 %v5541_v2 }
 0x1b7   : >> { %5148 = vmatprep.subr.bf16.mxu1 %v5541_v2  ;;  %5082 = vmatprep.mubr.msk.bf16.mxu0 %vm5542_vm0, %v5541_v2 }
 0x1b8   : >> { %5110 = vmatprep.mubr.msk.bf16.mxu1 %vm5542_vm0, %v5541_v2 }
 0x1b9   : >> { %5121 = vmatpush3.bf16.msra.mxu0 %v5439_v23  ;;  %v4181_v23 = vld [vmem:[%s5683_s27 + $0x82] sm:$0xff] }
 0x1ba   : >> { %5149 = vmatpush3.bf16.msra.mxu1 %v5440_v54  ;;  %5122 = vmatprep.subr.bf16.mxu0 %v5541_v2  ;;  %v3262_v54 = vpack.c.bf16 %v4182_v41, %v4181_v23 }
 0x1bb   : >> { %5150 = vmatprep.subr.bf16.mxu1 %v5541_v2 }
 0x1bc   : >> { %5083 = vmatmul.mubr.bf16.gmra.mrb[128].mxu0 %v2984_v16  ;;  %v5454_v16 = vld [vmem:[#allocation3 + $0x628] sm:$0xff]  }
 0x1bd   : >> { %5123 = vmatpush3.bf16.msra.mxu0 %v5441_v34  ;;  %5111 = vmatmul.mubr.bf16.gmra.mrb[128].mxu1 %v3123_v35 }
 0x1be   : >> { %5151 = vmatpush3.bf16.msra.mxu1 %v5442_v38  ;;  %5124 = vmatprep.subr.bf16.mxu0 %v5541_v2 }
 0x1bf   : >> { %v1416_v11 = vpop.f32.mrb[48].mxu0  ;;  %5152 = vmatprep.subr.bf16.mxu1 %v5541_v2  ;;  %5130 = vmatprep.mubr.msk.bf16.mxu0 %vm5542_vm0, %v5541_v2 }
 0x1c0   : >> { %v1439_v28 = vadd.f32 %v1416_v11, %v6319_v46  ;;  %v1555_v13 = vpop.f32.mrb[48].mxu1  ;;  %v4740_v15 = vpop.f32.mrb[49].mxu0  ;;  %5158 = vmatprep.mubr.msk.bf16.mxu1 %vm5542_vm0, %v5541_v2 }
 0x1c1   : >> { %v4768_v32 = vpop.f32.mrb[49].mxu1  ;;  %v1419_v47 = vpop.f32.mrb[50].mxu0  ;;  %5125 = vmatpush3.bf16.msra.mxu0 %v5443_v10 }
 0x1c2   : >> { %v6371_v39 = vadd.f32 %v1555_v13, %v1439_v28  ;;  %v1440_v21 = vadd.f32 %v1419_v47, %v6324_v52  ;;  %v1558_v33 = vpop.f32.mrb[50].mxu1  ;;  %5153 = vmatpush3.bf16.msra.mxu1 %v5444_v43  ;;  %5126 = vmatprep.subr.bf16.mxu0 %v5541_v2  ;;  %v4741_v51 = vpop.f32.mrb[51].mxu0  ;;  %v5455_v28 = vld [vmem:[#allocation3 + $0x630] sm:$0xff]  }
 0x1c3   : >> { %v4769_v46 = vpop.f32.mrb[51].mxu1  ;;  %5154 = vmatprep.subr.bf16.mxu1 %v5541_v2 }
 0x1c4   : >> { %v6376_v59 = vadd.f32 %v1558_v33, %v1440_v21  ;;  %v5456_v21 = vld [vmem:[#allocation3 + $0x638] sm:$0xff]   ;;  %v4208_v33 = vld [vmem:[%s5683_s27 + $0x7c] sm:$0xff] }
 0x1c5   : >> { %5127 = vmatpush3.bf16.msra.mxu0 %v5445_v36 }
 0x1c6   : >> { %5155 = vmatpush3.bf16.msra.mxu1 %v5446_v40  ;;  %5128 = vmatprep.subr.bf16.mxu0 %v5541_v2 }
 0x1c7   : >> { %v1424_v50 = vpop.f32.mrb[52].mxu0  ;;  %5156 = vmatprep.subr.bf16.mxu1 %v5541_v2 }
 0x1c8   : >> { %v4744_v52 = vpop.f32.mrb[53].mxu0  ;;  %v1563_v19 = vpop.f32.mrb[52].mxu1  ;;  %v3539_v50 = vpack.c.bf16 %v4208_v33, %v6299_v8 }
 0x1c9   : >> { %v1427_v29 = vpop.f32.mrb[54].mxu0  ;;  %5129 = vmatpush3.bf16.msra.mxu0 %v5447_v17  ;;  %v4772_v45 = vpop.f32.mrb[53].mxu1 }
 0x1ca   : >> { %v1442_v1 = vadd.f32 %v1427_v29, %v6335_v57  ;;  %5157 = vmatpush3.bf16.msra.mxu1 %v5448_v49  ;;  %v1566_v44 = vpop.f32.mrb[54].mxu1  ;;  %5170 = vmatprep.subr.bf16.mxu0 %v5541_v2  ;;  %v4745_v53 = vpop.f32.mrb[55].mxu0 }
 0x1cb   : >> { %5198 = vmatprep.subr.bf16.mxu1 %v5541_v2  ;;  %v4773_v25 = vpop.f32.mrb[55].mxu1 }
 0x1cc   : >> { %v6387_v37 = vadd.f32 %v1566_v44, %v1442_v1  ;;  %5131 = vmatmul.mubr.bf16.vlgmr.msra.gmra.mrb[132].mxu0 %v3260_v5 }
 0x1cd   : >> { %5159 = vmatmul.mubr.bf16.vlgmr.msra.gmra.mrb[132].mxu1 %v3399_v55  ;;  %5171 = vmatpush3.bf16.msra.mxu0 %v5449_v24  ;;  %v4209_v55 = vld [vmem:[%s5683_s27 + $0x84] sm:$0xff] }
 0x1ce   : >> { %5206 = vmatpush3.bf16.msra.mxu1 %v5449_v24  ;;  %5172 = vmatprep.subr.bf16.mxu0 %v5541_v2  ;;  %v4210_v24 = vld [vmem:[%s5683_s27 + $0x8c] sm:$0xff] }
 0x1cf   : >> { %v1432_v26 = vpop.f32.mrb[56].mxu0  ;;  %5199 = vmatprep.subr.bf16.mxu1 %v5541_v2  ;;  %5134 = vmatprep.mubr.msk.bf16.mxu0 %vm5542_vm0, %v5541_v2  ;;  %v3540_v25 = vpack.c.bf16 %v4210_v24, %v4209_v55 }
 0x1d0   : >> { %v1443_v57 = vadd.f32 %v1432_v26, %v6348_v27  ;;  %v4748_v62 = vpop.f32.mrb[57].mxu0  ;;  %v1571_v58 = vpop.f32.mrb[56].mxu1  ;;  %5162 = vmatprep.mubr.msk.bf16.mxu1 %vm5542_vm0, %v5541_v2 }
 0x1d1   : >> { %v1435_v3 = vpop.f32.mrb[58].mxu0  ;;  %5173 = vmatpush3.bf16.msra.mxu0 %v5450_v6  ;;  %v4776_v12 = vpop.f32.mrb[57].mxu1 }
 0x1d2   : >> { %v6400_v60 = vadd.f32 %v1571_v58, %v1443_v57  ;;  %5207 = vmatpush3.bf16.msra.mxu1 %v5450_v6  ;;  %v1574_v27 = vpop.f32.mrb[58].mxu1  ;;  %5174 = vmatprep.subr.bf16.mxu0 %v5541_v2  ;;  %v4749_v9 = vpop.f32.mrb[59].mxu0 }
 0x1d3   : >> { %5200 = vmatprep.subr.bf16.mxu1 %v5541_v2  ;;  %v4777_v20 = vpop.f32.mrb[59].mxu1 }
 0x1d4   : >> { %5135 = vmatmul.mubr.bf16.gmra.mrb[136].mxu0 %v3261_v56 }
 0x1d5   : >> { %5175 = vmatpush3.bf16.msra.mxu0 %v5451_v14  ;;  %5163 = vmatmul.mubr.bf16.gmra.mrb[136].mxu1 %v3400_v63 }
 0x1d6   : >> { %5208 = vmatpush3.bf16.msra.mxu1 %v5451_v14  ;;  %5176 = vmatprep.subr.bf16.mxu0 %v5541_v2 }
 0x1d7   : >> { %5201 = vmatprep.subr.bf16.mxu1 %v5541_v2  ;;  %5138 = vmatprep.mubr.msk.bf16.mxu0 %vm5542_vm0, %v5541_v2 }
 0x1d8   : >> { %5166 = vmatprep.mubr.msk.bf16.mxu1 %vm5542_vm0, %v5541_v2 }
 0x1d9   : >> { %5177 = vmatpush3.bf16.msra.mxu0 %v5452_v22 }
 0x1da   : >> { %5209 = vmatpush3.bf16.msra.mxu1 %v5452_v22  ;;  %5178 = vmatprep.subr.bf16.mxu0 %v5541_v2 }
 0x1db   : >> { %5202 = vmatprep.subr.bf16.mxu1 %v5541_v2 }
 0x1dc   : >> { %5139 = vmatmul.mubr.bf16.gmra.mrb[140].mxu0 %v3262_v54 }
 0x1dd   : >> { %5179 = vmatpush3.bf16.msra.mxu0 %v5453_v30  ;;  %5167 = vmatmul.mubr.bf16.gmra.mrb[140].mxu1 %v3401_v31 }
 0x1de   : >> { %5210 = vmatpush3.bf16.msra.mxu1 %v5453_v30  ;;  %5180 = vmatprep.subr.bf16.mxu0 %v5541_v2 }
 0x1df   : >> { %v1694_v34 = vpop.f32.mrb[60].mxu0  ;;  %5203 = vmatprep.subr.bf16.mxu1 %v5541_v2  ;;  %5186 = vmatprep.mubr.msk.bf16.mxu0 %vm5542_vm0, %v5541_v2 }
 0x1e0   : >> { %v1717_v35 = vadd.f32 %v1694_v34, %v6371_v39  ;;  %v1833_v38 = vpop.f32.mrb[60].mxu1  ;;  %v4796_v10 = vpop.f32.mrb[61].mxu0  ;;  %5190 = vmatprep.mubr.msk.bf16.mxu1 %vm5542_vm0, %v5541_v2 }
 0x1e1   : >> { %v4824_v43 = vpop.f32.mrb[61].mxu1  ;;  %v1697_v11 = vpop.f32.mrb[62].mxu0  ;;  %5181 = vmatpush3.bf16.msra.mxu0 %v5454_v16 }
 0x1e2   : >> { %v1856_v13 = vadd.f32 %v1833_v38, %v1717_v35  ;;  %v1718_v15 = vadd.f32 %v1697_v11, %v6376_v59  ;;  %v1836_v32 = vpop.f32.mrb[62].mxu1  ;;  %5211 = vmatpush3.bf16.msra.mxu1 %v5454_v16  ;;  %5182 = vmatprep.subr.bf16.mxu0 %v5541_v2  ;;  %v4797_v47 = vpop.f32.mrb[63].mxu0  ;;  %v3538_v59 = vpack.c.bf16 %v6296_v7, %v6272_v48 }
 0x1e3   : >> { %v4825_v36 = vpop.f32.mrb[63].mxu1  ;;  %5204 = vmatprep.subr.bf16.mxu1 %v5541_v2 }
 0x1e4   : >> { %v1857_v39 = vadd.f32 %v1836_v32, %v1718_v15 }
 0x1e5   : >> { %5183 = vmatpush3.bf16.msra.mxu0 %v5455_v28 }
 0x1e6   : >> { %5212 = vmatpush3.bf16.msra.mxu1 %v5455_v28  ;;  %5184 = vmatprep.subr.bf16.mxu0 %v5541_v2 }
 0x1e7   : >> { %v1702_v40 = vpop.f32.mrb[64].mxu0  ;;  %5205 = vmatprep.subr.bf16.mxu1 %v5541_v2 }
 0x1e8   : >> { %v4800_v51 = vpop.f32.mrb[65].mxu0  ;;  %v1841_v46 = vpop.f32.mrb[64].mxu1 }
 0x1e9   : >> { %v1705_v17 = vpop.f32.mrb[66].mxu0  ;;  %5185 = vmatpush3.bf16.msra.mxu0 %v5456_v21  ;;  %v4828_v49 = vpop.f32.mrb[65].mxu1 }
 0x1ea   : >> { %v1720_v52 = vadd.f32 %v1705_v17, %v6387_v37  ;;  %5213 = vmatpush3.bf16.msra.mxu1 %v5456_v21  ;;  %v1844_v19 = vpop.f32.mrb[66].mxu1  ;;  %v4801_v5 = vpop.f32.mrb[67].mxu0 }
 0x1eb   : >> { %v4829_v29 = vpop.f32.mrb[67].mxu1 }
 0x1ec   : >> { %v1859_v45 = vadd.f32 %v1844_v19, %v1720_v52  ;;  %5187 = vmatmul.mubr.bf16.vlgmr.msra.gmra.mrb[144].mxu0 %v3538_v59 }
 0x1ed   : >> { %5191 = vmatmul.mubr.bf16.vlgmr.msra.gmra.mrb[144].mxu1 %v3539_v50 }
 0x1ee   : >> { %5194 = vmatprep.mubr.msk.bf16.mxu1 %vm5542_vm0, %v5541_v2 }
 0x1ef   : >> { %v1710_v48 = vpop.f32.mrb[68].mxu0 }
 0x1f0   : >> { %v1721_v7 = vadd.f32 %v1710_v48, %v6400_v60  ;;  %v4804_v1 = vpop.f32.mrb[69].mxu0  ;;  %v1849_v44 = vpop.f32.mrb[68].mxu1 }
 0x1f1   : >> { %v1713_v8 = vpop.f32.mrb[70].mxu0  ;;  %v4832_v53 = vpop.f32.mrb[69].mxu1 }
 0x1f2   : >> { %v1860_v37 = vadd.f32 %v1849_v44, %v1721_v7  ;;  %v1852_v6 = vpop.f32.mrb[70].mxu1  ;;  %v4805_v61 = vpop.f32.mrb[71].mxu0 }
 0x1f3   : >> { %v4833_v18 = vpop.f32.mrb[71].mxu1 }
 0x1f5   : >> { %5195 = vmatmul.mubr.bf16.gmra.mrb[148].mxu1 %v3540_v25 }
 0x1ff   : >> { %v1972_v26 = vpop.f32.mrb[72].mxu0 }
 0x200   : >> { %v1995_v57 = vadd.f32 %v1972_v26, %v1856_v13  ;;  %v2111_v62 = vpop.f32.mrb[72].mxu1  ;;  %v4852_v58 = vpop.f32.mrb[73].mxu0 }
 0x201   : >> { %v4880_v2 = vpop.f32.mrb[73].mxu1  ;;  %v1975_v56 = vpop.f32.mrb[74].mxu0 }
 0x202   : >> { %v2134_v3 = vadd.f32 %v2111_v62, %v1995_v57  ;;  %v1996_v12 = vadd.f32 %v1975_v56, %v1857_v39  ;;  %v2114_v14 = vpop.f32.mrb[74].mxu1  ;;  %v4853_v63 = vpop.f32.mrb[75].mxu0 }
 0x203   : >> { %v4881_v60 = vpop.f32.mrb[75].mxu1 }
 0x204   : >> { %v2135_v27 = vadd.f32 %v2114_v14, %v1996_v12 }
 0x207   : >> { %v1980_v9 = vpop.f32.mrb[76].mxu0 }
 0x208   : >> { %v4856_v20 = vpop.f32.mrb[77].mxu0  ;;  %v2119_v22 = vpop.f32.mrb[76].mxu1 }
 0x209   : >> { %v1983_v23 = vpop.f32.mrb[78].mxu0  ;;  %v4884_v41 = vpop.f32.mrb[77].mxu1 }
 0x20a   : >> { %v1998_v42 = vadd.f32 %v1983_v23, %v1859_v45  ;;  %v2122_v4 = vpop.f32.mrb[78].mxu1  ;;  %v4857_v54 = vpop.f32.mrb[79].mxu0 }
 0x20b   : >> { %v4885_v30 = vpop.f32.mrb[79].mxu1 }
 0x20c   : >> { %v2137_v31 = vadd.f32 %v2122_v4, %v1998_v42 }
 0x20f   : >> { %v1988_v16 = vpop.f32.mrb[80].mxu0 }
 0x210   : >> { %v1999_v34 = vadd.f32 %v1988_v16, %v1860_v37  ;;  %v4860_v35 = vpop.f32.mrb[81].mxu0  ;;  %v2127_v38 = vpop.f32.mrb[80].mxu1 }
 0x211   : >> { %v1991_v10 = vpop.f32.mrb[82].mxu0  ;;  %v4888_v43 = vpop.f32.mrb[81].mxu1 }
 0x212   : >> { %v2138_v11 = vadd.f32 %v2127_v38, %v1999_v34  ;;  %v2130_v28 = vpop.f32.mrb[82].mxu1  ;;  %v4861_v13 = vpop.f32.mrb[83].mxu0 }
 0x213   : >> { %v4889_v15 = vpop.f32.mrb[83].mxu1 }
 0x21f   : >> { %v2250_v32 = vpop.f32.mrb[84].mxu0 }
 0x220   : >> { %v2273_v47 = vadd.f32 %v2250_v32, %v2134_v3  ;;  %v2389_v36 = vpop.f32.mrb[84].mxu1  ;;  %v4908_v39 = vpop.f32.mrb[85].mxu0 }
 0x221   : >> { %v4936_v21 = vpop.f32.mrb[85].mxu1  ;;  %v2253_v33 = vpop.f32.mrb[86].mxu0 }
 0x222   : >> { %v2412_v40 = vadd.f32 %v2389_v36, %v2273_v47  ;;  %v2274_v51 = vadd.f32 %v2253_v33, %v2135_v27  ;;  %v2392_v46 = vpop.f32.mrb[86].mxu1  ;;  %v4909_v59 = vpop.f32.mrb[87].mxu0 }
 0x223   : >> { %v4937_v17 = vpop.f32.mrb[87].mxu1 }
 0x224   : >> { %v2413_v49 = vadd.f32 %v2392_v46, %v2274_v51 }
 0x227   : >> { %v2258_v50 = vpop.f32.mrb[88].mxu0 }
 0x228   : >> { %v4912_v52 = vpop.f32.mrb[89].mxu0  ;;  %v2397_v19 = vpop.f32.mrb[88].mxu1 }
 0x229   : >> { %v2261_v5 = vpop.f32.mrb[90].mxu0  ;;  %v4940_v29 = vpop.f32.mrb[89].mxu1 }
 0x22a   : >> { %v2276_v45 = vadd.f32 %v2261_v5, %v2137_v31  ;;  %v2400_v55 = vpop.f32.mrb[90].mxu1  ;;  %v4913_v24 = vpop.f32.mrb[91].mxu0 }
 0x22b   : >> { %v4941_v48 = vpop.f32.mrb[91].mxu1 }
 0x22c   : >> { %v2415_v7 = vadd.f32 %v2400_v55, %v2276_v45 }
 0x22f   : >> { %v2266_v1 = vpop.f32.mrb[92].mxu0 }
 0x230   : >> { %v2277_v44 = vadd.f32 %v2266_v1, %v2138_v11  ;;  %v4916_v8 = vpop.f32.mrb[93].mxu0  ;;  %v2405_v53 = vpop.f32.mrb[92].mxu1 }
 0x231   : >> { %v2269_v25 = vpop.f32.mrb[94].mxu0  ;;  %v4944_v37 = vpop.f32.mrb[93].mxu1 }
 0x232   : >> { %v2416_v6 = vadd.f32 %v2405_v53, %v2277_v44  ;;  %v2408_v61 = vpop.f32.mrb[94].mxu1  ;;  %v4917_v18 = vpop.f32.mrb[95].mxu0 }
 0x233   : >> { %v4945_v26 = vpop.f32.mrb[95].mxu1 }
 0x23f   : >> { %v2528_v57 = vpop.f32.mrb[96].mxu0 }
 0x240   : >> { %v2551_v62 = vadd.f32 %v2528_v57, %v2412_v40  ;;  %v2667_v58 = vpop.f32.mrb[96].mxu1  ;;  %v4964_v2 = vpop.f32.mrb[97].mxu0 }
 0x241   : >> { %v4992_v56 = vpop.f32.mrb[97].mxu1  ;;  %v2531_v3 = vpop.f32.mrb[98].mxu0 }
 0x242   : >> { %v2690_v12 = vadd.f32 %v2667_v58, %v2551_v62  ;;  %v2552_v14 = vadd.f32 %v2531_v3, %v2413_v49  ;;  %v2670_v63 = vpop.f32.mrb[98].mxu1  ;;  %v4965_v60 = vpop.f32.mrb[99].mxu0 }
 0x243   : >> { %v4993_v27 = vpop.f32.mrb[99].mxu1 }
 0x244   : >> { %v2691_v9 = vadd.f32 %v2670_v63, %v2552_v14 }
 0x247   : >> { %v2536_v20 = vpop.f32.mrb[100].mxu0 }
 0x248   : >> { %v4968_v22 = vpop.f32.mrb[101].mxu0  ;;  %v2675_v23 = vpop.f32.mrb[100].mxu1 }
 0x249   : >> { %v2539_v41 = vpop.f32.mrb[102].mxu0  ;;  %v4996_v42 = vpop.f32.mrb[101].mxu1 }
 0x24a   : >> { %v2554_v4 = vadd.f32 %v2539_v41, %v2415_v7  ;;  %v2678_v54 = vpop.f32.mrb[102].mxu1  ;;  %v4969_v30 = vpop.f32.mrb[103].mxu0 }
 0x24b   : >> { %v4997_v31 = vpop.f32.mrb[103].mxu1 }
 0x24c   : >> { %v2693_v16 = vadd.f32 %v2678_v54, %v2554_v4 }
 0x24f   : >> { %v2544_v34 = vpop.f32.mrb[104].mxu0 }
 0x250   : >> { %v2555_v35 = vadd.f32 %v2544_v34, %v2416_v6  ;;  %v4972_v38 = vpop.f32.mrb[105].mxu0  ;;  %v2683_v10 = vpop.f32.mrb[104].mxu1 }
 0x251   : >> { %v2547_v43 = vpop.f32.mrb[106].mxu0  ;;  %v5000_v11 = vpop.f32.mrb[105].mxu1 }
 0x252   : >> { %v2694_v28 = vadd.f32 %v2683_v10, %v2555_v35  ;;  %v2686_v13 = vpop.f32.mrb[106].mxu1  ;;  %v4973_v15 = vpop.f32.mrb[107].mxu0 }
 0x253   : >> { %v5001_v32 = vpop.f32.mrb[107].mxu1 }
 0x25f   : >> { %v2806_v47 = vpop.f32.mrb[108].mxu0 }
 0x260   : >> { %v2829_v36 = vadd.f32 %v2806_v47, %v2690_v12  ;;  %v2945_v39 = vpop.f32.mrb[108].mxu1  ;;  %v5020_v21 = vpop.f32.mrb[109].mxu0 }
 0x261   : >> { %v5048_v33 = vpop.f32.mrb[109].mxu1  ;;  %v2809_v40 = vpop.f32.mrb[110].mxu0 }
 0x262   : >> { %v2968_v51 = vadd.f32 %v2945_v39, %v2829_v36  ;;  %v2830_v46 = vadd.f32 %v2809_v40, %v2691_v9  ;;  %v2948_v59 = vpop.f32.mrb[110].mxu1  ;;  %v5021_v17 = vpop.f32.mrb[111].mxu0 }
 0x263   : >> { %v5049_v49 = vpop.f32.mrb[111].mxu1 }
 0x264   : >> { %v2969_v50 = vadd.f32 %v2948_v59, %v2830_v46 }
 0x267   : >> { %v2814_v52 = vpop.f32.mrb[112].mxu0 }
 0x268   : >> { %v5024_v19 = vpop.f32.mrb[113].mxu0  ;;  %v2953_v5 = vpop.f32.mrb[112].mxu1 }
 0x269   : >> { %v2817_v29 = vpop.f32.mrb[114].mxu0  ;;  %v5052_v45 = vpop.f32.mrb[113].mxu1 }
 0x26a   : >> { %v2832_v55 = vadd.f32 %v2817_v29, %v2693_v16  ;;  %v2956_v24 = vpop.f32.mrb[114].mxu1  ;;  %v5025_v48 = vpop.f32.mrb[115].mxu0 }
 0x26b   : >> { %v5053_v7 = vpop.f32.mrb[115].mxu1 }
 0x26c   : >> { %v2971_v1 = vadd.f32 %v2956_v24, %v2832_v55 }
 0x26f   : >> { %v2822_v44 = vpop.f32.mrb[116].mxu0 }
 0x270   : >> { %v2833_v8 = vadd.f32 %v2822_v44, %v2694_v28  ;;  %v5028_v53 = vpop.f32.mrb[117].mxu0  ;;  %v2961_v25 = vpop.f32.mrb[116].mxu1 }
 0x271   : >> { %v2825_v37 = vpop.f32.mrb[118].mxu0  ;;  %v5056_v6 = vpop.f32.mrb[117].mxu1 }
 0x272   : >> { %v2972_v61 = vadd.f32 %v2961_v25, %v2833_v8  ;;  %v2964_v18 = vpop.f32.mrb[118].mxu1  ;;  %v5029_v26 = vpop.f32.mrb[119].mxu0 }
 0x273   : >> { %v5057_v57 = vpop.f32.mrb[119].mxu1 }
 0x27f   : >> { %v3084_v62 = vpop.f32.mrb[120].mxu0 }
 0x280   : >> { %v3107_v58 = vadd.f32 %v3084_v62, %v2968_v51  ;;  %v3223_v2 = vpop.f32.mrb[120].mxu1  ;;  %v5076_v56 = vpop.f32.mrb[121].mxu0 }
 0x281   : >> { %v5104_v3 = vpop.f32.mrb[121].mxu1  ;;  %v3087_v12 = vpop.f32.mrb[122].mxu0 }
 0x282   : >> { %v3246_v14 = vadd.f32 %v3223_v2, %v3107_v58  ;;  %v3108_v63 = vadd.f32 %v3087_v12, %v2969_v50  ;;  %v3226_v60 = vpop.f32.mrb[122].mxu1  ;;  %v5077_v27 = vpop.f32.mrb[123].mxu0 }
 0x283   : >> { %v5105_v9 = vpop.f32.mrb[123].mxu1 }
 0x284   : >> { %v3247_v20 = vadd.f32 %v3226_v60, %v3108_v63 }
 0x287   : >> { %v3092_v22 = vpop.f32.mrb[124].mxu0 }
 0x288   : >> { %v5080_v23 = vpop.f32.mrb[125].mxu0  ;;  %v3231_v41 = vpop.f32.mrb[124].mxu1 }
 0x289   : >> { %v3095_v42 = vpop.f32.mrb[126].mxu0  ;;  %v5108_v4 = vpop.f32.mrb[125].mxu1 }
 0x28a   : >> { %v3110_v54 = vadd.f32 %v3095_v42, %v2971_v1  ;;  %v3234_v30 = vpop.f32.mrb[126].mxu1  ;;  %v5081_v31 = vpop.f32.mrb[127].mxu0 }
 0x28b   : >> { %v5109_v16 = vpop.f32.mrb[127].mxu1 }
 0x28c   : >> { %v3249_v34 = vadd.f32 %v3234_v30, %v3110_v54 }
 0x28f   : >> { %v3100_v35 = vpop.f32.mrb[128].mxu0 }
 0x290   : >> { %v3111_v38 = vadd.f32 %v3100_v35, %v2972_v61  ;;  %v5084_v10 = vpop.f32.mrb[129].mxu0  ;;  %v3239_v43 = vpop.f32.mrb[128].mxu1 }
 0x291   : >> { %v3103_v11 = vpop.f32.mrb[130].mxu0  ;;  %v5112_v28 = vpop.f32.mrb[129].mxu1 }
 0x292   : >> { %v3250_v13 = vadd.f32 %v3239_v43, %v3111_v38  ;;  %v3242_v15 = vpop.f32.mrb[130].mxu1  ;;  %v5085_v32 = vpop.f32.mrb[131].mxu0 }
 0x293   : >> { %v5113_v47 = vpop.f32.mrb[131].mxu1  ;;  %v3703_v32 = vld [vmem:[%s3699_s29] sm:$0xf] }
 0x29f   : >> { %v3362_v36 = vpop.f32.mrb[132].mxu0 }
 0x2a0   : >> { %v3385_v39 = vadd.f32 %v3362_v36, %v3246_v14  ;;  %v3501_v21 = vpop.f32.mrb[132].mxu1  ;;  %v5132_v33 = vpop.f32.mrb[133].mxu0 }
 0x2a1   : >> { %v5160_v40 = vpop.f32.mrb[133].mxu1  ;;  %v3365_v51 = vpop.f32.mrb[134].mxu0 }
 0x2a2   : >> { %v3524_v46 = vadd.f32 %v3501_v21, %v3385_v39  ;;  %v3386_v59 = vadd.f32 %v3365_v51, %v3247_v20  ;;  %v3504_v17 = vpop.f32.mrb[134].mxu1  ;;  %v5133_v49 = vpop.f32.mrb[135].mxu0 }
 0x2a3   : >> { %v5161_v50 = vpop.f32.mrb[135].mxu1 }
 0x2a4   : >> { %v3525_v52 = vadd.f32 %v3504_v17, %v3386_v59 }
 0x2a7   : >> { %v3370_v19 = vpop.f32.mrb[136].mxu0 }
 0x2a8   : >> { %v5136_v5 = vpop.f32.mrb[137].mxu0  ;;  %v3509_v29 = vpop.f32.mrb[136].mxu1 }
 0x2a9   : >> { %v3373_v45 = vpop.f32.mrb[138].mxu0  ;;  %v5164_v55 = vpop.f32.mrb[137].mxu1 }
 0x2aa   : >> { %v3388_v24 = vadd.f32 %v3373_v45, %v3249_v34  ;;  %v3512_v48 = vpop.f32.mrb[138].mxu1  ;;  %v5137_v7 = vpop.f32.mrb[139].mxu0 }
 0x2ab   : >> { %v5165_v1 = vpop.f32.mrb[139].mxu1 }
 0x2ac   : >> { %v3527_v44 = vadd.f32 %v3512_v48, %v3388_v24 }
 0x2af   : >> { %v3378_v8 = vpop.f32.mrb[140].mxu0 }
 0x2b0   : >> { %v3389_v53 = vadd.f32 %v3378_v8, %v3250_v13  ;;  %v5140_v25 = vpop.f32.mrb[141].mxu0  ;;  %v3517_v37 = vpop.f32.mrb[140].mxu1 }
 0x2b1   : >> { %v3381_v6 = vpop.f32.mrb[142].mxu0  ;;  %v5168_v61 = vpop.f32.mrb[141].mxu1 }
 0x2b2   : >> { %v3528_v18 = vadd.f32 %v3517_v37, %v3389_v53  ;;  %v3520_v26 = vpop.f32.mrb[142].mxu1  ;;  %v5141_v57 = vpop.f32.mrb[143].mxu0 }
 0x2b3   : >> { %v5169_v62 = vpop.f32.mrb[143].mxu1 }
 0x2bf   : >> { %v3640_v58 = vpop.f32.mrb[144].mxu0 }
 0x2c0   : >> { %v3663_v2 = vadd.f32 %v3640_v58, %v3524_v46  ;;  %v3648_v56 = vpop.f32.mrb[144].mxu1  ;;  %v5188_v3 = vpop.f32.mrb[145].mxu0 }
 0x2c1   : >> { %v5192_v12 = vpop.f32.mrb[145].mxu1  ;;  %v3643_v14 = vpop.f32.mrb[146].mxu0 }
 0x2c2   : >> { %v3664_v63 = vadd.f32 %v3643_v14, %v3525_v52  ;;  %v3651_v60 = vpop.f32.mrb[146].mxu1  ;;  %v5189_v27 = vpop.f32.mrb[147].mxu0  ;;  %v3675_v9 = vadd.f32 %v5653_v0, %v3663_v2 }
 0x2c3   : >> { %v3666_v20 = vadd.f32 %v3651_v60, %v3527_v44  ;;  %v5193_v22 = vpop.f32.mrb[147].mxu1 }
 0x2c4   : >> { %v3681_v41 = vmax.f32 %v3675_v9, 0.0  ;;  %v3676_v54 = vadd.f32 %v5653_v0, %v3664_v63 }
 0x2c5   : >> { %v3678_v23 = vadd.f32 %v5653_v0, %v3666_v20 }
 0x2c6   : >> { %v3682_v10 = vmax.f32 %v3676_v54, 0.0 }
 0x2c7   : >> { %v3684_v42 = vmax.f32 %v3678_v23, 0.0 }
 0x2c8   : >> { %v3656_v4 = vpop.f32.mrb[148].mxu1 }
 0x2c9   : >> { %v3687_v30 = vmax.f32 %v3681_v41, %v3684_v42  ;;  %v3667_v31 = vadd.f32 %v3656_v4, %v3528_v18  ;;  %v5196_v16 = vpop.f32.mrb[149].mxu1 }
 0x2ca   : >> { %v3659_v34 = vpop.f32.mrb[150].mxu1 }
 0x2cb   : >> { %3690 = vst [vmem:[#allocation2] sm:$0xff] %v3687_v30  ;;  %v3679_v35 = vadd.f32 %v5653_v0, %v3667_v31  ;;  %v5197_v38 = vpop.f32.mrb[151].mxu1 }
 0x2cd   : >> { %v3685_v43 = vmax.f32 %v3679_v35, 0.0 }
 0x2cf   : >> { %v3688_v11 = vmax.f32 %v3682_v10, %v3685_v43 }
 0x2d1   : >> { %3691 = vst [vmem:[#allocation2 + $0x8] sm:$0xff] %v3688_v11 }
 0x2d8   : >> { %v3693_v28 = vld [vmem:[#allocation2] ss:$2 sm:$0xff]  ;;  %v3695_v13 = vld [vmem:[#allocation2 + $0x1] ss:$2 sm:$0xff]  ;;  %205 = sbr.rel (!%p203_p5) target bundleno = 75 (0x4b), region = 129 }
 0x2d9   : >> { %v3696_v15 = vmax.f32 %v3693_v28, %v3695_v13 }
 0x2db   : >> { %v3697_v47 = vpack.c.bf16 %v3696_v15, %v3696_v15 }
 0x2dd   : >> { %v3704_v36 = vsel %vm3702_vm3, %v3697_v47, %v3703_v32 }
 0x2de   : >> { %3705 = vst [vmem:[%s3699_s29] sm:$0xf] %v3704_v36 }
 0x2df PF: > { %s15_s12 = sadd.s32 1, %s5531_s12  }
 0x2e0   : > { %p12_p10 = scmp.ge.s32.totalorder %s15_s12, 4  }
 0x2e2   :  { %14 = sbr.rel (!%p12_p10) target bundleno = 2 (0x2), region = 140 }
 0x2e9   :  { %3727 = vsyncpa [#allocation4], 1 }
 0x2ea   :  { %3729 = vsyncpa [#allocation4 + $0x1], 1 }
 0x2eb   :  { %3730 = vsyncpa [#allocation6], 1 }

</bundles_post_ra>
